<compile_context>
chip_gen: v7x
topology: tpu7x:2x2x1
jax: 0.10.0
libtpu: 0.0.40
codegen_flags: <defaults>
</compile_context>

<pallas_src>
import functools

import jax
import jax.numpy as jnp
import numpy as np
from jax.experimental import pallas as pl
from jax.experimental.pallas import tpu as pltpu


# --------------------------------------------------------------------------
# Fused kernel
# --------------------------------------------------------------------------
def _fused_kernel(*refs, T, P, H, n_layers):
    (x_ref, len_ref, w_in_t_ref, ln_g_ref, ln_b_ref) = refs[:5]
    lstm_refs = refs[5:5 + 3 * n_layers]
    (a_ref, m_ref, num_ref, wout_t_ref, wcls_t_ref,
     out_ref, code_ref) = refs[5 + 3 * n_layers:]

    # ---- input_linear (no bias) + LayerNorm + tanh over all T*P rows ----
    y = jnp.dot(x_ref[...], w_in_t_ref[...], preferred_element_type=jnp.float32)
    mu = jnp.mean(y, axis=-1, keepdims=True)
    var = jnp.mean(jnp.square(y - mu), axis=-1, keepdims=True)
    inp = jnp.tanh((y - mu) * jax.lax.rsqrt(var + 1e-5) * ln_g_ref[...]
                   + ln_b_ref[...])                       # (T*P, E), time-major rows
    # TODO(synk): input_dropout skipped (dropout_prob=0.0 -> module has no dropout).

    len_col = len_ref[...]                                # (P, 1) int32

    h = jnp.zeros((P, H), jnp.float32)
    for layer in range(n_layers):
        wih_t_ref = lstm_refs[3 * layer + 0]              # (4, In, H) per-gate W_ih^T
        whh_t_ref = lstm_refs[3 * layer + 1]              # (4, H,  H) per-gate W_hh^T
        b_ref = lstm_refs[3 * layer + 2]                  # (4, 1,  H) b_ih + b_hh

        # Hoisted input contribution to the gates: matmuls over ALL T*P rows,
        # outside the serial recurrence.  Gate order: i, f, g, o (PyTorch).
        gx = [jnp.dot(inp, wih_t_ref[k], preferred_element_type=jnp.float32)
              + b_ref[k] for k in range(4)]               # 4 x (T*P, H)
        whh = [whh_t_ref[k] for k in range(4)]            # 4 x (H, H)

        h = jnp.zeros((P, H), jnp.float32)
        c = jnp.zeros((P, H), jnp.float32)
        last = layer == n_layers - 1
        outs = []
        for t in range(T):                                # fully unrolled (T static)
            r = t * P                                     # sublane-aligned row offset
            i_g = jax.nn.sigmoid(
                gx[0][r:r + P, :]
                + jnp.dot(h, whh[0], preferred_element_type=jnp.float32))
            f_g = jax.nn.sigmoid(
                gx[1][r:r + P, :]
                + jnp.dot(h, whh[1], preferred_element_type=jnp.float32))
            g_g = jnp.tanh(
                gx[2][r:r + P, :]
                + jnp.dot(h, whh[2], preferred_element_type=jnp.float32))
            o_g = jax.nn.sigmoid(
                gx[3][r:r + P, :]
                + jnp.dot(h, whh[3], preferred_element_type=jnp.float32))
            c_new = f_g * c + i_g * g_g
            h_new = o_g * jnp.tanh(c_new)
            valid = t < len_col                           # (P, 1) bool
            h = jnp.where(valid, h_new, h)                # freeze past the length
            c = jnp.where(valid, c_new, c)                # (== packed-sequence h_n)
            if not last:
                outs.append(h)
        if not last:
            inp = jnp.concatenate(outs, axis=0)           # (T*P, H), time-major
    h_last = h                                            # == h_n[-1] of packed LSTM

    # ---- per-group attention softmax + mean pool + out_linear + classifier ----
    a = a_ref[...]                                        # (1, H)
    s = jnp.sum(h_last * a, axis=-1, keepdims=True)       # (P, 1) scores (VPU reduce)
    m = m_ref[...]                                        # (P, G) group one-hot mask
    sm = jnp.where(m > 0.5, s, -1e30)                     # (P, G)
    mx = jnp.max(sm, axis=0, keepdims=True)               # (1, G)
    e = jnp.where(m > 0.5, jnp.exp(sm - mx), 0.0)         # (P, G)
    denom = jnp.sum(e, axis=0, keepdims=True)             # (1, G)
    # fold softmax normalisation and the mean's 1/n into one scale
    attn = e * pl.reciprocal(denom * num_ref[...], approx=True)        # (P, G)
    pooled = jnp.dot(attn.T, h_last, preferred_element_type=jnp.float32)  # (G, H)
    code = jnp.dot(pooled, wout_t_ref[...], preferred_element_type=jnp.float32)
    code_ref[...] = code                                                  # (G, V)
    out_ref[...] = jnp.dot(code, wcls_t_ref[...],
                           preferred_element_type=jnp.float32)            # (G, L)


# --------------------------------------------------------------------------
# Wrapper: weight pre-transpose / per-gate split + single pallas_call
# --------------------------------------------------------------------------
@functools.partial(jax.jit, static_argnames=("path_nums",))
def flaky_detect_forward(params, inputs, path_lengths, path_nums):
    P, T, Din = inputs.shape
    E = params["w_in"].shape[0]
    H = params["lstm"][0]["w_hh"].shape[1]
    n_layers = len(params["lstm"])
    G = len(path_nums)
    V = params["w_out"].shape[0]
    L = params["w_cls"].shape[0]

    # time-major rows so the recurrence reads contiguous sublane-aligned (P, .) rows
    x_tm = inputs.transpose(1, 0, 2).reshape(T * P, Din)
    lengths = jnp.asarray(path_lengths, jnp.int32).reshape(P, 1)

    # pre-transpose / pre-split all weights once in XLA (no in-kernel weight .T)
    w_in_t = params["w_in"].T                              # (Din, E)
    ln_g = params["ln_gamma"].reshape(1, E)
    ln_b = params["ln_beta"].reshape(1, E)
    lstm_args = []
    for lyr in params["lstm"]:
        in_sz = lyr["w_ih"].shape[1]
        lstm_args.append(lyr["w_ih"].reshape(4, H, in_sz).transpose(0, 2, 1))  # (4,In,H)
        lstm_args.append(lyr["w_hh"].reshape(4, H, H).transpose(0, 2, 1))      # (4,H,H)
        lstm_args.append((lyr["b_ih"] + lyr["b_hh"]).reshape(4, 1, H))         # (4,1,H)

    # (P, G) one-hot group membership + group sizes from static path_nums
    offsets = np.concatenate([[0], np.cumsum(path_nums)])
    idx = np.arange(P)
    mask_np = np.stack(
        [((idx >= offsets[g]) & (idx < offsets[g + 1])).astype(np.float32)
         for g in range(G)], axis=1)                       # (P, G)
    group_mask = jnp.asarray(mask_np)
    group_sizes = jnp.asarray(np.asarray(path_nums, np.float32).reshape(1, G))

    args = [x_tm, lengths, w_in_t, ln_g, ln_b, *lstm_args,
            params["attn"].reshape(1, H), group_mask, group_sizes,
            params["w_out"].T, params["w_cls"].T]

    kernel = functools.partial(_fused_kernel, T=T, P=P, H=H, n_layers=n_layers)
    in_specs = [pl.BlockSpec(tuple(a.shape), lambda i, nd=a.ndim: (0,) * nd)
                for a in args]

    outputs, code_vectors = pl.pallas_call(
        kernel,
        out_shape=(jax.ShapeDtypeStruct((G, L), jnp.float32),
                   jax.ShapeDtypeStruct((G, V), jnp.float32)),
        grid=(1,),
        in_specs=in_specs,
        out_specs=(pl.BlockSpec((G, L), lambda i: (0, 0)),
                   pl.BlockSpec((G, V), lambda i: (0, 0))),
        compiler_params=pltpu.CompilerParams(dimension_semantics=("arbitrary",)),
    )(*args)
    return outputs, code_vectors, params["attn"]


# --------------------------------------------------------------------------
# Pure-JAX reference (mirrors the PyTorch forward exactly)
# --------------------------------------------------------------------------
def reference_forward(params, inputs, path_lengths, path_nums):
    y = inputs @ params["w_in"].T
    mu = y.mean(-1, keepdims=True)
    var = ((y - mu) ** 2).mean(-1, keepdims=True)
    y = jnp.tanh((y - mu) / jnp.sqrt(var + 1e-5) * params["ln_gamma"]
                 + params["ln_beta"])
    P, T, _ = y.shape
    lengths = jnp.asarray(path_lengths, jnp.int32)
    seq = y
    h = None
    for lyr in params["lstm"]:
        H = lyr["w_hh"].shape[1]
        h = jnp.zeros((P, H), jnp.float32)
        c = jnp.zeros((P, H), jnp.float32)
        outs = []
        for t in range(T):
            x_t = seq[:, t, :]
            gates = (x_t @ lyr["w_ih"].T + h @ lyr["w_hh"].T
                     + lyr["b_ih"] + lyr["b_hh"])
            i_g = jax.nn.sigmoid(gates[:, :H])
            f_g = jax.nn.sigmoid(gates[:, H:2 * H])
            g_g = jnp.tanh(gates[:, 2 * H:3 * H])
            o_g = jax.nn.sigmoid(gates[:, 3 * H:])
            c_new = f_g * c + i_g * g_g
            h_new = o_g * jnp.tanh(c_new)
            m = (t < lengths).astype(jnp.float32)[:, None]
            h = m * h_new + (1.0 - m) * h
            c = m * c_new + (1.0 - m) * c
            outs.append(h)
        seq = jnp.stack(outs, axis=1)
    h_last = h
    a = params["attn"]
    codes = []
    off = 0
    for n in path_nums:
        v = h_last[off:off + n]
        s = (v * a[None, :]).sum(1)
        attn = jax.nn.softmax(s)[:, None]
        codes.append((v * attn).mean(0))
        off += n
    code = jnp.stack(codes, 0) @ params["w_out"].T
    out = code @ params["w_cls"].T
    return out, code, params["attn"]


# --------------------------------------------------------------------------
# Deterministic parameter init (shapes follow the module's __init__)
# --------------------------------------------------------------------------
def init_params(key, token_embed, method_embed, encode, hidden, n_layers,
                test_vec, labels):
    din = token_embed + method_embed
    keys = jax.random.split(key, 4 + 4 * n_layers)
    k = iter(keys)
    params = {
        "w_in": 0.1 * jax.random.normal(next(k), (encode, din), jnp.float32),
        "ln_gamma": jnp.ones((encode,), jnp.float32),
        "ln_beta": jnp.zeros((encode,), jnp.float32),
        "w_out": 0.1 * jax.random.normal(next(k), (test_vec, hidden), jnp.float32),
        "w_cls": 0.1 * jax.random.normal(next(k), (labels, test_vec), jnp.float32),
        # xavier_normal_ on (hidden, 1) then flattened
        "attn": jnp.sqrt(2.0 / (hidden + 1)) *
                jax.random.normal(next(k), (hidden,), jnp.float32),
        "lstm": [],
    }
    for layer in range(n_layers):
        in_sz = encode if layer == 0 else hidden
        params["lstm"].append({
            "w_ih": 0.1 * jax.random.normal(next(k), (4 * hidden, in_sz), jnp.float32),
            "w_hh": 0.1 * jax.random.normal(next(k), (4 * hidden, hidden), jnp.float32),
            "b_ih": 0.1 * jax.random.normal(next(k), (4 * hidden,), jnp.float32),
            "b_hh": 0.1 * jax.random.normal(next(k), (4 * hidden,), jnp.float32),
        })
    return params


if __name__ == "__main__":
    # option: token_embed_size=16, method_embed_size=16, encode_size=32,
    #         hidden_dim=32, n_layers=2, test_vector_size=16, label_count=2,
    #         dropout_prob=0.0
    TOKEN_EMBED, METHOD_EMBED = 16, 16
    ENCODE, HIDDEN, N_LAYERS = 32, 32, 2
    TEST_VEC, LABELS = 16, 2

    path_nums = (3, 5)              # paths per test method (2 tests)
    P = sum(path_nums)              # total paths = 8
    T = 8                           # max path length
    path_lengths = jnp.asarray([8, 5, 3, 8, 7, 6, 2, 4], dtype=jnp.int32)

    key = jax.random.PRNGKey(0)
    k_param, k_x = jax.random.split(key)
    params = init_params(k_param, TOKEN_EMBED, METHOD_EMBED, ENCODE, HIDDEN,
                         N_LAYERS, TEST_VEC, LABELS)
    inputs = jax.random.normal(k_x, (P, T, TOKEN_EMBED + METHOD_EMBED),
                               jnp.float32)

    outputs, code_vectors, attn_param = flaky_detect_forward(
        params, inputs, path_lengths, path_nums)
    jax.block_until_ready((outputs, code_vectors, attn_param))

    ref_out, ref_code, _ = reference_forward(params, inputs, path_lengths,
                                             list(path_nums))
    np.testing.assert_allclose(np.asarray(outputs), np.asarray(ref_out),
                               rtol=1e-2, atol=1e-2)
    np.testing.assert_allclose(np.asarray(code_vectors), np.asarray(ref_code),
                               rtol=1e-2, atol=1e-2)

    print("KERNEL_OK")
</pallas_src>

<mosaic_0001>
module attributes {stable_mosaic.version = 11 : i64} {
  func.func @_fused_kernel(%arg0: i32, %arg1: memref<64x32xf32, #tpu.memory_space<vmem>>, %arg2: memref<8x1xi32, #tpu.memory_space<vmem>>, %arg3: memref<32x32xf32, #tpu.memory_space<vmem>>, %arg4: memref<1x32xf32, #tpu.memory_space<vmem>>, %arg5: memref<1x32xf32, #tpu.memory_space<vmem>>, %arg6: memref<4x32x32xf32, #tpu.memory_space<vmem>>, %arg7: memref<4x32x32xf32, #tpu.memory_space<vmem>>, %arg8: memref<4x1x32xf32, #tpu.memory_space<vmem>>, %arg9: memref<4x32x32xf32, #tpu.memory_space<vmem>>, %arg10: memref<4x32x32xf32, #tpu.memory_space<vmem>>, %arg11: memref<4x1x32xf32, #tpu.memory_space<vmem>>, %arg12: memref<1x32xf32, #tpu.memory_space<vmem>>, %arg13: memref<8x2xf32, #tpu.memory_space<vmem>>, %arg14: memref<1x2xf32, #tpu.memory_space<vmem>>, %arg15: memref<32x16xf32, #tpu.memory_space<vmem>>, %arg16: memref<16x2xf32, #tpu.memory_space<vmem>>, %arg17: memref<2x2xf32, #tpu.memory_space<vmem>>, %arg18: memref<2x16xf32, #tpu.memory_space<vmem>>) attributes {dimension_semantics = [#tpu.dimension_semantics<arbitrary>], iteration_bounds = array<i64: 1>, scalar_prefetch = 0 : i64, scratch_operands = 0 : i64, tpu.core_type = #tpu.core_type<tc>, window_params = [{pipeline_mode = #tpu.pipeline_mode<synchronous>, transform_indices = @transform_0, window_bounds = array<i64: 64, 32>}, {pipeline_mode = #tpu.pipeline_mode<synchronous>, transform_indices = @transform_1, window_bounds = array<i64: 8, 1>}, {pipeline_mode = #tpu.pipeline_mode<synchronous>, transform_indices = @transform_2, window_bounds = array<i64: 32, 32>}, {pipeline_mode = #tpu.pipeline_mode<synchronous>, transform_indices = @transform_3, window_bounds = array<i64: 1, 32>}, {pipeline_mode = #tpu.pipeline_mode<synchronous>, transform_indices = @transform_4, window_bounds = array<i64: 1, 32>}, {pipeline_mode = #tpu.pipeline_mode<synchronous>, transform_indices = @transform_5, window_bounds = array<i64: 4, 32, 32>}, {pipeline_mode = #tpu.pipeline_mode<synchronous>, transform_indices = @transform_6, window_bounds = array<i64: 4, 32, 32>}, {pipeline_mode = #tpu.pipeline_mode<synchronous>, transform_indices = @transform_7, window_bounds = array<i64: 4, 1, 32>}, {pipeline_mode = #tpu.pipeline_mode<synchronous>, transform_indices = @transform_8, window_bounds = array<i64: 4, 32, 32>}, {pipeline_mode = #tpu.pipeline_mode<synchronous>, transform_indices = @transform_9, window_bounds = array<i64: 4, 32, 32>}, {pipeline_mode = #tpu.pipeline_mode<synchronous>, transform_indices = @transform_10, window_bounds = array<i64: 4, 1, 32>}, {pipeline_mode = #tpu.pipeline_mode<synchronous>, transform_indices = @transform_11, window_bounds = array<i64: 1, 32>}, {pipeline_mode = #tpu.pipeline_mode<synchronous>, transform_indices = @transform_12, window_bounds = array<i64: 8, 2>}, {pipeline_mode = #tpu.pipeline_mode<synchronous>, transform_indices = @transform_13, window_bounds = array<i64: 1, 2>}, {pipeline_mode = #tpu.pipeline_mode<synchronous>, transform_indices = @transform_14, window_bounds = array<i64: 32, 16>}, {pipeline_mode = #tpu.pipeline_mode<synchronous>, transform_indices = @transform_15, window_bounds = array<i64: 16, 2>}, {pipeline_mode = #tpu.pipeline_mode<synchronous>, transform_indices = @transform_16, window_bounds = array<i64: 2, 2>}, {pipeline_mode = #tpu.pipeline_mode<synchronous>, transform_indices = @transform_17, window_bounds = array<i64: 2, 16>}]} {
    %c0 = arith.constant 0 : index
    %c0_0 = arith.constant 0 : index
    %0 = vector.load %arg1[%c0, %c0_0] : memref<64x32xf32, #tpu.memory_space<vmem>>, vector<64x32xf32>
    %c0_1 = arith.constant 0 : index
    %c0_2 = arith.constant 0 : index
    %1 = vector.load %arg3[%c0_1, %c0_2] : memref<32x32xf32, #tpu.memory_space<vmem>>, vector<32x32xf32>
    %cst = arith.constant dense<0.000000e+00> : vector<64x32xf32>
    %2 = tpu.matmul %0, %1, %cst {dimension_numbers = #tpu.dot_dimension_numbers<[1], [0], [0], [1], [0, 0, 1, 1], [], []>} : vector<64x32xf32>, vector<32x32xf32>, vector<64x32xf32> -> vector<64x32xf32>
    %cst_3 = arith.constant dense<0.000000e+00> : vector<64xf32>
    %3 = vector.multi_reduction <add>, %2, %cst_3 [1] : vector<64x32xf32> to vector<64xf32>
    %4 = vector.shape_cast %3 : vector<64xf32> to vector<64x1xf32>
    %cst_4 = arith.constant 3.200000e+01 : f32
    %5 = vector.broadcast %cst_4 : f32 to vector<64x1xf32>
    %6 = arith.divf %4, %5 : vector<64x1xf32>
    %7 = vector.broadcast %6 : vector<64x1xf32> to vector<64x32xf32>
    %8 = arith.subf %2, %7 : vector<64x32xf32>
    %9 = arith.mulf %8, %8 : vector<64x32xf32>
    %cst_5 = arith.constant dense<0.000000e+00> : vector<64xf32>
    %10 = vector.multi_reduction <add>, %9, %cst_5 [1] : vector<64x32xf32> to vector<64xf32>
    %11 = vector.shape_cast %10 : vector<64xf32> to vector<64x1xf32>
    %cst_6 = arith.constant 3.200000e+01 : f32
    %12 = vector.broadcast %cst_6 : f32 to vector<64x1xf32>
    %13 = arith.divf %11, %12 : vector<64x1xf32>
    %14 = vector.broadcast %6 : vector<64x1xf32> to vector<64x32xf32>
    %15 = arith.subf %2, %14 : vector<64x32xf32>
    %cst_7 = arith.constant 9.99999974E-6 : f32
    %16 = vector.broadcast %cst_7 : f32 to vector<64x1xf32>
    %17 = arith.addf %13, %16 : vector<64x1xf32>
    %18 = math.rsqrt %17 : vector<64x1xf32>
    %19 = vector.broadcast %18 : vector<64x1xf32> to vector<64x32xf32>
    %20 = arith.mulf %15, %19 : vector<64x32xf32>
    %c0_8 = arith.constant 0 : index
    %c0_9 = arith.constant 0 : index
    %21 = vector.load %arg4[%c0_8, %c0_9] : memref<1x32xf32, #tpu.memory_space<vmem>>, vector<1x32xf32>
    %22 = vector.broadcast %21 : vector<1x32xf32> to vector<64x32xf32>
    %23 = arith.mulf %20, %22 : vector<64x32xf32>
    %c0_10 = arith.constant 0 : index
    %c0_11 = arith.constant 0 : index
    %24 = vector.load %arg5[%c0_10, %c0_11] : memref<1x32xf32, #tpu.memory_space<vmem>>, vector<1x32xf32>
    %25 = vector.broadcast %24 : vector<1x32xf32> to vector<64x32xf32>
    %26 = arith.addf %23, %25 : vector<64x32xf32>
    %27 = math.tanh %26 : vector<64x32xf32>
    %c0_12 = arith.constant 0 : index
    %c0_13 = arith.constant 0 : index
    %28 = vector.load %arg2[%c0_12, %c0_13] : memref<8x1xi32, #tpu.memory_space<vmem>>, vector<8x1xi32>
    %c0_14 = arith.constant 0 : index
    %c0_15 = arith.constant 0 : index
    %c0_16 = arith.constant 0 : index
    %29 = vector.load %arg6[%c0_14, %c0_15, %c0_16] : memref<4x32x32xf32, #tpu.memory_space<vmem>>, vector<1x32x32xf32>
    %30 = vector.shape_cast %29 : vector<1x32x32xf32> to vector<32x32xf32>
    %cst_17 = arith.constant dense<0.000000e+00> : vector<64x32xf32>
    %31 = tpu.matmul %27, %30, %cst_17 {dimension_numbers = #tpu.dot_dimension_numbers<[1], [0], [0], [1], [0, 0, 1, 1], [], []>} : vector<64x32xf32>, vector<32x32xf32>, vector<64x32xf32> -> vector<64x32xf32>
    %c0_18 = arith.constant 0 : index
    %c0_19 = arith.constant 0 : index
    %c0_20 = arith.constant 0 : index
    %32 = vector.load %arg8[%c0_18, %c0_19, %c0_20] : memref<4x1x32xf32, #tpu.memory_space<vmem>>, vector<1x1x32xf32>
    %33 = vector.shape_cast %32 : vector<1x1x32xf32> to vector<1x32xf32>
    %34 = vector.broadcast %33 : vector<1x32xf32> to vector<64x32xf32>
    %35 = arith.addf %31, %34 : vector<64x32xf32>
    %c1 = arith.constant 1 : index
    %c0_21 = arith.constant 0 : index
    %c0_22 = arith.constant 0 : index
    %36 = vector.load %arg6[%c1, %c0_21, %c0_22] : memref<4x32x32xf32, #tpu.memory_space<vmem>>, vector<1x32x32xf32>
    %37 = vector.shape_cast %36 : vector<1x32x32xf32> to vector<32x32xf32>
    %cst_23 = arith.constant dense<0.000000e+00> : vector<64x32xf32>
    %38 = tpu.matmul %27, %37, %cst_23 {dimension_numbers = #tpu.dot_dimension_numbers<[1], [0], [0], [1], [0, 0, 1, 1], [], []>} : vector<64x32xf32>, vector<32x32xf32>, vector<64x32xf32> -> vector<64x32xf32>
    %c1_24 = arith.constant 1 : index
    %c0_25 = arith.constant 0 : index
    %c0_26 = arith.constant 0 : index
    %39 = vector.load %arg8[%c1_24, %c0_25, %c0_26] : memref<4x1x32xf32, #tpu.memory_space<vmem>>, vector<1x1x32xf32>
    %40 = vector.shape_cast %39 : vector<1x1x32xf32> to vector<1x32xf32>
    %41 = vector.broadcast %40 : vector<1x32xf32> to vector<64x32xf32>
    %42 = arith.addf %38, %41 : vector<64x32xf32>
    %c2 = arith.constant 2 : index
    %c0_27 = arith.constant 0 : index
    %c0_28 = arith.constant 0 : index
    %43 = vector.load %arg6[%c2, %c0_27, %c0_28] : memref<4x32x32xf32, #tpu.memory_space<vmem>>, vector<1x32x32xf32>
    %44 = vector.shape_cast %43 : vector<1x32x32xf32> to vector<32x32xf32>
    %cst_29 = arith.constant dense<0.000000e+00> : vector<64x32xf32>
    %45 = tpu.matmul %27, %44, %cst_29 {dimension_numbers = #tpu.dot_dimension_numbers<[1], [0], [0], [1], [0, 0, 1, 1], [], []>} : vector<64x32xf32>, vector<32x32xf32>, vector<64x32xf32> -> vector<64x32xf32>
    %c2_30 = arith.constant 2 : index
    %c0_31 = arith.constant 0 : index
    %c0_32 = arith.constant 0 : index
    %46 = vector.load %arg8[%c2_30, %c0_31, %c0_32] : memref<4x1x32xf32, #tpu.memory_space<vmem>>, vector<1x1x32xf32>
    %47 = vector.shape_cast %46 : vector<1x1x32xf32> to vector<1x32xf32>
    %48 = vector.broadcast %47 : vector<1x32xf32> to vector<64x32xf32>
    %49 = arith.addf %45, %48 : vector<64x32xf32>
    %c3 = arith.constant 3 : index
    %c0_33 = arith.constant 0 : index
    %c0_34 = arith.constant 0 : index
    %50 = vector.load %arg6[%c3, %c0_33, %c0_34] : memref<4x32x32xf32, #tpu.memory_space<vmem>>, vector<1x32x32xf32>
    %51 = vector.shape_cast %50 : vector<1x32x32xf32> to vector<32x32xf32>
    %cst_35 = arith.constant dense<0.000000e+00> : vector<64x32xf32>
    %52 = tpu.matmul %27, %51, %cst_35 {dimension_numbers = #tpu.dot_dimension_numbers<[1], [0], [0], [1], [0, 0, 1, 1], [], []>} : vector<64x32xf32>, vector<32x32xf32>, vector<64x32xf32> -> vector<64x32xf32>
    %c3_36 = arith.constant 3 : index
    %c0_37 = arith.constant 0 : index
    %c0_38 = arith.constant 0 : index
    %53 = vector.load %arg8[%c3_36, %c0_37, %c0_38] : memref<4x1x32xf32, #tpu.memory_space<vmem>>, vector<1x1x32xf32>
    %54 = vector.shape_cast %53 : vector<1x1x32xf32> to vector<1x32xf32>
    %55 = vector.broadcast %54 : vector<1x32xf32> to vector<64x32xf32>
    %56 = arith.addf %52, %55 : vector<64x32xf32>
    %c0_39 = arith.constant 0 : index
    %c0_40 = arith.constant 0 : index
    %c0_41 = arith.constant 0 : index
    %57 = vector.load %arg7[%c0_39, %c0_40, %c0_41] : memref<4x32x32xf32, #tpu.memory_space<vmem>>, vector<1x32x32xf32>
    %58 = vector.shape_cast %57 : vector<1x32x32xf32> to vector<32x32xf32>
    %c1_42 = arith.constant 1 : index
    %c0_43 = arith.constant 0 : index
    %c0_44 = arith.constant 0 : index
    %59 = vector.load %arg7[%c1_42, %c0_43, %c0_44] : memref<4x32x32xf32, #tpu.memory_space<vmem>>, vector<1x32x32xf32>
    %60 = vector.shape_cast %59 : vector<1x32x32xf32> to vector<32x32xf32>
    %c2_45 = arith.constant 2 : index
    %c0_46 = arith.constant 0 : index
    %c0_47 = arith.constant 0 : index
    %61 = vector.load %arg7[%c2_45, %c0_46, %c0_47] : memref<4x32x32xf32, #tpu.memory_space<vmem>>, vector<1x32x32xf32>
    %62 = vector.shape_cast %61 : vector<1x32x32xf32> to vector<32x32xf32>
    %c3_48 = arith.constant 3 : index
    %c0_49 = arith.constant 0 : index
    %c0_50 = arith.constant 0 : index
    %63 = vector.load %arg7[%c3_48, %c0_49, %c0_50] : memref<4x32x32xf32, #tpu.memory_space<vmem>>, vector<1x32x32xf32>
    %64 = vector.shape_cast %63 : vector<1x32x32xf32> to vector<32x32xf32>
    %cst_51 = arith.constant 0.000000e+00 : f32
    %65 = vector.broadcast %cst_51 : f32 to vector<8x32xf32>
    %cst_52 = arith.constant 0.000000e+00 : f32
    %66 = vector.broadcast %cst_52 : f32 to vector<8x32xf32>
    %67 = vector.extract_strided_slice %35 {offsets = [0, 0], sizes = [8, 32], strides = [1, 1]} : vector<64x32xf32> to vector<8x32xf32>
    %cst_53 = arith.constant dense<0.000000e+00> : vector<8x32xf32>
    %68 = tpu.matmul %65, %58, %cst_53 {dimension_numbers = #tpu.dot_dimension_numbers<[1], [0], [0], [1], [0, 0, 1, 1], [], []>} : vector<8x32xf32>, vector<32x32xf32>, vector<8x32xf32> -> vector<8x32xf32>
    %69 = arith.addf %67, %68 : vector<8x32xf32>
    %70 = arith.negf %69 : vector<8x32xf32>
    %71 = math.exp %70 : vector<8x32xf32>
    %cst_54 = arith.constant 1.000000e+00 : f32
    %72 = vector.broadcast %cst_54 : f32 to vector<8x32xf32>
    %73 = arith.addf %72, %71 : vector<8x32xf32>
    %74 = arith.divf %72, %73 : vector<8x32xf32>
    %75 = vector.extract_strided_slice %42 {offsets = [0, 0], sizes = [8, 32], strides = [1, 1]} : vector<64x32xf32> to vector<8x32xf32>
    %cst_55 = arith.constant dense<0.000000e+00> : vector<8x32xf32>
    %76 = tpu.matmul %65, %60, %cst_55 {dimension_numbers = #tpu.dot_dimension_numbers<[1], [0], [0], [1], [0, 0, 1, 1], [], []>} : vector<8x32xf32>, vector<32x32xf32>, vector<8x32xf32> -> vector<8x32xf32>
    %77 = arith.addf %75, %76 : vector<8x32xf32>
    %78 = arith.negf %77 : vector<8x32xf32>
    %79 = math.exp %78 : vector<8x32xf32>
    %cst_56 = arith.constant 1.000000e+00 : f32
    %80 = vector.broadcast %cst_56 : f32 to vector<8x32xf32>
    %81 = arith.addf %80, %79 : vector<8x32xf32>
    %82 = arith.divf %80, %81 : vector<8x32xf32>
    %83 = vector.extract_strided_slice %49 {offsets = [0, 0], sizes = [8, 32], strides = [1, 1]} : vector<64x32xf32> to vector<8x32xf32>
    %cst_57 = arith.constant dense<0.000000e+00> : vector<8x32xf32>
    %84 = tpu.matmul %65, %62, %cst_57 {dimension_numbers = #tpu.dot_dimension_numbers<[1], [0], [0], [1], [0, 0, 1, 1], [], []>} : vector<8x32xf32>, vector<32x32xf32>, vector<8x32xf32> -> vector<8x32xf32>
    %85 = arith.addf %83, %84 : vector<8x32xf32>
    %86 = math.tanh %85 : vector<8x32xf32>
    %87 = vector.extract_strided_slice %56 {offsets = [0, 0], sizes = [8, 32], strides = [1, 1]} : vector<64x32xf32> to vector<8x32xf32>
    %cst_58 = arith.constant dense<0.000000e+00> : vector<8x32xf32>
    %88 = tpu.matmul %65, %64, %cst_58 {dimension_numbers = #tpu.dot_dimension_numbers<[1], [0], [0], [1], [0, 0, 1, 1], [], []>} : vector<8x32xf32>, vector<32x32xf32>, vector<8x32xf32> -> vector<8x32xf32>
    %89 = arith.addf %87, %88 : vector<8x32xf32>
    %90 = arith.negf %89 : vector<8x32xf32>
    %91 = math.exp %90 : vector<8x32xf32>
    %cst_59 = arith.constant 1.000000e+00 : f32
    %92 = vector.broadcast %cst_59 : f32 to vector<8x32xf32>
    %93 = arith.addf %92, %91 : vector<8x32xf32>
    %94 = arith.divf %92, %93 : vector<8x32xf32>
    %95 = arith.mulf %82, %66 : vector<8x32xf32>
    %96 = arith.mulf %74, %86 : vector<8x32xf32>
    %97 = arith.addf %95, %96 : vector<8x32xf32>
    %98 = math.tanh %97 : vector<8x32xf32>
    %99 = arith.mulf %94, %98 : vector<8x32xf32>
    %c0_i32 = arith.constant 0 : i32
    %100 = vector.broadcast %c0_i32 : i32 to vector<8x1xi32>
    %101 = arith.cmpi sgt, %28, %100 : vector<8x1xi32>
    %102 = vector.shape_cast %101 : vector<8x1xi1> to vector<8x1xi1>
    %103 = vector.broadcast %102 : vector<8x1xi1> to vector<8x32xi1>
    %104 = arith.select %103, %99, %65 : vector<8x32xi1>, vector<8x32xf32>
    %105 = vector.shape_cast %101 : vector<8x1xi1> to vector<8x1xi1>
    %106 = vector.broadcast %105 : vector<8x1xi1> to vector<8x32xi1>
    %107 = arith.select %106, %97, %66 : vector<8x32xi1>, vector<8x32xf32>
    %108 = vector.extract_strided_slice %35 {offsets = [8, 0], sizes = [8, 32], strides = [1, 1]} : vector<64x32xf32> to vector<8x32xf32>
    %cst_60 = arith.constant dense<0.000000e+00> : vector<8x32xf32>
    %109 = tpu.matmul %104, %58, %cst_60 {dimension_numbers = #tpu.dot_dimension_numbers<[1], [0], [0], [1], [0, 0, 1, 1], [], []>} : vector<8x32xf32>, vector<32x32xf32>, vector<8x32xf32> -> vector<8x32xf32>
    %110 = arith.addf %108, %109 : vector<8x32xf32>
    %111 = arith.negf %110 : vector<8x32xf32>
    %112 = math.exp %111 : vector<8x32xf32>
    %cst_61 = arith.constant 1.000000e+00 : f32
    %113 = vector.broadcast %cst_61 : f32 to vector<8x32xf32>
    %114 = arith.addf %113, %112 : vector<8x32xf32>
    %115 = arith.divf %113, %114 : vector<8x32xf32>
    %116 = vector.extract_strided_slice %42 {offsets = [8, 0], sizes = [8, 32], strides = [1, 1]} : vector<64x32xf32> to vector<8x32xf32>
    %cst_62 = arith.constant dense<0.000000e+00> : vector<8x32xf32>
    %117 = tpu.matmul %104, %60, %cst_62 {dimension_numbers = #tpu.dot_dimension_numbers<[1], [0], [0], [1], [0, 0, 1, 1], [], []>} : vector<8x32xf32>, vector<32x32xf32>, vector<8x32xf32> -> vector<8x32xf32>
    %118 = arith.addf %116, %117 : vector<8x32xf32>
    %119 = arith.negf %118 : vector<8x32xf32>
    %120 = math.exp %119 : vector<8x32xf32>
    %cst_63 = arith.constant 1.000000e+00 : f32
    %121 = vector.broadcast %cst_63 : f32 to vector<8x32xf32>
    %122 = arith.addf %121, %120 : vector<8x32xf32>
    %123 = arith.divf %121, %122 : vector<8x32xf32>
    %124 = vector.extract_strided_slice %49 {offsets = [8, 0], sizes = [8, 32], strides = [1, 1]} : vector<64x32xf32> to vector<8x32xf32>
    %cst_64 = arith.constant dense<0.000000e+00> : vector<8x32xf32>
    %125 = tpu.matmul %104, %62, %cst_64 {dimension_numbers = #tpu.dot_dimension_numbers<[1], [0], [0], [1], [0, 0, 1, 1], [], []>} : vector<8x32xf32>, vector<32x32xf32>, vector<8x32xf32> -> vector<8x32xf32>
    %126 = arith.addf %124, %125 : vector<8x32xf32>
    %127 = math.tanh %126 : vector<8x32xf32>
    %128 = vector.extract_strided_slice %56 {offsets = [8, 0], sizes = [8, 32], strides = [1, 1]} : vector<64x32xf32> to vector<8x32xf32>
    %cst_65 = arith.constant dense<0.000000e+00> : vector<8x32xf32>
    %129 = tpu.matmul %104, %64, %cst_65 {dimension_numbers = #tpu.dot_dimension_numbers<[1], [0], [0], [1], [0, 0, 1, 1], [], []>} : vector<8x32xf32>, vector<32x32xf32>, vector<8x32xf32> -> vector<8x32xf32>
    %130 = arith.addf %128, %129 : vector<8x32xf32>
    %131 = arith.negf %130 : vector<8x32xf32>
    %132 = math.exp %131 : vector<8x32xf32>
    %cst_66 = arith.constant 1.000000e+00 : f32
    %133 = vector.broadcast %cst_66 : f32 to vector<8x32xf32>
    %134 = arith.addf %133, %132 : vector<8x32xf32>
    %135 = arith.divf %133, %134 : vector<8x32xf32>
    %136 = arith.mulf %123, %107 : vector<8x32xf32>
    %137 = arith.mulf %115, %127 : vector<8x32xf32>
    %138 = arith.addf %136, %137 : vector<8x32xf32>
    %139 = math.tanh %138 : vector<8x32xf32>
    %140 = arith.mulf %135, %139 : vector<8x32xf32>
    %c1_i32 = arith.constant 1 : i32
    %141 = vector.broadcast %c1_i32 : i32 to vector<8x1xi32>
    %142 = arith.cmpi sgt, %28, %141 : vector<8x1xi32>
    %143 = vector.shape_cast %142 : vector<8x1xi1> to vector<8x1xi1>
    %144 = vector.broadcast %143 : vector<8x1xi1> to vector<8x32xi1>
    %145 = arith.select %144, %140, %104 : vector<8x32xi1>, vector<8x32xf32>
    %146 = vector.shape_cast %142 : vector<8x1xi1> to vector<8x1xi1>
    %147 = vector.broadcast %146 : vector<8x1xi1> to vector<8x32xi1>
    %148 = arith.select %147, %138, %107 : vector<8x32xi1>, vector<8x32xf32>
    %149 = vector.extract_strided_slice %35 {offsets = [16, 0], sizes = [8, 32], strides = [1, 1]} : vector<64x32xf32> to vector<8x32xf32>
    %cst_67 = arith.constant dense<0.000000e+00> : vector<8x32xf32>
    %150 = tpu.matmul %145, %58, %cst_67 {dimension_numbers = #tpu.dot_dimension_numbers<[1], [0], [0], [1], [0, 0, 1, 1], [], []>} : vector<8x32xf32>, vector<32x32xf32>, vector<8x32xf32> -> vector<8x32xf32>
    %151 = arith.addf %149, %150 : vector<8x32xf32>
    %152 = arith.negf %151 : vector<8x32xf32>
    %153 = math.exp %152 : vector<8x32xf32>
    %cst_68 = arith.constant 1.000000e+00 : f32
    %154 = vector.broadcast %cst_68 : f32 to vector<8x32xf32>
    %155 = arith.addf %154, %153 : vector<8x32xf32>
    %156 = arith.divf %154, %155 : vector<8x32xf32>
    %157 = vector.extract_strided_slice %42 {offsets = [16, 0], sizes = [8, 32], strides = [1, 1]} : vector<64x32xf32> to vector<8x32xf32>
    %cst_69 = arith.constant dense<0.000000e+00> : vector<8x32xf32>
    %158 = tpu.matmul %145, %60, %cst_69 {dimension_numbers = #tpu.dot_dimension_numbers<[1], [0], [0], [1], [0, 0, 1, 1], [], []>} : vector<8x32xf32>, vector<32x32xf32>, vector<8x32xf32> -> vector<8x32xf32>
    %159 = arith.addf %157, %158 : vector<8x32xf32>
    %160 = arith.negf %159 : vector<8x32xf32>
    %161 = math.exp %160 : vector<8x32xf32>
    %cst_70 = arith.constant 1.000000e+00 : f32
    %162 = vector.broadcast %cst_70 : f32 to vector<8x32xf32>
    %163 = arith.addf %162, %161 : vector<8x32xf32>
    %164 = arith.divf %162, %163 : vector<8x32xf32>
    %165 = vector.extract_strided_slice %49 {offsets = [16, 0], sizes = [8, 32], strides = [1, 1]} : vector<64x32xf32> to vector<8x32xf32>
    %cst_71 = arith.constant dense<0.000000e+00> : vector<8x32xf32>
    %166 = tpu.matmul %145, %62, %cst_71 {dimension_numbers = #tpu.dot_dimension_numbers<[1], [0], [0], [1], [0, 0, 1, 1], [], []>} : vector<8x32xf32>, vector<32x32xf32>, vector<8x32xf32> -> vector<8x32xf32>
    %167 = arith.addf %165, %166 : vector<8x32xf32>
    %168 = math.tanh %167 : vector<8x32xf32>
    %169 = vector.extract_strided_slice %56 {offsets = [16, 0], sizes = [8, 32], strides = [1, 1]} : vector<64x32xf32> to vector<8x32xf32>
    %cst_72 = arith.constant dense<0.000000e+00> : vector<8x32xf32>
    %170 = tpu.matmul %145, %64, %cst_72 {dimension_numbers = #tpu.dot_dimension_numbers<[1], [0], [0], [1], [0, 0, 1, 1], [], []>} : vector<8x32xf32>, vector<32x32xf32>, vector<8x32xf32> -> vector<8x32xf32>
    %171 = arith.addf %169, %170 : vector<8x32xf32>
    %172 = arith.negf %171 : vector<8x32xf32>
    %173 = math.exp %172 : vector<8x32xf32>
    %cst_73 = arith.constant 1.000000e+00 : f32
    %174 = vector.broadcast %cst_73 : f32 to vector<8x32xf32>
    %175 = arith.addf %174, %173 : vector<8x32xf32>
    %176 = arith.divf %174, %175 : vector<8x32xf32>
    %177 = arith.mulf %164, %148 : vector<8x32xf32>
    %178 = arith.mulf %156, %168 : vector<8x32xf32>
    %179 = arith.addf %177, %178 : vector<8x32xf32>
    %180 = math.tanh %179 : vector<8x32xf32>
    %181 = arith.mulf %176, %180 : vector<8x32xf32>
    %c2_i32 = arith.constant 2 : i32
    %182 = vector.broadcast %c2_i32 : i32 to vector<8x1xi32>
    %183 = arith.cmpi sgt, %28, %182 : vector<8x1xi32>
    %184 = vector.shape_cast %183 : vector<8x1xi1> to vector<8x1xi1>
    %185 = vector.broadcast %184 : vector<8x1xi1> to vector<8x32xi1>
    %186 = arith.select %185, %181, %145 : vector<8x32xi1>, vector<8x32xf32>
    %187 = vector.shape_cast %183 : vector<8x1xi1> to vector<8x1xi1>
    %188 = vector.broadcast %187 : vector<8x1xi1> to vector<8x32xi1>
    %189 = arith.select %188, %179, %148 : vector<8x32xi1>, vector<8x32xf32>
    %190 = vector.extract_strided_slice %35 {offsets = [24, 0], sizes = [8, 32], strides = [1, 1]} : vector<64x32xf32> to vector<8x32xf32>
    %cst_74 = arith.constant dense<0.000000e+00> : vector<8x32xf32>
    %191 = tpu.matmul %186, %58, %cst_74 {dimension_numbers = #tpu.dot_dimension_numbers<[1], [0], [0], [1], [0, 0, 1, 1], [], []>} : vector<8x32xf32>, vector<32x32xf32>, vector<8x32xf32> -> vector<8x32xf32>
    %192 = arith.addf %190, %191 : vector<8x32xf32>
    %193 = arith.negf %192 : vector<8x32xf32>
    %194 = math.exp %193 : vector<8x32xf32>
    %cst_75 = arith.constant 1.000000e+00 : f32
    %195 = vector.broadcast %cst_75 : f32 to vector<8x32xf32>
    %196 = arith.addf %195, %194 : vector<8x32xf32>
    %197 = arith.divf %195, %196 : vector<8x32xf32>
    %198 = vector.extract_strided_slice %42 {offsets = [24, 0], sizes = [8, 32], strides = [1, 1]} : vector<64x32xf32> to vector<8x32xf32>
    %cst_76 = arith.constant dense<0.000000e+00> : vector<8x32xf32>
    %199 = tpu.matmul %186, %60, %cst_76 {dimension_numbers = #tpu.dot_dimension_numbers<[1], [0], [0], [1], [0, 0, 1, 1], [], []>} : vector<8x32xf32>, vector<32x32xf32>, vector<8x32xf32> -> vector<8x32xf32>
    %200 = arith.addf %198, %199 : vector<8x32xf32>
    %201 = arith.negf %200 : vector<8x32xf32>
    %202 = math.exp %201 : vector<8x32xf32>
    %cst_77 = arith.constant 1.000000e+00 : f32
    %203 = vector.broadcast %cst_77 : f32 to vector<8x32xf32>
    %204 = arith.addf %203, %202 : vector<8x32xf32>
    %205 = arith.divf %203, %204 : vector<8x32xf32>
    %206 = vector.extract_strided_slice %49 {offsets = [24, 0], sizes = [8, 32], strides = [1, 1]} : vector<64x32xf32> to vector<8x32xf32>
    %cst_78 = arith.constant dense<0.000000e+00> : vector<8x32xf32>
    %207 = tpu.matmul %186, %62, %cst_78 {dimension_numbers = #tpu.dot_dimension_numbers<[1], [0], [0], [1], [0, 0, 1, 1], [], []>} : vector<8x32xf32>, vector<32x32xf32>, vector<8x32xf32> -> vector<8x32xf32>
    %208 = arith.addf %206, %207 : vector<8x32xf32>
    %209 = math.tanh %208 : vector<8x32xf32>
    %210 = vector.extract_strided_slice %56 {offsets = [24, 0], sizes = [8, 32], strides = [1, 1]} : vector<64x32xf32> to vector<8x32xf32>
    %cst_79 = arith.constant dense<0.000000e+00> : vector<8x32xf32>
    %211 = tpu.matmul %186, %64, %cst_79 {dimension_numbers = #tpu.dot_dimension_numbers<[1], [0], [0], [1], [0, 0, 1, 1], [], []>} : vector<8x32xf32>, vector<32x32xf32>, vector<8x32xf32> -> vector<8x32xf32>
    %212 = arith.addf %210, %211 : vector<8x32xf32>
    %213 = arith.negf %212 : vector<8x32xf32>
    %214 = math.exp %213 : vector<8x32xf32>
    %cst_80 = arith.constant 1.000000e+00 : f32
    %215 = vector.broadcast %cst_80 : f32 to vector<8x32xf32>
    %216 = arith.addf %215, %214 : vector<8x32xf32>
    %217 = arith.divf %215, %216 : vector<8x32xf32>
    %218 = arith.mulf %205, %189 : vector<8x32xf32>
    %219 = arith.mulf %197, %209 : vector<8x32xf32>
    %220 = arith.addf %218, %219 : vector<8x32xf32>
    %221 = math.tanh %220 : vector<8x32xf32>
    %222 = arith.mulf %217, %221 : vector<8x32xf32>
    %c3_i32 = arith.constant 3 : i32
    %223 = vector.broadcast %c3_i32 : i32 to vector<8x1xi32>
    %224 = arith.cmpi sgt, %28, %223 : vector<8x1xi32>
    %225 = vector.shape_cast %224 : vector<8x1xi1> to vector<8x1xi1>
    %226 = vector.broadcast %225 : vector<8x1xi1> to vector<8x32xi1>
    %227 = arith.select %226, %222, %186 : vector<8x32xi1>, vector<8x32xf32>
    %228 = vector.shape_cast %224 : vector<8x1xi1> to vector<8x1xi1>
    %229 = vector.broadcast %228 : vector<8x1xi1> to vector<8x32xi1>
    %230 = arith.select %229, %220, %189 : vector<8x32xi1>, vector<8x32xf32>
    %231 = vector.extract_strided_slice %35 {offsets = [32, 0], sizes = [8, 32], strides = [1, 1]} : vector<64x32xf32> to vector<8x32xf32>
    %cst_81 = arith.constant dense<0.000000e+00> : vector<8x32xf32>
    %232 = tpu.matmul %227, %58, %cst_81 {dimension_numbers = #tpu.dot_dimension_numbers<[1], [0], [0], [1], [0, 0, 1, 1], [], []>} : vector<8x32xf32>, vector<32x32xf32>, vector<8x32xf32> -> vector<8x32xf32>
    %233 = arith.addf %231, %232 : vector<8x32xf32>
    %234 = arith.negf %233 : vector<8x32xf32>
    %235 = math.exp %234 : vector<8x32xf32>
    %cst_82 = arith.constant 1.000000e+00 : f32
    %236 = vector.broadcast %cst_82 : f32 to vector<8x32xf32>
    %237 = arith.addf %236, %235 : vector<8x32xf32>
    %238 = arith.divf %236, %237 : vector<8x32xf32>
    %239 = vector.extract_strided_slice %42 {offsets = [32, 0], sizes = [8, 32], strides = [1, 1]} : vector<64x32xf32> to vector<8x32xf32>
    %cst_83 = arith.constant dense<0.000000e+00> : vector<8x32xf32>
    %240 = tpu.matmul %227, %60, %cst_83 {dimension_numbers = #tpu.dot_dimension_numbers<[1], [0], [0], [1], [0, 0, 1, 1], [], []>} : vector<8x32xf32>, vector<32x32xf32>, vector<8x32xf32> -> vector<8x32xf32>
    %241 = arith.addf %239, %240 : vector<8x32xf32>
    %242 = arith.negf %241 : vector<8x32xf32>
    %243 = math.exp %242 : vector<8x32xf32>
    %cst_84 = arith.constant 1.000000e+00 : f32
    %244 = vector.broadcast %cst_84 : f32 to vector<8x32xf32>
    %245 = arith.addf %244, %243 : vector<8x32xf32>
    %246 = arith.divf %244, %245 : vector<8x32xf32>
    %247 = vector.extract_strided_slice %49 {offsets = [32, 0], sizes = [8, 32], strides = [1, 1]} : vector<64x32xf32> to vector<8x32xf32>
    %cst_85 = arith.constant dense<0.000000e+00> : vector<8x32xf32>
    %248 = tpu.matmul %227, %62, %cst_85 {dimension_numbers = #tpu.dot_dimension_numbers<[1], [0], [0], [1], [0, 0, 1, 1], [], []>} : vector<8x32xf32>, vector<32x32xf32>, vector<8x32xf32> -> vector<8x32xf32>
    %249 = arith.addf %247, %248 : vector<8x32xf32>
    %250 = math.tanh %249 : vector<8x32xf32>
    %251 = vector.extract_strided_slice %56 {offsets = [32, 0], sizes = [8, 32], strides = [1, 1]} : vector<64x32xf32> to vector<8x32xf32>
    %cst_86 = arith.constant dense<0.000000e+00> : vector<8x32xf32>
    %252 = tpu.matmul %227, %64, %cst_86 {dimension_numbers = #tpu.dot_dimension_numbers<[1], [0], [0], [1], [0, 0, 1, 1], [], []>} : vector<8x32xf32>, vector<32x32xf32>, vector<8x32xf32> -> vector<8x32xf32>
    %253 = arith.addf %251, %252 : vector<8x32xf32>
    %254 = arith.negf %253 : vector<8x32xf32>
    %255 = math.exp %254 : vector<8x32xf32>
    %cst_87 = arith.constant 1.000000e+00 : f32
    %256 = vector.broadcast %cst_87 : f32 to vector<8x32xf32>
    %257 = arith.addf %256, %255 : vector<8x32xf32>
    %258 = arith.divf %256, %257 : vector<8x32xf32>
    %259 = arith.mulf %246, %230 : vector<8x32xf32>
    %260 = arith.mulf %238, %250 : vector<8x32xf32>
    %261 = arith.addf %259, %260 : vector<8x32xf32>
    %262 = math.tanh %261 : vector<8x32xf32>
    %263 = arith.mulf %258, %262 : vector<8x32xf32>
    %c4_i32 = arith.constant 4 : i32
    %264 = vector.broadcast %c4_i32 : i32 to vector<8x1xi32>
    %265 = arith.cmpi sgt, %28, %264 : vector<8x1xi32>
    %266 = vector.shape_cast %265 : vector<8x1xi1> to vector<8x1xi1>
    %267 = vector.broadcast %266 : vector<8x1xi1> to vector<8x32xi1>
    %268 = arith.select %267, %263, %227 : vector<8x32xi1>, vector<8x32xf32>
    %269 = vector.shape_cast %265 : vector<8x1xi1> to vector<8x1xi1>
    %270 = vector.broadcast %269 : vector<8x1xi1> to vector<8x32xi1>
    %271 = arith.select %270, %261, %230 : vector<8x32xi1>, vector<8x32xf32>
    %272 = vector.extract_strided_slice %35 {offsets = [40, 0], sizes = [8, 32], strides = [1, 1]} : vector<64x32xf32> to vector<8x32xf32>
    %cst_88 = arith.constant dense<0.000000e+00> : vector<8x32xf32>
    %273 = tpu.matmul %268, %58, %cst_88 {dimension_numbers = #tpu.dot_dimension_numbers<[1], [0], [0], [1], [0, 0, 1, 1], [], []>} : vector<8x32xf32>, vector<32x32xf32>, vector<8x32xf32> -> vector<8x32xf32>
    %274 = arith.addf %272, %273 : vector<8x32xf32>
    %275 = arith.negf %274 : vector<8x32xf32>
    %276 = math.exp %275 : vector<8x32xf32>
    %cst_89 = arith.constant 1.000000e+00 : f32
    %277 = vector.broadcast %cst_89 : f32 to vector<8x32xf32>
    %278 = arith.addf %277, %276 : vector<8x32xf32>
    %279 = arith.divf %277, %278 : vector<8x32xf32>
    %280 = vector.extract_strided_slice %42 {offsets = [40, 0], sizes = [8, 32], strides = [1, 1]} : vector<64x32xf32> to vector<8x32xf32>
    %cst_90 = arith.constant dense<0.000000e+00> : vector<8x32xf32>
    %281 = tpu.matmul %268, %60, %cst_90 {dimension_numbers = #tpu.dot_dimension_numbers<[1], [0], [0], [1], [0, 0, 1, 1], [], []>} : vector<8x32xf32>, vector<32x32xf32>, vector<8x32xf32> -> vector<8x32xf32>
    %282 = arith.addf %280, %281 : vector<8x32xf32>
    %283 = arith.negf %282 : vector<8x32xf32>
    %284 = math.exp %283 : vector<8x32xf32>
    %cst_91 = arith.constant 1.000000e+00 : f32
    %285 = vector.broadcast %cst_91 : f32 to vector<8x32xf32>
    %286 = arith.addf %285, %284 : vector<8x32xf32>
    %287 = arith.divf %285, %286 : vector<8x32xf32>
    %288 = vector.extract_strided_slice %49 {offsets = [40, 0], sizes = [8, 32], strides = [1, 1]} : vector<64x32xf32> to vector<8x32xf32>
    %cst_92 = arith.constant dense<0.000000e+00> : vector<8x32xf32>
    %289 = tpu.matmul %268, %62, %cst_92 {dimension_numbers = #tpu.dot_dimension_numbers<[1], [0], [0], [1], [0, 0, 1, 1], [], []>} : vector<8x32xf32>, vector<32x32xf32>, vector<8x32xf32> -> vector<8x32xf32>
    %290 = arith.addf %288, %289 : vector<8x32xf32>
    %291 = math.tanh %290 : vector<8x32xf32>
    %292 = vector.extract_strided_slice %56 {offsets = [40, 0], sizes = [8, 32], strides = [1, 1]} : vector<64x32xf32> to vector<8x32xf32>
    %cst_93 = arith.constant dense<0.000000e+00> : vector<8x32xf32>
    %293 = tpu.matmul %268, %64, %cst_93 {dimension_numbers = #tpu.dot_dimension_numbers<[1], [0], [0], [1], [0, 0, 1, 1], [], []>} : vector<8x32xf32>, vector<32x32xf32>, vector<8x32xf32> -> vector<8x32xf32>
    %294 = arith.addf %292, %293 : vector<8x32xf32>
    %295 = arith.negf %294 : vector<8x32xf32>
    %296 = math.exp %295 : vector<8x32xf32>
    %cst_94 = arith.constant 1.000000e+00 : f32
    %297 = vector.broadcast %cst_94 : f32 to vector<8x32xf32>
    %298 = arith.addf %297, %296 : vector<8x32xf32>
    %299 = arith.divf %297, %298 : vector<8x32xf32>
    %300 = arith.mulf %287, %271 : vector<8x32xf32>
    %301 = arith.mulf %279, %291 : vector<8x32xf32>
    %302 = arith.addf %300, %301 : vector<8x32xf32>
    %303 = math.tanh %302 : vector<8x32xf32>
    %304 = arith.mulf %299, %303 : vector<8x32xf32>
    %c5_i32 = arith.constant 5 : i32
    %305 = vector.broadcast %c5_i32 : i32 to vector<8x1xi32>
    %306 = arith.cmpi sgt, %28, %305 : vector<8x1xi32>
    %307 = vector.shape_cast %306 : vector<8x1xi1> to vector<8x1xi1>
    %308 = vector.broadcast %307 : vector<8x1xi1> to vector<8x32xi1>
    %309 = arith.select %308, %304, %268 : vector<8x32xi1>, vector<8x32xf32>
    %310 = vector.shape_cast %306 : vector<8x1xi1> to vector<8x1xi1>
    %311 = vector.broadcast %310 : vector<8x1xi1> to vector<8x32xi1>
    %312 = arith.select %311, %302, %271 : vector<8x32xi1>, vector<8x32xf32>
    %313 = vector.extract_strided_slice %35 {offsets = [48, 0], sizes = [8, 32], strides = [1, 1]} : vector<64x32xf32> to vector<8x32xf32>
    %cst_95 = arith.constant dense<0.000000e+00> : vector<8x32xf32>
    %314 = tpu.matmul %309, %58, %cst_95 {dimension_numbers = #tpu.dot_dimension_numbers<[1], [0], [0], [1], [0, 0, 1, 1], [], []>} : vector<8x32xf32>, vector<32x32xf32>, vector<8x32xf32> -> vector<8x32xf32>
    %315 = arith.addf %313, %314 : vector<8x32xf32>
    %316 = arith.negf %315 : vector<8x32xf32>
    %317 = math.exp %316 : vector<8x32xf32>
    %cst_96 = arith.constant 1.000000e+00 : f32
    %318 = vector.broadcast %cst_96 : f32 to vector<8x32xf32>
    %319 = arith.addf %318, %317 : vector<8x32xf32>
    %320 = arith.divf %318, %319 : vector<8x32xf32>
    %321 = vector.extract_strided_slice %42 {offsets = [48, 0], sizes = [8, 32], strides = [1, 1]} : vector<64x32xf32> to vector<8x32xf32>
    %cst_97 = arith.constant dense<0.000000e+00> : vector<8x32xf32>
    %322 = tpu.matmul %309, %60, %cst_97 {dimension_numbers = #tpu.dot_dimension_numbers<[1], [0], [0], [1], [0, 0, 1, 1], [], []>} : vector<8x32xf32>, vector<32x32xf32>, vector<8x32xf32> -> vector<8x32xf32>
    %323 = arith.addf %321, %322 : vector<8x32xf32>
    %324 = arith.negf %323 : vector<8x32xf32>
    %325 = math.exp %324 : vector<8x32xf32>
    %cst_98 = arith.constant 1.000000e+00 : f32
    %326 = vector.broadcast %cst_98 : f32 to vector<8x32xf32>
    %327 = arith.addf %326, %325 : vector<8x32xf32>
    %328 = arith.divf %326, %327 : vector<8x32xf32>
    %329 = vector.extract_strided_slice %49 {offsets = [48, 0], sizes = [8, 32], strides = [1, 1]} : vector<64x32xf32> to vector<8x32xf32>
    %cst_99 = arith.constant dense<0.000000e+00> : vector<8x32xf32>
    %330 = tpu.matmul %309, %62, %cst_99 {dimension_numbers = #tpu.dot_dimension_numbers<[1], [0], [0], [1], [0, 0, 1, 1], [], []>} : vector<8x32xf32>, vector<32x32xf32>, vector<8x32xf32> -> vector<8x32xf32>
    %331 = arith.addf %329, %330 : vector<8x32xf32>
    %332 = math.tanh %331 : vector<8x32xf32>
    %333 = vector.extract_strided_slice %56 {offsets = [48, 0], sizes = [8, 32], strides = [1, 1]} : vector<64x32xf32> to vector<8x32xf32>
    %cst_100 = arith.constant dense<0.000000e+00> : vector<8x32xf32>
    %334 = tpu.matmul %309, %64, %cst_100 {dimension_numbers = #tpu.dot_dimension_numbers<[1], [0], [0], [1], [0, 0, 1, 1], [], []>} : vector<8x32xf32>, vector<32x32xf32>, vector<8x32xf32> -> vector<8x32xf32>
    %335 = arith.addf %333, %334 : vector<8x32xf32>
    %336 = arith.negf %335 : vector<8x32xf32>
    %337 = math.exp %336 : vector<8x32xf32>
    %cst_101 = arith.constant 1.000000e+00 : f32
    %338 = vector.broadcast %cst_101 : f32 to vector<8x32xf32>
    %339 = arith.addf %338, %337 : vector<8x32xf32>
    %340 = arith.divf %338, %339 : vector<8x32xf32>
    %341 = arith.mulf %328, %312 : vector<8x32xf32>
    %342 = arith.mulf %320, %332 : vector<8x32xf32>
    %343 = arith.addf %341, %342 : vector<8x32xf32>
    %344 = math.tanh %343 : vector<8x32xf32>
    %345 = arith.mulf %340, %344 : vector<8x32xf32>
    %c6_i32 = arith.constant 6 : i32
    %346 = vector.broadcast %c6_i32 : i32 to vector<8x1xi32>
    %347 = arith.cmpi sgt, %28, %346 : vector<8x1xi32>
    %348 = vector.shape_cast %347 : vector<8x1xi1> to vector<8x1xi1>
    %349 = vector.broadcast %348 : vector<8x1xi1> to vector<8x32xi1>
    %350 = arith.select %349, %345, %309 : vector<8x32xi1>, vector<8x32xf32>
    %351 = vector.shape_cast %347 : vector<8x1xi1> to vector<8x1xi1>
    %352 = vector.broadcast %351 : vector<8x1xi1> to vector<8x32xi1>
    %353 = arith.select %352, %343, %312 : vector<8x32xi1>, vector<8x32xf32>
    %354 = vector.extract_strided_slice %35 {offsets = [56, 0], sizes = [8, 32], strides = [1, 1]} : vector<64x32xf32> to vector<8x32xf32>
    %cst_102 = arith.constant dense<0.000000e+00> : vector<8x32xf32>
    %355 = tpu.matmul %350, %58, %cst_102 {dimension_numbers = #tpu.dot_dimension_numbers<[1], [0], [0], [1], [0, 0, 1, 1], [], []>} : vector<8x32xf32>, vector<32x32xf32>, vector<8x32xf32> -> vector<8x32xf32>
    %356 = arith.addf %354, %355 : vector<8x32xf32>
    %357 = arith.negf %356 : vector<8x32xf32>
    %358 = math.exp %357 : vector<8x32xf32>
    %cst_103 = arith.constant 1.000000e+00 : f32
    %359 = vector.broadcast %cst_103 : f32 to vector<8x32xf32>
    %360 = arith.addf %359, %358 : vector<8x32xf32>
    %361 = arith.divf %359, %360 : vector<8x32xf32>
    %362 = vector.extract_strided_slice %42 {offsets = [56, 0], sizes = [8, 32], strides = [1, 1]} : vector<64x32xf32> to vector<8x32xf32>
    %cst_104 = arith.constant dense<0.000000e+00> : vector<8x32xf32>
    %363 = tpu.matmul %350, %60, %cst_104 {dimension_numbers = #tpu.dot_dimension_numbers<[1], [0], [0], [1], [0, 0, 1, 1], [], []>} : vector<8x32xf32>, vector<32x32xf32>, vector<8x32xf32> -> vector<8x32xf32>
    %364 = arith.addf %362, %363 : vector<8x32xf32>
    %365 = arith.negf %364 : vector<8x32xf32>
    %366 = math.exp %365 : vector<8x32xf32>
    %cst_105 = arith.constant 1.000000e+00 : f32
    %367 = vector.broadcast %cst_105 : f32 to vector<8x32xf32>
    %368 = arith.addf %367, %366 : vector<8x32xf32>
    %369 = arith.divf %367, %368 : vector<8x32xf32>
    %370 = vector.extract_strided_slice %49 {offsets = [56, 0], sizes = [8, 32], strides = [1, 1]} : vector<64x32xf32> to vector<8x32xf32>
    %cst_106 = arith.constant dense<0.000000e+00> : vector<8x32xf32>
    %371 = tpu.matmul %350, %62, %cst_106 {dimension_numbers = #tpu.dot_dimension_numbers<[1], [0], [0], [1], [0, 0, 1, 1], [], []>} : vector<8x32xf32>, vector<32x32xf32>, vector<8x32xf32> -> vector<8x32xf32>
    %372 = arith.addf %370, %371 : vector<8x32xf32>
    %373 = math.tanh %372 : vector<8x32xf32>
    %374 = vector.extract_strided_slice %56 {offsets = [56, 0], sizes = [8, 32], strides = [1, 1]} : vector<64x32xf32> to vector<8x32xf32>
    %cst_107 = arith.constant dense<0.000000e+00> : vector<8x32xf32>
    %375 = tpu.matmul %350, %64, %cst_107 {dimension_numbers = #tpu.dot_dimension_numbers<[1], [0], [0], [1], [0, 0, 1, 1], [], []>} : vector<8x32xf32>, vector<32x32xf32>, vector<8x32xf32> -> vector<8x32xf32>
    %376 = arith.addf %374, %375 : vector<8x32xf32>
    %377 = arith.negf %376 : vector<8x32xf32>
    %378 = math.exp %377 : vector<8x32xf32>
    %cst_108 = arith.constant 1.000000e+00 : f32
    %379 = vector.broadcast %cst_108 : f32 to vector<8x32xf32>
    %380 = arith.addf %379, %378 : vector<8x32xf32>
    %381 = arith.divf %379, %380 : vector<8x32xf32>
    %382 = arith.mulf %369, %353 : vector<8x32xf32>
    %383 = arith.mulf %361, %373 : vector<8x32xf32>
    %384 = arith.addf %382, %383 : vector<8x32xf32>
    %385 = math.tanh %384 : vector<8x32xf32>
    %386 = arith.mulf %381, %385 : vector<8x32xf32>
    %c7_i32 = arith.constant 7 : i32
    %387 = vector.broadcast %c7_i32 : i32 to vector<8x1xi32>
    %388 = arith.cmpi sgt, %28, %387 : vector<8x1xi32>
    %389 = vector.shape_cast %388 : vector<8x1xi1> to vector<8x1xi1>
    %390 = vector.broadcast %389 : vector<8x1xi1> to vector<8x32xi1>
    %391 = arith.select %390, %386, %350 : vector<8x32xi1>, vector<8x32xf32>
    %392 = tpu.concatenate %104, %145, %186, %227, %268, %309, %350, %391 in 0 : vector<8x32xf32>, vector<8x32xf32>, vector<8x32xf32>, vector<8x32xf32>, vector<8x32xf32>, vector<8x32xf32>, vector<8x32xf32>, vector<8x32xf32> -> vector<64x32xf32>
    %c0_109 = arith.constant 0 : index
    %c0_110 = arith.constant 0 : index
    %c0_111 = arith.constant 0 : index
    %393 = vector.load %arg9[%c0_109, %c0_110, %c0_111] : memref<4x32x32xf32, #tpu.memory_space<vmem>>, vector<1x32x32xf32>
    %394 = vector.shape_cast %393 : vector<1x32x32xf32> to vector<32x32xf32>
    %cst_112 = arith.constant dense<0.000000e+00> : vector<64x32xf32>
    %395 = tpu.matmul %392, %394, %cst_112 {dimension_numbers = #tpu.dot_dimension_numbers<[1], [0], [0], [1], [0, 0, 1, 1], [], []>} : vector<64x32xf32>, vector<32x32xf32>, vector<64x32xf32> -> vector<64x32xf32>
    %c0_113 = arith.constant 0 : index
    %c0_114 = arith.constant 0 : index
    %c0_115 = arith.constant 0 : index
    %396 = vector.load %arg11[%c0_113, %c0_114, %c0_115] : memref<4x1x32xf32, #tpu.memory_space<vmem>>, vector<1x1x32xf32>
    %397 = vector.shape_cast %396 : vector<1x1x32xf32> to vector<1x32xf32>
    %398 = vector.broadcast %397 : vector<1x32xf32> to vector<64x32xf32>
    %399 = arith.addf %395, %398 : vector<64x32xf32>
    %c1_116 = arith.constant 1 : index
    %c0_117 = arith.constant 0 : index
    %c0_118 = arith.constant 0 : index
    %400 = vector.load %arg9[%c1_116, %c0_117, %c0_118] : memref<4x32x32xf32, #tpu.memory_space<vmem>>, vector<1x32x32xf32>
    %401 = vector.shape_cast %400 : vector<1x32x32xf32> to vector<32x32xf32>
    %cst_119 = arith.constant dense<0.000000e+00> : vector<64x32xf32>
    %402 = tpu.matmul %392, %401, %cst_119 {dimension_numbers = #tpu.dot_dimension_numbers<[1], [0], [0], [1], [0, 0, 1, 1], [], []>} : vector<64x32xf32>, vector<32x32xf32>, vector<64x32xf32> -> vector<64x32xf32>
    %c1_120 = arith.constant 1 : index
    %c0_121 = arith.constant 0 : index
    %c0_122 = arith.constant 0 : index
    %403 = vector.load %arg11[%c1_120, %c0_121, %c0_122] : memref<4x1x32xf32, #tpu.memory_space<vmem>>, vector<1x1x32xf32>
    %404 = vector.shape_cast %403 : vector<1x1x32xf32> to vector<1x32xf32>
    %405 = vector.broadcast %404 : vector<1x32xf32> to vector<64x32xf32>
    %406 = arith.addf %402, %405 : vector<64x32xf32>
    %c2_123 = arith.constant 2 : index
    %c0_124 = arith.constant 0 : index
    %c0_125 = arith.constant 0 : index
    %407 = vector.load %arg9[%c2_123, %c0_124, %c0_125] : memref<4x32x32xf32, #tpu.memory_space<vmem>>, vector<1x32x32xf32>
    %408 = vector.shape_cast %407 : vector<1x32x32xf32> to vector<32x32xf32>
    %cst_126 = arith.constant dense<0.000000e+00> : vector<64x32xf32>
    %409 = tpu.matmul %392, %408, %cst_126 {dimension_numbers = #tpu.dot_dimension_numbers<[1], [0], [0], [1], [0, 0, 1, 1], [], []>} : vector<64x32xf32>, vector<32x32xf32>, vector<64x32xf32> -> vector<64x32xf32>
    %c2_127 = arith.constant 2 : index
    %c0_128 = arith.constant 0 : index
    %c0_129 = arith.constant 0 : index
    %410 = vector.load %arg11[%c2_127, %c0_128, %c0_129] : memref<4x1x32xf32, #tpu.memory_space<vmem>>, vector<1x1x32xf32>
    %411 = vector.shape_cast %410 : vector<1x1x32xf32> to vector<1x32xf32>
    %412 = vector.broadcast %411 : vector<1x32xf32> to vector<64x32xf32>
    %413 = arith.addf %409, %412 : vector<64x32xf32>
    %c3_130 = arith.constant 3 : index
    %c0_131 = arith.constant 0 : index
    %c0_132 = arith.constant 0 : index
    %414 = vector.load %arg9[%c3_130, %c0_131, %c0_132] : memref<4x32x32xf32, #tpu.memory_space<vmem>>, vector<1x32x32xf32>
    %415 = vector.shape_cast %414 : vector<1x32x32xf32> to vector<32x32xf32>
    %cst_133 = arith.constant dense<0.000000e+00> : vector<64x32xf32>
    %416 = tpu.matmul %392, %415, %cst_133 {dimension_numbers = #tpu.dot_dimension_numbers<[1], [0], [0], [1], [0, 0, 1, 1], [], []>} : vector<64x32xf32>, vector<32x32xf32>, vector<64x32xf32> -> vector<64x32xf32>
    %c3_134 = arith.constant 3 : index
    %c0_135 = arith.constant 0 : index
    %c0_136 = arith.constant 0 : index
    %417 = vector.load %arg11[%c3_134, %c0_135, %c0_136] : memref<4x1x32xf32, #tpu.memory_space<vmem>>, vector<1x1x32xf32>
    %418 = vector.shape_cast %417 : vector<1x1x32xf32> to vector<1x32xf32>
    %419 = vector.broadcast %418 : vector<1x32xf32> to vector<64x32xf32>
    %420 = arith.addf %416, %419 : vector<64x32xf32>
    %c0_137 = arith.constant 0 : index
    %c0_138 = arith.constant 0 : index
    %c0_139 = arith.constant 0 : index
    %421 = vector.load %arg10[%c0_137, %c0_138, %c0_139] : memref<4x32x32xf32, #tpu.memory_space<vmem>>, vector<1x32x32xf32>
    %422 = vector.shape_cast %421 : vector<1x32x32xf32> to vector<32x32xf32>
    %c1_140 = arith.constant 1 : index
    %c0_141 = arith.constant 0 : index
    %c0_142 = arith.constant 0 : index
    %423 = vector.load %arg10[%c1_140, %c0_141, %c0_142] : memref<4x32x32xf32, #tpu.memory_space<vmem>>, vector<1x32x32xf32>
    %424 = vector.shape_cast %423 : vector<1x32x32xf32> to vector<32x32xf32>
    %c2_143 = arith.constant 2 : index
    %c0_144 = arith.constant 0 : index
    %c0_145 = arith.constant 0 : index
    %425 = vector.load %arg10[%c2_143, %c0_144, %c0_145] : memref<4x32x32xf32, #tpu.memory_space<vmem>>, vector<1x32x32xf32>
    %426 = vector.shape_cast %425 : vector<1x32x32xf32> to vector<32x32xf32>
    %c3_146 = arith.constant 3 : index
    %c0_147 = arith.constant 0 : index
    %c0_148 = arith.constant 0 : index
    %427 = vector.load %arg10[%c3_146, %c0_147, %c0_148] : memref<4x32x32xf32, #tpu.memory_space<vmem>>, vector<1x32x32xf32>
    %428 = vector.shape_cast %427 : vector<1x32x32xf32> to vector<32x32xf32>
    %cst_149 = arith.constant 0.000000e+00 : f32
    %429 = vector.broadcast %cst_149 : f32 to vector<8x32xf32>
    %cst_150 = arith.constant 0.000000e+00 : f32
    %430 = vector.broadcast %cst_150 : f32 to vector<8x32xf32>
    %431 = vector.extract_strided_slice %399 {offsets = [0, 0], sizes = [8, 32], strides = [1, 1]} : vector<64x32xf32> to vector<8x32xf32>
    %cst_151 = arith.constant dense<0.000000e+00> : vector<8x32xf32>
    %432 = tpu.matmul %429, %422, %cst_151 {dimension_numbers = #tpu.dot_dimension_numbers<[1], [0], [0], [1], [0, 0, 1, 1], [], []>} : vector<8x32xf32>, vector<32x32xf32>, vector<8x32xf32> -> vector<8x32xf32>
    %433 = arith.addf %431, %432 : vector<8x32xf32>
    %434 = arith.negf %433 : vector<8x32xf32>
    %435 = math.exp %434 : vector<8x32xf32>
    %cst_152 = arith.constant 1.000000e+00 : f32
    %436 = vector.broadcast %cst_152 : f32 to vector<8x32xf32>
    %437 = arith.addf %436, %435 : vector<8x32xf32>
    %438 = arith.divf %436, %437 : vector<8x32xf32>
    %439 = vector.extract_strided_slice %406 {offsets = [0, 0], sizes = [8, 32], strides = [1, 1]} : vector<64x32xf32> to vector<8x32xf32>
    %cst_153 = arith.constant dense<0.000000e+00> : vector<8x32xf32>
    %440 = tpu.matmul %429, %424, %cst_153 {dimension_numbers = #tpu.dot_dimension_numbers<[1], [0], [0], [1], [0, 0, 1, 1], [], []>} : vector<8x32xf32>, vector<32x32xf32>, vector<8x32xf32> -> vector<8x32xf32>
    %441 = arith.addf %439, %440 : vector<8x32xf32>
    %442 = arith.negf %441 : vector<8x32xf32>
    %443 = math.exp %442 : vector<8x32xf32>
    %cst_154 = arith.constant 1.000000e+00 : f32
    %444 = vector.broadcast %cst_154 : f32 to vector<8x32xf32>
    %445 = arith.addf %444, %443 : vector<8x32xf32>
    %446 = arith.divf %444, %445 : vector<8x32xf32>
    %447 = vector.extract_strided_slice %413 {offsets = [0, 0], sizes = [8, 32], strides = [1, 1]} : vector<64x32xf32> to vector<8x32xf32>
    %cst_155 = arith.constant dense<0.000000e+00> : vector<8x32xf32>
    %448 = tpu.matmul %429, %426, %cst_155 {dimension_numbers = #tpu.dot_dimension_numbers<[1], [0], [0], [1], [0, 0, 1, 1], [], []>} : vector<8x32xf32>, vector<32x32xf32>, vector<8x32xf32> -> vector<8x32xf32>
    %449 = arith.addf %447, %448 : vector<8x32xf32>
    %450 = math.tanh %449 : vector<8x32xf32>
    %451 = vector.extract_strided_slice %420 {offsets = [0, 0], sizes = [8, 32], strides = [1, 1]} : vector<64x32xf32> to vector<8x32xf32>
    %cst_156 = arith.constant dense<0.000000e+00> : vector<8x32xf32>
    %452 = tpu.matmul %429, %428, %cst_156 {dimension_numbers = #tpu.dot_dimension_numbers<[1], [0], [0], [1], [0, 0, 1, 1], [], []>} : vector<8x32xf32>, vector<32x32xf32>, vector<8x32xf32> -> vector<8x32xf32>
    %453 = arith.addf %451, %452 : vector<8x32xf32>
    %454 = arith.negf %453 : vector<8x32xf32>
    %455 = math.exp %454 : vector<8x32xf32>
    %cst_157 = arith.constant 1.000000e+00 : f32
    %456 = vector.broadcast %cst_157 : f32 to vector<8x32xf32>
    %457 = arith.addf %456, %455 : vector<8x32xf32>
    %458 = arith.divf %456, %457 : vector<8x32xf32>
    %459 = arith.mulf %446, %430 : vector<8x32xf32>
    %460 = arith.mulf %438, %450 : vector<8x32xf32>
    %461 = arith.addf %459, %460 : vector<8x32xf32>
    %462 = math.tanh %461 : vector<8x32xf32>
    %463 = arith.mulf %458, %462 : vector<8x32xf32>
    %c0_i32_158 = arith.constant 0 : i32
    %464 = vector.broadcast %c0_i32_158 : i32 to vector<8x1xi32>
    %465 = arith.cmpi sgt, %28, %464 : vector<8x1xi32>
    %466 = vector.shape_cast %465 : vector<8x1xi1> to vector<8x1xi1>
    %467 = vector.broadcast %466 : vector<8x1xi1> to vector<8x32xi1>
    %468 = arith.select %467, %463, %429 : vector<8x32xi1>, vector<8x32xf32>
    %469 = vector.shape_cast %465 : vector<8x1xi1> to vector<8x1xi1>
    %470 = vector.broadcast %469 : vector<8x1xi1> to vector<8x32xi1>
    %471 = arith.select %470, %461, %430 : vector<8x32xi1>, vector<8x32xf32>
    %472 = vector.extract_strided_slice %399 {offsets = [8, 0], sizes = [8, 32], strides = [1, 1]} : vector<64x32xf32> to vector<8x32xf32>
    %cst_159 = arith.constant dense<0.000000e+00> : vector<8x32xf32>
    %473 = tpu.matmul %468, %422, %cst_159 {dimension_numbers = #tpu.dot_dimension_numbers<[1], [0], [0], [1], [0, 0, 1, 1], [], []>} : vector<8x32xf32>, vector<32x32xf32>, vector<8x32xf32> -> vector<8x32xf32>
    %474 = arith.addf %472, %473 : vector<8x32xf32>
    %475 = arith.negf %474 : vector<8x32xf32>
    %476 = math.exp %475 : vector<8x32xf32>
    %cst_160 = arith.constant 1.000000e+00 : f32
    %477 = vector.broadcast %cst_160 : f32 to vector<8x32xf32>
    %478 = arith.addf %477, %476 : vector<8x32xf32>
    %479 = arith.divf %477, %478 : vector<8x32xf32>
    %480 = vector.extract_strided_slice %406 {offsets = [8, 0], sizes = [8, 32], strides = [1, 1]} : vector<64x32xf32> to vector<8x32xf32>
    %cst_161 = arith.constant dense<0.000000e+00> : vector<8x32xf32>
    %481 = tpu.matmul %468, %424, %cst_161 {dimension_numbers = #tpu.dot_dimension_numbers<[1], [0], [0], [1], [0, 0, 1, 1], [], []>} : vector<8x32xf32>, vector<32x32xf32>, vector<8x32xf32> -> vector<8x32xf32>
    %482 = arith.addf %480, %481 : vector<8x32xf32>
    %483 = arith.negf %482 : vector<8x32xf32>
    %484 = math.exp %483 : vector<8x32xf32>
    %cst_162 = arith.constant 1.000000e+00 : f32
    %485 = vector.broadcast %cst_162 : f32 to vector<8x32xf32>
    %486 = arith.addf %485, %484 : vector<8x32xf32>
    %487 = arith.divf %485, %486 : vector<8x32xf32>
    %488 = vector.extract_strided_slice %413 {offsets = [8, 0], sizes = [8, 32], strides = [1, 1]} : vector<64x32xf32> to vector<8x32xf32>
    %cst_163 = arith.constant dense<0.000000e+00> : vector<8x32xf32>
    %489 = tpu.matmul %468, %426, %cst_163 {dimension_numbers = #tpu.dot_dimension_numbers<[1], [0], [0], [1], [0, 0, 1, 1], [], []>} : vector<8x32xf32>, vector<32x32xf32>, vector<8x32xf32> -> vector<8x32xf32>
    %490 = arith.addf %488, %489 : vector<8x32xf32>
    %491 = math.tanh %490 : vector<8x32xf32>
    %492 = vector.extract_strided_slice %420 {offsets = [8, 0], sizes = [8, 32], strides = [1, 1]} : vector<64x32xf32> to vector<8x32xf32>
    %cst_164 = arith.constant dense<0.000000e+00> : vector<8x32xf32>
    %493 = tpu.matmul %468, %428, %cst_164 {dimension_numbers = #tpu.dot_dimension_numbers<[1], [0], [0], [1], [0, 0, 1, 1], [], []>} : vector<8x32xf32>, vector<32x32xf32>, vector<8x32xf32> -> vector<8x32xf32>
    %494 = arith.addf %492, %493 : vector<8x32xf32>
    %495 = arith.negf %494 : vector<8x32xf32>
    %496 = math.exp %495 : vector<8x32xf32>
    %cst_165 = arith.constant 1.000000e+00 : f32
    %497 = vector.broadcast %cst_165 : f32 to vector<8x32xf32>
    %498 = arith.addf %497, %496 : vector<8x32xf32>
    %499 = arith.divf %497, %498 : vector<8x32xf32>
    %500 = arith.mulf %487, %471 : vector<8x32xf32>
    %501 = arith.mulf %479, %491 : vector<8x32xf32>
    %502 = arith.addf %500, %501 : vector<8x32xf32>
    %503 = math.tanh %502 : vector<8x32xf32>
    %504 = arith.mulf %499, %503 : vector<8x32xf32>
    %c1_i32_166 = arith.constant 1 : i32
    %505 = vector.broadcast %c1_i32_166 : i32 to vector<8x1xi32>
    %506 = arith.cmpi sgt, %28, %505 : vector<8x1xi32>
    %507 = vector.shape_cast %506 : vector<8x1xi1> to vector<8x1xi1>
    %508 = vector.broadcast %507 : vector<8x1xi1> to vector<8x32xi1>
    %509 = arith.select %508, %504, %468 : vector<8x32xi1>, vector<8x32xf32>
    %510 = vector.shape_cast %506 : vector<8x1xi1> to vector<8x1xi1>
    %511 = vector.broadcast %510 : vector<8x1xi1> to vector<8x32xi1>
    %512 = arith.select %511, %502, %471 : vector<8x32xi1>, vector<8x32xf32>
    %513 = vector.extract_strided_slice %399 {offsets = [16, 0], sizes = [8, 32], strides = [1, 1]} : vector<64x32xf32> to vector<8x32xf32>
    %cst_167 = arith.constant dense<0.000000e+00> : vector<8x32xf32>
    %514 = tpu.matmul %509, %422, %cst_167 {dimension_numbers = #tpu.dot_dimension_numbers<[1], [0], [0], [1], [0, 0, 1, 1], [], []>} : vector<8x32xf32>, vector<32x32xf32>, vector<8x32xf32> -> vector<8x32xf32>
    %515 = arith.addf %513, %514 : vector<8x32xf32>
    %516 = arith.negf %515 : vector<8x32xf32>
    %517 = math.exp %516 : vector<8x32xf32>
    %cst_168 = arith.constant 1.000000e+00 : f32
    %518 = vector.broadcast %cst_168 : f32 to vector<8x32xf32>
    %519 = arith.addf %518, %517 : vector<8x32xf32>
    %520 = arith.divf %518, %519 : vector<8x32xf32>
    %521 = vector.extract_strided_slice %406 {offsets = [16, 0], sizes = [8, 32], strides = [1, 1]} : vector<64x32xf32> to vector<8x32xf32>
    %cst_169 = arith.constant dense<0.000000e+00> : vector<8x32xf32>
    %522 = tpu.matmul %509, %424, %cst_169 {dimension_numbers = #tpu.dot_dimension_numbers<[1], [0], [0], [1], [0, 0, 1, 1], [], []>} : vector<8x32xf32>, vector<32x32xf32>, vector<8x32xf32> -> vector<8x32xf32>
    %523 = arith.addf %521, %522 : vector<8x32xf32>
    %524 = arith.negf %523 : vector<8x32xf32>
    %525 = math.exp %524 : vector<8x32xf32>
    %cst_170 = arith.constant 1.000000e+00 : f32
    %526 = vector.broadcast %cst_170 : f32 to vector<8x32xf32>
    %527 = arith.addf %526, %525 : vector<8x32xf32>
    %528 = arith.divf %526, %527 : vector<8x32xf32>
    %529 = vector.extract_strided_slice %413 {offsets = [16, 0], sizes = [8, 32], strides = [1, 1]} : vector<64x32xf32> to vector<8x32xf32>
    %cst_171 = arith.constant dense<0.000000e+00> : vector<8x32xf32>
    %530 = tpu.matmul %509, %426, %cst_171 {dimension_numbers = #tpu.dot_dimension_numbers<[1], [0], [0], [1], [0, 0, 1, 1], [], []>} : vector<8x32xf32>, vector<32x32xf32>, vector<8x32xf32> -> vector<8x32xf32>
    %531 = arith.addf %529, %530 : vector<8x32xf32>
    %532 = math.tanh %531 : vector<8x32xf32>
    %533 = vector.extract_strided_slice %420 {offsets = [16, 0], sizes = [8, 32], strides = [1, 1]} : vector<64x32xf32> to vector<8x32xf32>
    %cst_172 = arith.constant dense<0.000000e+00> : vector<8x32xf32>
    %534 = tpu.matmul %509, %428, %cst_172 {dimension_numbers = #tpu.dot_dimension_numbers<[1], [0], [0], [1], [0, 0, 1, 1], [], []>} : vector<8x32xf32>, vector<32x32xf32>, vector<8x32xf32> -> vector<8x32xf32>
    %535 = arith.addf %533, %534 : vector<8x32xf32>
    %536 = arith.negf %535 : vector<8x32xf32>
    %537 = math.exp %536 : vector<8x32xf32>
    %cst_173 = arith.constant 1.000000e+00 : f32
    %538 = vector.broadcast %cst_173 : f32 to vector<8x32xf32>
    %539 = arith.addf %538, %537 : vector<8x32xf32>
    %540 = arith.divf %538, %539 : vector<8x32xf32>
    %541 = arith.mulf %528, %512 : vector<8x32xf32>
    %542 = arith.mulf %520, %532 : vector<8x32xf32>
    %543 = arith.addf %541, %542 : vector<8x32xf32>
    %544 = math.tanh %543 : vector<8x32xf32>
    %545 = arith.mulf %540, %544 : vector<8x32xf32>
    %c2_i32_174 = arith.constant 2 : i32
    %546 = vector.broadcast %c2_i32_174 : i32 to vector<8x1xi32>
    %547 = arith.cmpi sgt, %28, %546 : vector<8x1xi32>
    %548 = vector.shape_cast %547 : vector<8x1xi1> to vector<8x1xi1>
    %549 = vector.broadcast %548 : vector<8x1xi1> to vector<8x32xi1>
    %550 = arith.select %549, %545, %509 : vector<8x32xi1>, vector<8x32xf32>
    %551 = vector.shape_cast %547 : vector<8x1xi1> to vector<8x1xi1>
    %552 = vector.broadcast %551 : vector<8x1xi1> to vector<8x32xi1>
    %553 = arith.select %552, %543, %512 : vector<8x32xi1>, vector<8x32xf32>
    %554 = vector.extract_strided_slice %399 {offsets = [24, 0], sizes = [8, 32], strides = [1, 1]} : vector<64x32xf32> to vector<8x32xf32>
    %cst_175 = arith.constant dense<0.000000e+00> : vector<8x32xf32>
    %555 = tpu.matmul %550, %422, %cst_175 {dimension_numbers = #tpu.dot_dimension_numbers<[1], [0], [0], [1], [0, 0, 1, 1], [], []>} : vector<8x32xf32>, vector<32x32xf32>, vector<8x32xf32> -> vector<8x32xf32>
    %556 = arith.addf %554, %555 : vector<8x32xf32>
    %557 = arith.negf %556 : vector<8x32xf32>
    %558 = math.exp %557 : vector<8x32xf32>
    %cst_176 = arith.constant 1.000000e+00 : f32
    %559 = vector.broadcast %cst_176 : f32 to vector<8x32xf32>
    %560 = arith.addf %559, %558 : vector<8x32xf32>
    %561 = arith.divf %559, %560 : vector<8x32xf32>
    %562 = vector.extract_strided_slice %406 {offsets = [24, 0], sizes = [8, 32], strides = [1, 1]} : vector<64x32xf32> to vector<8x32xf32>
    %cst_177 = arith.constant dense<0.000000e+00> : vector<8x32xf32>
    %563 = tpu.matmul %550, %424, %cst_177 {dimension_numbers = #tpu.dot_dimension_numbers<[1], [0], [0], [1], [0, 0, 1, 1], [], []>} : vector<8x32xf32>, vector<32x32xf32>, vector<8x32xf32> -> vector<8x32xf32>
    %564 = arith.addf %562, %563 : vector<8x32xf32>
    %565 = arith.negf %564 : vector<8x32xf32>
    %566 = math.exp %565 : vector<8x32xf32>
    %cst_178 = arith.constant 1.000000e+00 : f32
    %567 = vector.broadcast %cst_178 : f32 to vector<8x32xf32>
    %568 = arith.addf %567, %566 : vector<8x32xf32>
    %569 = arith.divf %567, %568 : vector<8x32xf32>
    %570 = vector.extract_strided_slice %413 {offsets = [24, 0], sizes = [8, 32], strides = [1, 1]} : vector<64x32xf32> to vector<8x32xf32>
    %cst_179 = arith.constant dense<0.000000e+00> : vector<8x32xf32>
    %571 = tpu.matmul %550, %426, %cst_179 {dimension_numbers = #tpu.dot_dimension_numbers<[1], [0], [0], [1], [0, 0, 1, 1], [], []>} : vector<8x32xf32>, vector<32x32xf32>, vector<8x32xf32> -> vector<8x32xf32>
    %572 = arith.addf %570, %571 : vector<8x32xf32>
    %573 = math.tanh %572 : vector<8x32xf32>
    %574 = vector.extract_strided_slice %420 {offsets = [24, 0], sizes = [8, 32], strides = [1, 1]} : vector<64x32xf32> to vector<8x32xf32>
    %cst_180 = arith.constant dense<0.000000e+00> : vector<8x32xf32>
    %575 = tpu.matmul %550, %428, %cst_180 {dimension_numbers = #tpu.dot_dimension_numbers<[1], [0], [0], [1], [0, 0, 1, 1], [], []>} : vector<8x32xf32>, vector<32x32xf32>, vector<8x32xf32> -> vector<8x32xf32>
    %576 = arith.addf %574, %575 : vector<8x32xf32>
    %577 = arith.negf %576 : vector<8x32xf32>
    %578 = math.exp %577 : vector<8x32xf32>
    %cst_181 = arith.constant 1.000000e+00 : f32
    %579 = vector.broadcast %cst_181 : f32 to vector<8x32xf32>
    %580 = arith.addf %579, %578 : vector<8x32xf32>
    %581 = arith.divf %579, %580 : vector<8x32xf32>
    %582 = arith.mulf %569, %553 : vector<8x32xf32>
    %583 = arith.mulf %561, %573 : vector<8x32xf32>
    %584 = arith.addf %582, %583 : vector<8x32xf32>
    %585 = math.tanh %584 : vector<8x32xf32>
    %586 = arith.mulf %581, %585 : vector<8x32xf32>
    %c3_i32_182 = arith.constant 3 : i32
    %587 = vector.broadcast %c3_i32_182 : i32 to vector<8x1xi32>
    %588 = arith.cmpi sgt, %28, %587 : vector<8x1xi32>
    %589 = vector.shape_cast %588 : vector<8x1xi1> to vector<8x1xi1>
    %590 = vector.broadcast %589 : vector<8x1xi1> to vector<8x32xi1>
    %591 = arith.select %590, %586, %550 : vector<8x32xi1>, vector<8x32xf32>
    %592 = vector.shape_cast %588 : vector<8x1xi1> to vector<8x1xi1>
    %593 = vector.broadcast %592 : vector<8x1xi1> to vector<8x32xi1>
    %594 = arith.select %593, %584, %553 : vector<8x32xi1>, vector<8x32xf32>
    %595 = vector.extract_strided_slice %399 {offsets = [32, 0], sizes = [8, 32], strides = [1, 1]} : vector<64x32xf32> to vector<8x32xf32>
    %cst_183 = arith.constant dense<0.000000e+00> : vector<8x32xf32>
    %596 = tpu.matmul %591, %422, %cst_183 {dimension_numbers = #tpu.dot_dimension_numbers<[1], [0], [0], [1], [0, 0, 1, 1], [], []>} : vector<8x32xf32>, vector<32x32xf32>, vector<8x32xf32> -> vector<8x32xf32>
    %597 = arith.addf %595, %596 : vector<8x32xf32>
    %598 = arith.negf %597 : vector<8x32xf32>
    %599 = math.exp %598 : vector<8x32xf32>
    %cst_184 = arith.constant 1.000000e+00 : f32
    %600 = vector.broadcast %cst_184 : f32 to vector<8x32xf32>
    %601 = arith.addf %600, %599 : vector<8x32xf32>
    %602 = arith.divf %600, %601 : vector<8x32xf32>
    %603 = vector.extract_strided_slice %406 {offsets = [32, 0], sizes = [8, 32], strides = [1, 1]} : vector<64x32xf32> to vector<8x32xf32>
    %cst_185 = arith.constant dense<0.000000e+00> : vector<8x32xf32>
    %604 = tpu.matmul %591, %424, %cst_185 {dimension_numbers = #tpu.dot_dimension_numbers<[1], [0], [0], [1], [0, 0, 1, 1], [], []>} : vector<8x32xf32>, vector<32x32xf32>, vector<8x32xf32> -> vector<8x32xf32>
    %605 = arith.addf %603, %604 : vector<8x32xf32>
    %606 = arith.negf %605 : vector<8x32xf32>
    %607 = math.exp %606 : vector<8x32xf32>
    %cst_186 = arith.constant 1.000000e+00 : f32
    %608 = vector.broadcast %cst_186 : f32 to vector<8x32xf32>
    %609 = arith.addf %608, %607 : vector<8x32xf32>
    %610 = arith.divf %608, %609 : vector<8x32xf32>
    %611 = vector.extract_strided_slice %413 {offsets = [32, 0], sizes = [8, 32], strides = [1, 1]} : vector<64x32xf32> to vector<8x32xf32>
    %cst_187 = arith.constant dense<0.000000e+00> : vector<8x32xf32>
    %612 = tpu.matmul %591, %426, %cst_187 {dimension_numbers = #tpu.dot_dimension_numbers<[1], [0], [0], [1], [0, 0, 1, 1], [], []>} : vector<8x32xf32>, vector<32x32xf32>, vector<8x32xf32> -> vector<8x32xf32>
    %613 = arith.addf %611, %612 : vector<8x32xf32>
    %614 = math.tanh %613 : vector<8x32xf32>
    %615 = vector.extract_strided_slice %420 {offsets = [32, 0], sizes = [8, 32], strides = [1, 1]} : vector<64x32xf32> to vector<8x32xf32>
    %cst_188 = arith.constant dense<0.000000e+00> : vector<8x32xf32>
    %616 = tpu.matmul %591, %428, %cst_188 {dimension_numbers = #tpu.dot_dimension_numbers<[1], [0], [0], [1], [0, 0, 1, 1], [], []>} : vector<8x32xf32>, vector<32x32xf32>, vector<8x32xf32> -> vector<8x32xf32>
    %617 = arith.addf %615, %616 : vector<8x32xf32>
    %618 = arith.negf %617 : vector<8x32xf32>
    %619 = math.exp %618 : vector<8x32xf32>
    %cst_189 = arith.constant 1.000000e+00 : f32
    %620 = vector.broadcast %cst_189 : f32 to vector<8x32xf32>
    %621 = arith.addf %620, %619 : vector<8x32xf32>
    %622 = arith.divf %620, %621 : vector<8x32xf32>
    %623 = arith.mulf %610, %594 : vector<8x32xf32>
    %624 = arith.mulf %602, %614 : vector<8x32xf32>
    %625 = arith.addf %623, %624 : vector<8x32xf32>
    %626 = math.tanh %625 : vector<8x32xf32>
    %627 = arith.mulf %622, %626 : vector<8x32xf32>
    %c4_i32_190 = arith.constant 4 : i32
    %628 = vector.broadcast %c4_i32_190 : i32 to vector<8x1xi32>
    %629 = arith.cmpi sgt, %28, %628 : vector<8x1xi32>
    %630 = vector.shape_cast %629 : vector<8x1xi1> to vector<8x1xi1>
    %631 = vector.broadcast %630 : vector<8x1xi1> to vector<8x32xi1>
    %632 = arith.select %631, %627, %591 : vector<8x32xi1>, vector<8x32xf32>
    %633 = vector.shape_cast %629 : vector<8x1xi1> to vector<8x1xi1>
    %634 = vector.broadcast %633 : vector<8x1xi1> to vector<8x32xi1>
    %635 = arith.select %634, %625, %594 : vector<8x32xi1>, vector<8x32xf32>
    %636 = vector.extract_strided_slice %399 {offsets = [40, 0], sizes = [8, 32], strides = [1, 1]} : vector<64x32xf32> to vector<8x32xf32>
    %cst_191 = arith.constant dense<0.000000e+00> : vector<8x32xf32>
    %637 = tpu.matmul %632, %422, %cst_191 {dimension_numbers = #tpu.dot_dimension_numbers<[1], [0], [0], [1], [0, 0, 1, 1], [], []>} : vector<8x32xf32>, vector<32x32xf32>, vector<8x32xf32> -> vector<8x32xf32>
    %638 = arith.addf %636, %637 : vector<8x32xf32>
    %639 = arith.negf %638 : vector<8x32xf32>
    %640 = math.exp %639 : vector<8x32xf32>
    %cst_192 = arith.constant 1.000000e+00 : f32
    %641 = vector.broadcast %cst_192 : f32 to vector<8x32xf32>
    %642 = arith.addf %641, %640 : vector<8x32xf32>
    %643 = arith.divf %641, %642 : vector<8x32xf32>
    %644 = vector.extract_strided_slice %406 {offsets = [40, 0], sizes = [8, 32], strides = [1, 1]} : vector<64x32xf32> to vector<8x32xf32>
    %cst_193 = arith.constant dense<0.000000e+00> : vector<8x32xf32>
    %645 = tpu.matmul %632, %424, %cst_193 {dimension_numbers = #tpu.dot_dimension_numbers<[1], [0], [0], [1], [0, 0, 1, 1], [], []>} : vector<8x32xf32>, vector<32x32xf32>, vector<8x32xf32> -> vector<8x32xf32>
    %646 = arith.addf %644, %645 : vector<8x32xf32>
    %647 = arith.negf %646 : vector<8x32xf32>
    %648 = math.exp %647 : vector<8x32xf32>
    %cst_194 = arith.constant 1.000000e+00 : f32
    %649 = vector.broadcast %cst_194 : f32 to vector<8x32xf32>
    %650 = arith.addf %649, %648 : vector<8x32xf32>
    %651 = arith.divf %649, %650 : vector<8x32xf32>
    %652 = vector.extract_strided_slice %413 {offsets = [40, 0], sizes = [8, 32], strides = [1, 1]} : vector<64x32xf32> to vector<8x32xf32>
    %cst_195 = arith.constant dense<0.000000e+00> : vector<8x32xf32>
    %653 = tpu.matmul %632, %426, %cst_195 {dimension_numbers = #tpu.dot_dimension_numbers<[1], [0], [0], [1], [0, 0, 1, 1], [], []>} : vector<8x32xf32>, vector<32x32xf32>, vector<8x32xf32> -> vector<8x32xf32>
    %654 = arith.addf %652, %653 : vector<8x32xf32>
    %655 = math.tanh %654 : vector<8x32xf32>
    %656 = vector.extract_strided_slice %420 {offsets = [40, 0], sizes = [8, 32], strides = [1, 1]} : vector<64x32xf32> to vector<8x32xf32>
    %cst_196 = arith.constant dense<0.000000e+00> : vector<8x32xf32>
    %657 = tpu.matmul %632, %428, %cst_196 {dimension_numbers = #tpu.dot_dimension_numbers<[1], [0], [0], [1], [0, 0, 1, 1], [], []>} : vector<8x32xf32>, vector<32x32xf32>, vector<8x32xf32> -> vector<8x32xf32>
    %658 = arith.addf %656, %657 : vector<8x32xf32>
    %659 = arith.negf %658 : vector<8x32xf32>
    %660 = math.exp %659 : vector<8x32xf32>
    %cst_197 = arith.constant 1.000000e+00 : f32
    %661 = vector.broadcast %cst_197 : f32 to vector<8x32xf32>
    %662 = arith.addf %661, %660 : vector<8x32xf32>
    %663 = arith.divf %661, %662 : vector<8x32xf32>
    %664 = arith.mulf %651, %635 : vector<8x32xf32>
    %665 = arith.mulf %643, %655 : vector<8x32xf32>
    %666 = arith.addf %664, %665 : vector<8x32xf32>
    %667 = math.tanh %666 : vector<8x32xf32>
    %668 = arith.mulf %663, %667 : vector<8x32xf32>
    %c5_i32_198 = arith.constant 5 : i32
    %669 = vector.broadcast %c5_i32_198 : i32 to vector<8x1xi32>
    %670 = arith.cmpi sgt, %28, %669 : vector<8x1xi32>
    %671 = vector.shape_cast %670 : vector<8x1xi1> to vector<8x1xi1>
    %672 = vector.broadcast %671 : vector<8x1xi1> to vector<8x32xi1>
    %673 = arith.select %672, %668, %632 : vector<8x32xi1>, vector<8x32xf32>
    %674 = vector.shape_cast %670 : vector<8x1xi1> to vector<8x1xi1>
    %675 = vector.broadcast %674 : vector<8x1xi1> to vector<8x32xi1>
    %676 = arith.select %675, %666, %635 : vector<8x32xi1>, vector<8x32xf32>
    %677 = vector.extract_strided_slice %399 {offsets = [48, 0], sizes = [8, 32], strides = [1, 1]} : vector<64x32xf32> to vector<8x32xf32>
    %cst_199 = arith.constant dense<0.000000e+00> : vector<8x32xf32>
    %678 = tpu.matmul %673, %422, %cst_199 {dimension_numbers = #tpu.dot_dimension_numbers<[1], [0], [0], [1], [0, 0, 1, 1], [], []>} : vector<8x32xf32>, vector<32x32xf32>, vector<8x32xf32> -> vector<8x32xf32>
    %679 = arith.addf %677, %678 : vector<8x32xf32>
    %680 = arith.negf %679 : vector<8x32xf32>
    %681 = math.exp %680 : vector<8x32xf32>
    %cst_200 = arith.constant 1.000000e+00 : f32
    %682 = vector.broadcast %cst_200 : f32 to vector<8x32xf32>
    %683 = arith.addf %682, %681 : vector<8x32xf32>
    %684 = arith.divf %682, %683 : vector<8x32xf32>
    %685 = vector.extract_strided_slice %406 {offsets = [48, 0], sizes = [8, 32], strides = [1, 1]} : vector<64x32xf32> to vector<8x32xf32>
    %cst_201 = arith.constant dense<0.000000e+00> : vector<8x32xf32>
    %686 = tpu.matmul %673, %424, %cst_201 {dimension_numbers = #tpu.dot_dimension_numbers<[1], [0], [0], [1], [0, 0, 1, 1], [], []>} : vector<8x32xf32>, vector<32x32xf32>, vector<8x32xf32> -> vector<8x32xf32>
    %687 = arith.addf %685, %686 : vector<8x32xf32>
    %688 = arith.negf %687 : vector<8x32xf32>
    %689 = math.exp %688 : vector<8x32xf32>
    %cst_202 = arith.constant 1.000000e+00 : f32
    %690 = vector.broadcast %cst_202 : f32 to vector<8x32xf32>
    %691 = arith.addf %690, %689 : vector<8x32xf32>
    %692 = arith.divf %690, %691 : vector<8x32xf32>
    %693 = vector.extract_strided_slice %413 {offsets = [48, 0], sizes = [8, 32], strides = [1, 1]} : vector<64x32xf32> to vector<8x32xf32>
    %cst_203 = arith.constant dense<0.000000e+00> : vector<8x32xf32>
    %694 = tpu.matmul %673, %426, %cst_203 {dimension_numbers = #tpu.dot_dimension_numbers<[1], [0], [0], [1], [0, 0, 1, 1], [], []>} : vector<8x32xf32>, vector<32x32xf32>, vector<8x32xf32> -> vector<8x32xf32>
    %695 = arith.addf %693, %694 : vector<8x32xf32>
    %696 = math.tanh %695 : vector<8x32xf32>
    %697 = vector.extract_strided_slice %420 {offsets = [48, 0], sizes = [8, 32], strides = [1, 1]} : vector<64x32xf32> to vector<8x32xf32>
    %cst_204 = arith.constant dense<0.000000e+00> : vector<8x32xf32>
    %698 = tpu.matmul %673, %428, %cst_204 {dimension_numbers = #tpu.dot_dimension_numbers<[1], [0], [0], [1], [0, 0, 1, 1], [], []>} : vector<8x32xf32>, vector<32x32xf32>, vector<8x32xf32> -> vector<8x32xf32>
    %699 = arith.addf %697, %698 : vector<8x32xf32>
    %700 = arith.negf %699 : vector<8x32xf32>
    %701 = math.exp %700 : vector<8x32xf32>
    %cst_205 = arith.constant 1.000000e+00 : f32
    %702 = vector.broadcast %cst_205 : f32 to vector<8x32xf32>
    %703 = arith.addf %702, %701 : vector<8x32xf32>
    %704 = arith.divf %702, %703 : vector<8x32xf32>
    %705 = arith.mulf %692, %676 : vector<8x32xf32>
    %706 = arith.mulf %684, %696 : vector<8x32xf32>
    %707 = arith.addf %705, %706 : vector<8x32xf32>
    %708 = math.tanh %707 : vector<8x32xf32>
    %709 = arith.mulf %704, %708 : vector<8x32xf32>
    %c6_i32_206 = arith.constant 6 : i32
    %710 = vector.broadcast %c6_i32_206 : i32 to vector<8x1xi32>
    %711 = arith.cmpi sgt, %28, %710 : vector<8x1xi32>
    %712 = vector.shape_cast %711 : vector<8x1xi1> to vector<8x1xi1>
    %713 = vector.broadcast %712 : vector<8x1xi1> to vector<8x32xi1>
    %714 = arith.select %713, %709, %673 : vector<8x32xi1>, vector<8x32xf32>
    %715 = vector.shape_cast %711 : vector<8x1xi1> to vector<8x1xi1>
    %716 = vector.broadcast %715 : vector<8x1xi1> to vector<8x32xi1>
    %717 = arith.select %716, %707, %676 : vector<8x32xi1>, vector<8x32xf32>
    %718 = vector.extract_strided_slice %399 {offsets = [56, 0], sizes = [8, 32], strides = [1, 1]} : vector<64x32xf32> to vector<8x32xf32>
    %cst_207 = arith.constant dense<0.000000e+00> : vector<8x32xf32>
    %719 = tpu.matmul %714, %422, %cst_207 {dimension_numbers = #tpu.dot_dimension_numbers<[1], [0], [0], [1], [0, 0, 1, 1], [], []>} : vector<8x32xf32>, vector<32x32xf32>, vector<8x32xf32> -> vector<8x32xf32>
    %720 = arith.addf %718, %719 : vector<8x32xf32>
    %721 = arith.negf %720 : vector<8x32xf32>
    %722 = math.exp %721 : vector<8x32xf32>
    %cst_208 = arith.constant 1.000000e+00 : f32
    %723 = vector.broadcast %cst_208 : f32 to vector<8x32xf32>
    %724 = arith.addf %723, %722 : vector<8x32xf32>
    %725 = arith.divf %723, %724 : vector<8x32xf32>
    %726 = vector.extract_strided_slice %406 {offsets = [56, 0], sizes = [8, 32], strides = [1, 1]} : vector<64x32xf32> to vector<8x32xf32>
    %cst_209 = arith.constant dense<0.000000e+00> : vector<8x32xf32>
    %727 = tpu.matmul %714, %424, %cst_209 {dimension_numbers = #tpu.dot_dimension_numbers<[1], [0], [0], [1], [0, 0, 1, 1], [], []>} : vector<8x32xf32>, vector<32x32xf32>, vector<8x32xf32> -> vector<8x32xf32>
    %728 = arith.addf %726, %727 : vector<8x32xf32>
    %729 = arith.negf %728 : vector<8x32xf32>
    %730 = math.exp %729 : vector<8x32xf32>
    %cst_210 = arith.constant 1.000000e+00 : f32
    %731 = vector.broadcast %cst_210 : f32 to vector<8x32xf32>
    %732 = arith.addf %731, %730 : vector<8x32xf32>
    %733 = arith.divf %731, %732 : vector<8x32xf32>
    %734 = vector.extract_strided_slice %413 {offsets = [56, 0], sizes = [8, 32], strides = [1, 1]} : vector<64x32xf32> to vector<8x32xf32>
    %cst_211 = arith.constant dense<0.000000e+00> : vector<8x32xf32>
    %735 = tpu.matmul %714, %426, %cst_211 {dimension_numbers = #tpu.dot_dimension_numbers<[1], [0], [0], [1], [0, 0, 1, 1], [], []>} : vector<8x32xf32>, vector<32x32xf32>, vector<8x32xf32> -> vector<8x32xf32>
    %736 = arith.addf %734, %735 : vector<8x32xf32>
    %737 = math.tanh %736 : vector<8x32xf32>
    %738 = vector.extract_strided_slice %420 {offsets = [56, 0], sizes = [8, 32], strides = [1, 1]} : vector<64x32xf32> to vector<8x32xf32>
    %cst_212 = arith.constant dense<0.000000e+00> : vector<8x32xf32>
    %739 = tpu.matmul %714, %428, %cst_212 {dimension_numbers = #tpu.dot_dimension_numbers<[1], [0], [0], [1], [0, 0, 1, 1], [], []>} : vector<8x32xf32>, vector<32x32xf32>, vector<8x32xf32> -> vector<8x32xf32>
    %740 = arith.addf %738, %739 : vector<8x32xf32>
    %741 = arith.negf %740 : vector<8x32xf32>
    %742 = math.exp %741 : vector<8x32xf32>
    %cst_213 = arith.constant 1.000000e+00 : f32
    %743 = vector.broadcast %cst_213 : f32 to vector<8x32xf32>
    %744 = arith.addf %743, %742 : vector<8x32xf32>
    %745 = arith.divf %743, %744 : vector<8x32xf32>
    %746 = arith.mulf %733, %717 : vector<8x32xf32>
    %747 = arith.mulf %725, %737 : vector<8x32xf32>
    %748 = arith.addf %746, %747 : vector<8x32xf32>
    %749 = math.tanh %748 : vector<8x32xf32>
    %750 = arith.mulf %745, %749 : vector<8x32xf32>
    %c7_i32_214 = arith.constant 7 : i32
    %751 = vector.broadcast %c7_i32_214 : i32 to vector<8x1xi32>
    %752 = arith.cmpi sgt, %28, %751 : vector<8x1xi32>
    %753 = vector.shape_cast %752 : vector<8x1xi1> to vector<8x1xi1>
    %754 = vector.broadcast %753 : vector<8x1xi1> to vector<8x32xi1>
    %755 = arith.select %754, %750, %714 : vector<8x32xi1>, vector<8x32xf32>
    %c0_215 = arith.constant 0 : index
    %c0_216 = arith.constant 0 : index
    %756 = vector.load %arg12[%c0_215, %c0_216] : memref<1x32xf32, #tpu.memory_space<vmem>>, vector<1x32xf32>
    %757 = vector.broadcast %756 : vector<1x32xf32> to vector<8x32xf32>
    %758 = arith.mulf %755, %757 : vector<8x32xf32>
    %cst_217 = arith.constant dense<0.000000e+00> : vector<8xf32>
    %759 = vector.multi_reduction <add>, %758, %cst_217 [1] : vector<8x32xf32> to vector<8xf32>
    %760 = vector.shape_cast %759 : vector<8xf32> to vector<8x1xf32>
    %c0_218 = arith.constant 0 : index
    %c0_219 = arith.constant 0 : index
    %761 = vector.load %arg13[%c0_218, %c0_219] : memref<8x2xf32, #tpu.memory_space<vmem>>, vector<8x2xf32>
    %cst_220 = arith.constant 5.000000e-01 : f32
    %762 = vector.broadcast %cst_220 : f32 to vector<8x2xf32>
    %763 = arith.cmpf ogt, %761, %762 : vector<8x2xf32>
    %cst_221 = arith.constant -1.000000e+30 : f32
    %764 = vector.shape_cast %760 : vector<8x1xf32> to vector<8x1xf32>
    %765 = vector.broadcast %764 : vector<8x1xf32> to vector<8x2xf32>
    %766 = vector.broadcast %cst_221 : f32 to vector<8x2xf32>
    %767 = arith.select %763, %765, %766 : vector<8x2xi1>, vector<8x2xf32>
    %cst_222 = arith.constant dense<0xFF800000> : vector<2xf32>
    %768 = vector.multi_reduction <maximumf>, %767, %cst_222 [0] : vector<8x2xf32> to vector<2xf32>
    %769 = vector.shape_cast %768 : vector<2xf32> to vector<1x2xf32>
    %cst_223 = arith.constant 5.000000e-01 : f32
    %770 = vector.broadcast %cst_223 : f32 to vector<8x2xf32>
    %771 = arith.cmpf ogt, %761, %770 : vector<8x2xf32>
    %772 = vector.broadcast %769 : vector<1x2xf32> to vector<8x2xf32>
    %773 = arith.subf %767, %772 : vector<8x2xf32>
    %774 = math.exp %773 : vector<8x2xf32>
    %cst_224 = arith.constant 0.000000e+00 : f32
    %775 = vector.broadcast %cst_224 : f32 to vector<8x2xf32>
    %776 = arith.select %771, %774, %775 : vector<8x2xi1>, vector<8x2xf32>
    %cst_225 = arith.constant dense<0.000000e+00> : vector<2xf32>
    %777 = vector.multi_reduction <add>, %776, %cst_225 [0] : vector<8x2xf32> to vector<2xf32>
    %778 = vector.shape_cast %777 : vector<2xf32> to vector<1x2xf32>
    %c0_226 = arith.constant 0 : index
    %c0_227 = arith.constant 0 : index
    %779 = vector.load %arg14[%c0_226, %c0_227] : memref<1x2xf32, #tpu.memory_space<vmem>>, vector<1x2xf32>
    %780 = arith.mulf %778, %779 : vector<1x2xf32>
    %781 = tpu.reciprocal %780 {approx = true} : vector<1x2xf32> -> vector<1x2xf32>
    %782 = vector.broadcast %781 : vector<1x2xf32> to vector<8x2xf32>
    %783 = arith.mulf %776, %782 : vector<8x2xf32>
    %784 = tpu.transpose %783, [1, 0] : vector<8x2xf32> -> vector<2x8xf32>
    %cst_228 = arith.constant dense<0.000000e+00> : vector<2x32xf32>
    %785 = tpu.matmul %784, %755, %cst_228 {dimension_numbers = #tpu.dot_dimension_numbers<[1], [0], [0], [1], [0, 0, 1, 1], [], []>} : vector<2x8xf32>, vector<8x32xf32>, vector<2x32xf32> -> vector<2x32xf32>
    %c0_229 = arith.constant 0 : index
    %c0_230 = arith.constant 0 : index
    %786 = vector.load %arg15[%c0_229, %c0_230] : memref<32x16xf32, #tpu.memory_space<vmem>>, vector<32x16xf32>
    %cst_231 = arith.constant dense<0.000000e+00> : vector<2x16xf32>
    %787 = tpu.matmul %785, %786, %cst_231 {dimension_numbers = #tpu.dot_dimension_numbers<[1], [0], [0], [1], [0, 0, 1, 1], [], []>} : vector<2x32xf32>, vector<32x16xf32>, vector<2x16xf32> -> vector<2x16xf32>
    %c0_232 = arith.constant 0 : index
    %c0_233 = arith.constant 0 : index
    %788 = vector.load %arg18[%c0_232, %c0_233] : memref<2x16xf32, #tpu.memory_space<vmem>>, vector<2x16xf32>
    tpu.vector_store %arg18[%c0_232, %c0_233], %787 {strides = array<i32>} : memref<2x16xf32, #tpu.memory_space<vmem>>, vector<2x16xf32>,
    %c0_234 = arith.constant 0 : index
    %c0_235 = arith.constant 0 : index
    %789 = vector.load %arg16[%c0_234, %c0_235] : memref<16x2xf32, #tpu.memory_space<vmem>>, vector<16x2xf32>
    %cst_236 = arith.constant dense<0.000000e+00> : vector<2x2xf32>
    %790 = tpu.matmul %787, %789, %cst_236 {dimension_numbers = #tpu.dot_dimension_numbers<[1], [0], [0], [1], [0, 0, 1, 1], [], []>} : vector<2x16xf32>, vector<16x2xf32>, vector<2x2xf32> -> vector<2x2xf32>
    %c0_237 = arith.constant 0 : index
    %c0_238 = arith.constant 0 : index
    %791 = vector.load %arg17[%c0_237, %c0_238] : memref<2x2xf32, #tpu.memory_space<vmem>>, vector<2x2xf32>
    tpu.vector_store %arg17[%c0_237, %c0_238], %790 {strides = array<i32>} : memref<2x2xf32, #tpu.memory_space<vmem>>, vector<2x2xf32>,
    return
  }
  func.func @transform_0(%arg0: i32) -> (i32, i32) {
    %c0_i32 = arith.constant 0 : i32
    %c0_i32_0 = arith.constant 0 : i32
    %c0_i32_1 = arith.constant 0 : i32
    return %c0_i32, %c0_i32_0 : i32, i32
  }
  func.func @transform_1(%arg0: i32) -> (i32, i32) {
    %c0_i32 = arith.constant 0 : i32
    %c0_i32_0 = arith.constant 0 : i32
    %c0_i32_1 = arith.constant 0 : i32
    return %c0_i32, %c0_i32_0 : i32, i32
  }
  func.func @transform_2(%arg0: i32) -> (i32, i32) {
    %c0_i32 = arith.constant 0 : i32
    %c0_i32_0 = arith.constant 0 : i32
    %c0_i32_1 = arith.constant 0 : i32
    return %c0_i32, %c0_i32_0 : i32, i32
  }
  func.func @transform_3(%arg0: i32) -> (i32, i32) {
    %c0_i32 = arith.constant 0 : i32
    %c0_i32_0 = arith.constant 0 : i32
    %c0_i32_1 = arith.constant 0 : i32
    return %c0_i32, %c0_i32_0 : i32, i32
  }
  func.func @transform_4(%arg0: i32) -> (i32, i32) {
    %c0_i32 = arith.constant 0 : i32
    %c0_i32_0 = arith.constant 0 : i32
    %c0_i32_1 = arith.constant 0 : i32
    return %c0_i32, %c0_i32_0 : i32, i32
  }
  func.func @transform_5(%arg0: i32) -> (i32, i32, i32) {
    %c0_i32 = arith.constant 0 : i32
    %c0_i32_0 = arith.constant 0 : i32
    %c0_i32_1 = arith.constant 0 : i32
    %c0_i32_2 = arith.constant 0 : i32
    return %c0_i32, %c0_i32_0, %c0_i32_1 : i32, i32, i32
  }
  func.func @transform_6(%arg0: i32) -> (i32, i32, i32) {
    %c0_i32 = arith.constant 0 : i32
    %c0_i32_0 = arith.constant 0 : i32
    %c0_i32_1 = arith.constant 0 : i32
    %c0_i32_2 = arith.constant 0 : i32
    return %c0_i32, %c0_i32_0, %c0_i32_1 : i32, i32, i32
  }
  func.func @transform_7(%arg0: i32) -> (i32, i32, i32) {
    %c0_i32 = arith.constant 0 : i32
    %c0_i32_0 = arith.constant 0 : i32
    %c0_i32_1 = arith.constant 0 : i32
    %c0_i32_2 = arith.constant 0 : i32
    return %c0_i32, %c0_i32_0, %c0_i32_1 : i32, i32, i32
  }
  func.func @transform_8(%arg0: i32) -> (i32, i32, i32) {
    %c0_i32 = arith.constant 0 : i32
    %c0_i32_0 = arith.constant 0 : i32
    %c0_i32_1 = arith.constant 0 : i32
    %c0_i32_2 = arith.constant 0 : i32
    return %c0_i32, %c0_i32_0, %c0_i32_1 : i32, i32, i32
  }
  func.func @transform_9(%arg0: i32) -> (i32, i32, i32) {
    %c0_i32 = arith.constant 0 : i32
    %c0_i32_0 = arith.constant 0 : i32
    %c0_i32_1 = arith.constant 0 : i32
    %c0_i32_2 = arith.constant 0 : i32
    return %c0_i32, %c0_i32_0, %c0_i32_1 : i32, i32, i32
  }
  func.func @transform_10(%arg0: i32) -> (i32, i32, i32) {
    %c0_i32 = arith.constant 0 : i32
    %c0_i32_0 = arith.constant 0 : i32
    %c0_i32_1 = arith.constant 0 : i32
    %c0_i32_2 = arith.constant 0 : i32
    return %c0_i32, %c0_i32_0, %c0_i32_1 : i32, i32, i32
  }
  func.func @transform_11(%arg0: i32) -> (i32, i32) {
    %c0_i32 = arith.constant 0 : i32
    %c0_i32_0 = arith.constant 0 : i32
    %c0_i32_1 = arith.constant 0 : i32
    return %c0_i32, %c0_i32_0 : i32, i32
  }
  func.func @transform_12(%arg0: i32) -> (i32, i32) {
    %c0_i32 = arith.constant 0 : i32
    %c0_i32_0 = arith.constant 0 : i32
    %c0_i32_1 = arith.constant 0 : i32
    return %c0_i32, %c0_i32_0 : i32, i32
  }
  func.func @transform_13(%arg0: i32) -> (i32, i32) {
    %c0_i32 = arith.constant 0 : i32
    %c0_i32_0 = arith.constant 0 : i32
    %c0_i32_1 = arith.constant 0 : i32
    return %c0_i32, %c0_i32_0 : i32, i32
  }
  func.func @transform_14(%arg0: i32) -> (i32, i32) {
    %c0_i32 = arith.constant 0 : i32
    %c0_i32_0 = arith.constant 0 : i32
    %c0_i32_1 = arith.constant 0 : i32
    return %c0_i32, %c0_i32_0 : i32, i32
  }
  func.func @transform_15(%arg0: i32) -> (i32, i32) {
    %c0_i32 = arith.constant 0 : i32
    %c0_i32_0 = arith.constant 0 : i32
    %c0_i32_1 = arith.constant 0 : i32
    return %c0_i32, %c0_i32_0 : i32, i32
  }
  func.func @transform_16(%arg0: i32) -> (i32, i32) {
    %c0_i32 = arith.constant 0 : i32
    %c0_i32_0 = arith.constant 0 : i32
    %c0_i32_1 = arith.constant 0 : i32
    return %c0_i32, %c0_i32_0 : i32, i32
  }
  func.func @transform_17(%arg0: i32) -> (i32, i32) {
    %c0_i32 = arith.constant 0 : i32
    %c0_i32_0 = arith.constant 0 : i32
    %c0_i32_1 = arith.constant 0 : i32
    return %c0_i32, %c0_i32_0 : i32, i32
  }
}

</mosaic_0001>

<bundles_post_ra>
// kernel: flaky_detect_forward.1
= control target key start
LH: loop header
LB: loop body
LE: loop exit
PB: predicated region body
PF: predicated region fallthrough
CT: control target
= control target key end

     0   :  { %s10652_s0 = inlined_call_operand.vmem [shape: f32[64,32], index: 0, kind: input, shape index: {}]   ;;  %s10653_s1 = inlined_call_operand.vmem [shape: s32[8,1], index: 1, kind: input, shape index: {}]   ;;  %s10654_s2 = inlined_call_operand.vmem [shape: f32[32,32], index: 2, kind: input, shape index: {}]   ;;  %s10655_s3 = inlined_call_operand.vmem [shape: f32[1,32], index: 3, kind: input, shape index: {}]   ;;  %s10656_s4 = inlined_call_operand.vmem [shape: f32[1,32], index: 4, kind: input, shape index: {}]   ;;  %s10657_s5 = inlined_call_operand.vmem [shape: f32[4,32,32], index: 5, kind: input, shape index: {}]   ;;  %s10658_s6 = inlined_call_operand.vmem [shape: f32[4,32,32], index: 6, kind: input, shape index: {}]   ;;  %s10659_s7 = inlined_call_operand.vmem [shape: f32[4,1,32], index: 7, kind: input, shape index: {}]   ;;  %s10660_s8 = inlined_call_operand.vmem [shape: f32[4,32,32], index: 8, kind: input, shape index: {}]   ;;  %s10661_s9 = inlined_call_operand.vmem [shape: f32[4,32,32], index: 9, kind: input, shape index: {}]   ;;  %s10662_s10 = inlined_call_operand.vmem [shape: f32[4,1,32], index: 10, kind: input, shape index: {}]   ;;  %s10663_s11 = inlined_call_operand.vmem [shape: f32[1,32], index: 11, kind: input, shape index: {}]   ;;  %s10664_s12 = inlined_call_operand.vmem [shape: f32[8,2], index: 12, kind: input, shape index: {}]   ;;  %s10665_s13 = inlined_call_operand.vmem [shape: f32[1,2], index: 13, kind: input, shape index: {}]   ;;  %s10666_s14 = inlined_call_operand.vmem [shape: f32[32,16], index: 14, kind: input, shape index: {}]   ;;  %s10667_s15 = inlined_call_operand.vmem [shape: f32[16,2], index: 15, kind: input, shape index: {}]   ;;  %s10668_s16 = inlined_call_operand.hbm [shape: f32[2,2], index: 16, kind: output, shape index: {0}]   ;;  %s10669_s17 = inlined_call_operand.hbm [shape: f32[2,16], index: 17, kind: output, shape index: {1}]  }
   0x1   :  { %10678 = sst [smem:[#allocation16_spill]] %s10652_s0 }
   0x2   :  { %10679 = sst [smem:[#allocation17_spill]] %s10653_s1 }
   0x3   :  { %23 = vsyncpa [#allocation3], 0  ;;  %v65_v0 = vld [vmem:[%s10654_s2] sm:$0xff]  ;;  %v66_v1 = vld [vmem:[%s10654_s2 + $0x8] sm:$0xff]  ;;  %vm69_vm0 = vcmask 261120   ;;  %s10680_s1 = sld [smem:[#allocation16_spill]] }
   0x4   :  { %v67_v2 = vld [vmem:[%s10654_s2 + $0x10] sm:$0xff]  ;;  %v8320_v3 = vpack.c.bf16 %v66_v1, %v65_v0  ;;  %v68_v4 = vld [vmem:[%s10654_s2 + $0x18] sm:$0xff] }
   0x5   :  { %v8324_v6 = vpack.c.bf16 %v68_v4, %v67_v2 }
   0x6   :  { %8321 = vmatprep.subr.bf16.mxu0 %v8320_v3 }
   0x7   :  { %8323 = vmatpush3.bf16.msra.mxu0 %v8320_v3 }
   0x9   :  { %v57_v5 = vld [vmem:[%s10680_s1] sm:$0xff] }
   0xa   :  { %7421 = vmatprep.mubr.msk.f32.mxu0 %vm69_vm0, %v57_v5 }
   0xb   :  { %24 = vsyncpa [#allocation5], 0  ;;  %8325 = vmatprep.subr.bf16.mxu0 %v8324_v6  ;;  %v58_v7 = vld [vmem:[%s10680_s1 + $0x8] sm:$0xff]  ;;  %v59_v8 = vld [vmem:[%s10680_s1 + $0x10] sm:$0xff]  ;;  %s10681_s27 = sld [smem:[#allocation17_spill]]  ;;  %vm9135_vm2 = vmmov 0  }
   0xc   :  { %8327 = vmatpush3.bf16.msra.mxu0 %v8324_v6  ;;  %v60_v9 = vld [vmem:[%s10680_s1 + $0x18] sm:$0xff]  ;;  %v61_v10 = vld [vmem:[%s10680_s1 + $0x20] sm:$0xff]  ;;  %v62_v11 = vld [vmem:[%s10680_s1 + $0x28] sm:$0xff] }
   0xd   :  { %v63_v12 = vld [vmem:[%s10680_s1 + $0x30] sm:$0xff]  ;;  %v64_v13 = vld [vmem:[%s10680_s1 + $0x38] sm:$0xff]  ;;  %v343_v6 = vld [vmem:[%s10657_s5] sm:$0xff] }
   0xf   :  { %7422 = vmatmul.mubr.msk.f32.vlgmr.msra.gmra.mrb[0].mxu0 %vm69_vm0, %v58_v7  ;;  %v344_v7 = vld [vmem:[%s10657_s5 + $0x8] sm:$0xff] }
  0x10   :  { %7424 = vmatprep.mubr.msk.f32.mxu0 %vm69_vm0, %v59_v8  ;;  %v6750_v8 = vld [vmem:[%s10657_s5 + $0x20] sm:$0xff] }
  0x13   :  { %7425 = vmatmul.mubr.msk.f32.gmra.mrb[2].mxu0 %vm69_vm0, %v60_v9  ;;  %v8328_v9 = vpack.c.bf16 %v344_v7, %v343_v6 }
  0x14   :  { %7427 = vmatprep.mubr.msk.f32.mxu0 %vm69_vm0, %v61_v10  ;;  %v6751_v10 = vld [vmem:[%s10657_s5 + $0x28] sm:$0xff] }
  0x15   :  { %8329 = vmatprep.subr.bf16.mxu1 %v8328_v9 }
  0x16   :  { %8331 = vmatpush3.bf16.msra.mxu1 %v8328_v9 }
  0x17   :  { %7428 = vmatmul.mubr.msk.f32.gmra.mrb[4].mxu0 %vm69_vm0, %v62_v11  ;;  %v8336_v11 = vpack.c.bf16 %v6751_v10, %v6750_v8 }
  0x18   :  { %7430 = vmatprep.mubr.msk.f32.mxu0 %vm69_vm0, %v63_v12  ;;  %v345_v12 = vld [vmem:[%s10657_s5 + $0x10] sm:$0xff] }
  0x19   :  { %8337 = vmatprep.subr.bf16.mxu0 %v8336_v11 }
  0x1a   :  { %8339 = vmatpush3.bf16.msra.mxu0 %v8336_v11 }
  0x1b   :  { %7431 = vmatmul.mubr.msk.f32.gmra.mrb[6].mxu0 %vm69_vm0, %v64_v13  ;;  %v346_v13 = vld [vmem:[%s10657_s5 + $0x18] sm:$0xff] }
  0xe2   :  { %v7423_v14 = vpop.f32.mrb[0].mxu0 }
  0xe3   :  { %v160_v15 = vpop.f32.mrb[1].mxu0  ;;  %v202_v19 = vsel %vm69_vm0, %v7423_v14, 0.0 }
  0xe4   :  { %v199_v16 = vsel %vm69_vm0, %v160_v15, 0.0 }
  0xe5   :  { %200 = vadd.xlane.f32.xlu0 %v199_v16  ;;  %v6753_v16 = vld [vmem:[%s10657_s5 + $0x38] sm:$0xff] }
  0xe6   :  { %v7426_v17 = vpop.f32.mrb[2].mxu0 }
  0xe7   :  { %v170_v18 = vpop.f32.mrb[3].mxu0  ;;  %v208_v23 = vsel %vm69_vm0, %v7426_v17, 0.0 }
  0xe8   :  { %v205_v20 = vsel %vm69_vm0, %v170_v18, 0.0 }
  0xe9   :  { %203 = vadd.xlane.f32.xlu0 %v202_v19  ;;  %206 = vadd.xlane.f32.xlu1 %v205_v20  ;;  %v6765_v19 = vld [vmem:[%s10657_s5 + $0x48] sm:$0xff] }
  0xea   :  { %v7429_v21 = vpop.f32.mrb[4].mxu0 }
  0xeb   :  { %v180_v22 = vpop.f32.mrb[5].mxu0  ;;  %v214_v27 = vsel %vm69_vm0, %v7429_v21, 0.0 }
  0xec   :  { %v211_v24 = vsel %vm69_vm0, %v180_v22, 0.0 }
  0xed   :  { %209 = vadd.xlane.f32.xlu1 %v208_v23  ;;  %212 = vadd.xlane.f32.xlu0 %v211_v24  ;;  %v9366_v24 = vld [vmem:[%s10681_s27] sm:$0xff] }
  0xee   :  { %v7432_v25 = vpop.f32.mrb[6].mxu0  ;;  %vm1167_vm1 = vcmp.gt.s32.totalorder %v9366_v24, 0  ;;  %vm1486_vm3 = vcmp.gt.s32.totalorder %v9366_v24, 1  ;;  %vm1805_vm4 = vcmp.gt.s32.totalorder %v9366_v24, 2  ;;  %vm2124_vm5 = vcmp.gt.s32.totalorder %v9366_v24, 3 }
  0xef   :  { %v190_v26 = vpop.f32.mrb[7].mxu0  ;;  %v220_v29 = vsel %vm69_vm0, %v7432_v25, 0.0  ;;  %vm2443_vm6 = vcmp.gt.s32.totalorder %v9366_v24, 4  ;;  %vm2762_vm7 = vcmp.gt.s32.totalorder %v9366_v24, 5  ;;  %vm3081_vm8 = vcmp.gt.s32.totalorder %v9366_v24, 6 }
  0xf0   :  { %v217_v28 = vsel %vm69_vm0, %v190_v26, 0.0  ;;  %vm3400_vm9 = vcmp.gt.s32.totalorder %v9366_v24, 7 }
  0xf1   :  { %215 = vadd.xlane.f32.xlu1 %v214_v27  ;;  %218 = vadd.xlane.f32.xlu0 %v217_v28 }
  0xf5   :  { %221 = vadd.xlane.f32.xlu1 %v220_v29 }
 0x172   :  { %v201_v30 = vpop.xlane.xlu0 %200 }
 0x173   :  { %v224_v31 = vmul.f32 0.03125, %v201_v30 }
 0x175   :  { %v9281_v32 = vsub.f32 %v160_v15, %v224_v31  ;;  %v8332_v15 = vpack.c.bf16 %v346_v13, %v345_v12 }
 0x176   :  { %v204_v33 = vpop.xlane.xlu0 %203  ;;  %v207_v34 = vpop.xlane.xlu1 %206 }
 0x177   :  { %v225_v35 = vmul.f32 0.03125, %v204_v33  ;;  %v226_v36 = vmul.f32 0.03125, %v207_v34  ;;  %v240_v37 = vmul.f32 %v9281_v32, %v9281_v32  ;;  %8333 = vmatprep.subr.bf16.mxu1 %v8332_v15 }
 0x178   :  { %8335 = vmatpush3.bf16.msra.mxu1 %v8332_v15 }
 0x179   :  { %v9285_v38 = vsub.f32 %v7423_v14, %v225_v35  ;;  %v9287_v39 = vsub.f32 %v170_v18, %v226_v36  ;;  %v248_v40 = vsel %vm69_vm0, %v240_v37, 0.0  ;;  %v6752_v14 = vld [vmem:[%s10657_s5 + $0x30] sm:$0xff]  ;;  %v6764_v18 = vld [vmem:[%s10657_s5 + $0x40] sm:$0xff] }
 0x17a   :  { %v210_v41 = vpop.xlane.xlu1 %209  ;;  %v213_v42 = vpop.xlane.xlu0 %212  ;;  %249 = vadd.xlane.f32.xlu0 %v248_v40  ;;  %v9351_v20 = vpack.c.bf16 %v6765_v19, %v6764_v18 }
 0x17b   :  { %v227_v43 = vmul.f32 0.03125, %v210_v41  ;;  %v228_v44 = vmul.f32 0.03125, %v213_v42  ;;  %v241_v45 = vmul.f32 %v9285_v38, %v9285_v38  ;;  %v242_v46 = vmul.f32 %v9287_v39, %v9287_v39 }
 0x17c   :  { %8345 = vmatprep.subr.bf16.mxu1 %v9351_v20 }
 0x17d   :  { %v9294_v47 = vsub.f32 %v7426_v17, %v227_v43  ;;  %v9296_v48 = vsub.f32 %v180_v22, %v228_v44  ;;  %v251_v49 = vsel %vm69_vm0, %v241_v45, 0.0  ;;  %v254_v50 = vsel %vm69_vm0, %v242_v46, 0.0  ;;  %v6779_v22 = vld [vmem:[%s10657_s5 + $0x68] sm:$0xff] }
 0x17e   :  { %v216_v51 = vpop.xlane.xlu1 %215  ;;  %252 = vadd.xlane.f32.xlu1 %v251_v49  ;;  %255 = vadd.xlane.f32.xlu0 %v254_v50  ;;  %v219_v52 = vpop.xlane.xlu0 %218  ;;  %v8340_v17 = vpack.c.bf16 %v6753_v16, %v6752_v14 }
 0x17f   :  { %v229_v53 = vmul.f32 0.03125, %v216_v51  ;;  %v230_v54 = vmul.f32 0.03125, %v219_v52  ;;  %v243_v55 = vmul.f32 %v9294_v47, %v9294_v47  ;;  %v244_v56 = vmul.f32 %v9296_v48, %v9296_v48  ;;  %v6739_v52 = vld [vmem:[%s10655_s3] ss:$0 sm:$0xff] }
 0x180   :  { %8341 = vmatprep.subr.bf16.mxu0 %v8340_v17 }
 0x181   :  { %v9304_v57 = vsub.f32 %v7429_v21, %v229_v53  ;;  %v9306_v58 = vsub.f32 %v190_v26, %v230_v54  ;;  %v257_v59 = vsel %vm69_vm0, %v243_v55, 0.0  ;;  %v260_v60 = vsel %vm69_vm0, %v244_v56, 0.0  ;;  %8343 = vmatpush3.bf16.msra.mxu0 %v8340_v17  ;;  %v6778_v21 = vld [vmem:[%s10657_s5 + $0x60] sm:$0xff] }
 0x182   :  { %258 = vadd.xlane.f32.xlu1 %v257_v59  ;;  %v222_v61 = vpop.xlane.xlu1 %221  ;;  %261 = vadd.xlane.f32.xlu0 %v260_v60  ;;  %v9360_v23 = vpack.c.bf16 %v6779_v22, %v6778_v21  ;;  %v6740_v59 = vld [vmem:[%s10656_s4] ss:$0 sm:$0xff] }
 0x183   :  { %v231_v62 = vmul.f32 0.03125, %v222_v61  ;;  %v245_v63 = vmul.f32 %v9304_v57, %v9304_v57  ;;  %v246_v0 = vmul.f32 %v9306_v58, %v9306_v58 }
 0x184   :  { %8353 = vmatprep.subr.bf16.mxu0 %v9360_v23 }
 0x185   :  { %v9314_v1 = vsub.f32 %v7432_v25, %v231_v62  ;;  %v263_v2 = vsel %vm69_vm0, %v245_v63, 0.0  ;;  %v266_v3 = vsel %vm69_vm0, %v246_v0, 0.0  ;;  %v9133_v25 = vmov 0  }
 0x186   :  { %264 = vadd.xlane.f32.xlu1 %v263_v2  ;;  %267 = vadd.xlane.f32.xlu0 %v266_v3  ;;  %v1168_v26 = vsel %vm1167_vm1, 1, %v9133_v25 }
 0x187   :  { %v247_v4 = vmul.f32 %v9314_v1, %v9314_v1  ;;  %8791 = vset.pattern.permute.xlu0 %v9133_v25  ;;  %8792 = vset.pattern.permute.xlu1 %v9133_v25 }
 0x189   :  { %v269_v5 = vsel %vm69_vm0, %v247_v4, 0.0 }
 0x18a   :  { %270 = vadd.xlane.f32.xlu1 %v269_v5 }
 0x19c   :  { %1170 = vperm.xlu0 %8791, %v1168_v26   ;;  %v6766_v26 = vld [vmem:[%s10657_s5 + $0x50] sm:$0xff] }
 0x207   :  { %v250_v27 = vpop.xlane.xlu0 %249 }
 0x208   :  { %v272_v28 = vmul.f32 0.03125, %v250_v27 }
 0x20a   :  { %v280_v29 = vadd.f32 1e-05, %v272_v28 }
 0x20b   :  { %v253_v30 = vpop.xlane.xlu1 %252  ;;  %v256_v31 = vpop.xlane.xlu0 %255 }
 0x20c   :  { %8793 = vrsqrt.f32 %v280_v29  ;;  %v273_v33 = vmul.f32 0.03125, %v253_v30  ;;  %v274_v34 = vmul.f32 0.03125, %v256_v31  ;;  %v6781_v31 = vld [vmem:[%s10657_s5 + $0x78] sm:$0xff] }
 0x20e   :  { %v281_v35 = vadd.f32 1e-05, %v273_v33  ;;  %v282_v36 = vadd.f32 1e-05, %v274_v34 }
 0x20f   :  { %v259_v37 = vpop.xlane.xlu1 %258  ;;  %v262_v40 = vpop.xlane.xlu0 %261 }
 0x210   :  { %8795 = vrsqrt.f32 %v281_v35  ;;  %v275_v41 = vmul.f32 0.03125, %v259_v37  ;;  %v276_v42 = vmul.f32 0.03125, %v262_v40  ;;  %v10673_v37 = vmov 0.0|0.0  }
 0x211   :  { %8797 = vrsqrt.f32 %v282_v36 }
 0x212   :  { %v283_v43 = vadd.f32 1e-05, %v275_v41  ;;  %v284_v44 = vadd.f32 1e-05, %v276_v42  ;;  %v838_v41 = vld [vmem:[%s10658_s6 + $0x8] sm:$0xff] }
 0x213   :  { %v265_v45 = vpop.xlane.xlu1 %264  ;;  %v268_v46 = vpop.xlane.xlu0 %267 }
 0x214   :  { %8799 = vrsqrt.f32 %v283_v43  ;;  %v277_v49 = vmul.f32 0.03125, %v265_v45  ;;  %v278_v50 = vmul.f32 0.03125, %v268_v46  ;;  %v6796_v43 = vld [vmem:[%s10658_s6 + $0x40] sm:$0xff]  ;;  %v839_v46 = vld [vmem:[%s10658_s6 + $0x10] sm:$0xff] }
 0x215   :  { %8801 = vrsqrt.f32 %v284_v44  ;;  %v6797_v44 = vld [vmem:[%s10658_s6 + $0x48] sm:$0xff] }
 0x216   :  { %v8794_v51 = vpop.eup %8793  ;;  %v285_v53 = vadd.f32 1e-05, %v277_v49  ;;  %v286_v54 = vadd.f32 1e-05, %v278_v50  ;;  %v840_v49 = vld [vmem:[%s10658_s6 + $0x18] sm:$0xff]  ;;  %v9440_v50 = vpack.c.bf16 %v6797_v44, %v6796_v43 }
 0x217   :  { %v296_v55 = vmul.f32 %v8794_v51, %v9281_v32  ;;  %v271_v56 = vpop.xlane.xlu1 %270  ;;  %v6798_v51 = vld [vmem:[%s10658_s6 + $0x50] sm:$0xff]  ;;  %v6783_v43 = vld [vmem:[%s10659_s7 + $0x3] ss:$0 sm:$0xff] }
 0x218   :  { %8803 = vrsqrt.f32 %v285_v53  ;;  %v279_v60 = vmul.f32 0.03125, %v271_v56  ;;  %v9454_v53 = vpack.c.bf16 %v840_v49, %v839_v46  ;;  %v6793_v56 = vld [vmem:[%s10658_s6 + $0x28] sm:$0xff] }
 0x219   :  { %v311_v61 = vmul.f32 %v6739_v52, %v296_v55  ;;  %8805 = vrsqrt.f32 %v286_v54  ;;  %v6792_v55 = vld [vmem:[%s10658_s6 + $0x20] sm:$0xff] }
 0x21a   :  { %v8796_v62 = vpop.eup %8795  ;;  %v287_v63 = vadd.f32 1e-05, %v279_v60  ;;  %v9484_v60 = vpack.c.bf16 %v6793_v56, %v6792_v55 }
 0x21b   :  { %v8798_v0 = vpop.eup %8797  ;;  %v326_v2 = vadd.f32 %v6740_v59, %v311_v61  ;;  %v297_v3 = vmul.f32 %v8796_v62, %v9285_v38  ;;  %v6794_v61 = vld [vmem:[%s10658_s6 + $0x30] sm:$0xff]  ;;  %v6795_v62 = vld [vmem:[%s10658_s6 + $0x38] sm:$0xff] }
 0x21c   :  { %v298_v4 = vmul.f32 %v8798_v0, %v9287_v39  ;;  %8807 = vrsqrt.f32 %v287_v63  ;;  %v9495_v63 = vpack.c.bf16 %v6795_v62, %v6794_v61  ;;  %v6800_v0 = vld [vmem:[%s10658_s6 + $0x60] sm:$0xff] }
 0x21d   :  { %8809 = vtanh.f32 %v326_v2  ;;  %v312_v32 = vmul.f32 %v6739_v52, %v297_v3  ;;  %v6801_v2 = vld [vmem:[%s10658_s6 + $0x68] sm:$0xff] }
 0x21e   :  { %v8800_v5 = vpop.eup %8799  ;;  %v313_v6 = vmul.f32 %v6739_v52, %v298_v4  ;;  %v9511_v3 = vpack.c.bf16 %v6801_v2, %v6800_v0  ;;  %v6802_v4 = vld [vmem:[%s10658_s6 + $0x70] sm:$0xff] }
 0x21f   :  { %v8802_v7 = vpop.eup %8801  ;;  %v327_v8 = vadd.f32 %v6740_v59, %v312_v32  ;;  %v299_v9 = vmul.f32 %v8800_v5, %v9294_v47  ;;  %v6803_v32 = vld [vmem:[%s10658_s6 + $0x78] sm:$0xff] }
 0x220   :  { %v328_v10 = vadd.f32 %v6740_v59, %v313_v6  ;;  %v300_v11 = vmul.f32 %v8802_v7, %v9296_v48  ;;  %v9524_v5 = vpack.c.bf16 %v6803_v32, %v6802_v4  ;;  %v1487_v6 = vsel %vm1486_vm3, 1, %v9133_v25 }
 0x221   :  { %8811 = vtanh.f32 %v327_v8  ;;  %v314_v12 = vmul.f32 %v6739_v52, %v299_v9  ;;  %1489 = vperm.xlu1 %8792, %v1487_v6   ;;  %v1806_v7 = vsel %vm1805_vm4, 1, %v9133_v25  ;;  %v2125_v8 = vsel %vm2124_vm5, 1, %v9133_v25 }
 0x222   :  { %v8804_v13 = vpop.eup %8803  ;;  %8813 = vtanh.f32 %v328_v10  ;;  %v315_v14 = vmul.f32 %v6739_v52, %v300_v11  ;;  %v2444_v9 = vsel %vm2443_vm6, 1, %v9133_v25  ;;  %v2763_v10 = vsel %vm2762_vm7, 1, %v9133_v25 }
 0x223   :  { %v8806_v38 = vpop.eup %8805  ;;  %v329_v15 = vadd.f32 %v6740_v59, %v314_v12  ;;  %v301_v39 = vmul.f32 %v8804_v13, %v9304_v57  ;;  %v6767_v57 = vld [vmem:[%s10657_s5 + $0x58] sm:$0xff]  ;;  %v3082_v11 = vsel %vm3081_vm8, 1, %v9133_v25  ;;  %v3401_v12 = vsel %vm3400_vm9, 1, %v9133_v25  ;;  %v9555_v13 = vld [vmem:[%s10659_s7] ss:$0 sm:$0xff] }
 0x224   :  { %v330_v16 = vadd.f32 %v6740_v59, %v315_v14  ;;  %v302_v17 = vmul.f32 %v8806_v38, %v9306_v58  ;;  %v8348_v28 = vpack.c.bf16 %v6767_v57, %v6766_v26  ;;  %v9560_v14 = vld [vmem:[%s10659_s7 + $0x1] ss:$0 sm:$0xff]  ;;  %vm6413_vm5 = vcmask 15360  }
 0x225   :  { %8815 = vtanh.f32 %v329_v15  ;;  %v316_v18 = vmul.f32 %v6739_v52, %v301_v39  ;;  %1808 = vperm.xlu1 %8792, %v1806_v7   ;;  %vm6472_vm6 = vcmask 64512   ;;  %vm6627_vm7 = vcmask 130048  }
 0x226   :  { %v8808_v19 = vpop.eup %8807  ;;  %8817 = vtanh.f32 %v330_v16  ;;  %v317_v47 = vmul.f32 %v6739_v52, %v302_v17  ;;  %vm6623_vm8 = vcmask 123904  }
 0x227   :  { %v8810_v21 = vpop.eup %8809  ;;  %v331_v22 = vadd.f32 %v6740_v59, %v316_v18  ;;  %v303_v48 = vmul.f32 %v8808_v19, %v9314_v1  ;;  %v6780_v1 = vld [vmem:[%s10657_s5 + $0x70] sm:$0xff] }
 0x228   :  { %v332_v27 = vadd.f32 %v6740_v59, %v317_v47  ;;  %7441 = vmatprep.mubr.msk.f32.mxu1 %vm69_vm0, %v8810_v21  ;;  %7461 = vmatprep.mubr.msk.f32.mxu0 %vm69_vm0, %v8810_v21  ;;  %v8356_v34 = vpack.c.bf16 %v6781_v31, %v6780_v1 }
 0x229   :  { %8819 = vtanh.f32 %v331_v22  ;;  %v318_v58 = vmul.f32 %v6739_v52, %v303_v48  ;;  %v6799_v52 = vld [vmem:[%s10658_s6 + $0x58] sm:$0xff]  ;;  %2127 = vperm.xlu1 %8792, %v2125_v8  }
 0x22a   :  { %8821 = vtanh.f32 %v332_v27  ;;  %v9457_v54 = vpack.c.bf16 %v6799_v52, %v6798_v51 }
 0x22b   :  { %v8812_v29 = vpop.eup %8811  ;;  %v333_v30 = vadd.f32 %v6740_v59, %v318_v58  ;;  %v10671_v59 = vmov 0.0  }
 0x22c   :  { %v8814_v33 = vpop.eup %8813  ;;  %7442 = vmatmul.mubr.msk.f32.vlgmr.msra.gmra.mrb[0].mxu1 %vm69_vm0, %v8812_v29  ;;  %7462 = vmatmul.mubr.msk.f32.vlgmr.msra.gmra.mrb[8].mxu0 %vm69_vm0, %v8812_v29 }
 0x22d   :  { %8823 = vtanh.f32 %v333_v30  ;;  %8347 = vmatpush3.bf16.msra.mxu1 %v9351_v20  ;;  %7444 = vmatprep.mubr.msk.f32.mxu1 %vm69_vm0, %v8814_v33 }
 0x22e   :  { %7464 = vmatprep.mubr.msk.f32.mxu0 %vm69_vm0, %v8814_v33  ;;  %8349 = vmatprep.subr.bf16.mxu1 %v8348_v28 }
 0x22f   :  { %v8816_v35 = vpop.eup %8815  ;;  %8355 = vmatpush3.bf16.msra.mxu0 %v9360_v23  ;;  %v837_v23 = vld [vmem:[%s10658_s6] sm:$0xff]  ;;  %2446 = vperm.xlu1 %8792, %v2444_v9  }
 0x230   :  { %v8818_v36 = vpop.eup %8817  ;;  %7445 = vmatmul.mubr.msk.f32.gmra.mrb[2].mxu1 %vm69_vm0, %v8816_v35  ;;  %7465 = vmatmul.mubr.msk.f32.gmra.mrb[10].mxu0 %vm69_vm0, %v8816_v35  ;;  %v9432_v45 = vpack.c.bf16 %v838_v41, %v837_v23 }
 0x231   :  { %7447 = vmatprep.mubr.msk.f32.mxu1 %vm69_vm0, %v8818_v36  ;;  %7467 = vmatprep.mubr.msk.f32.mxu0 %vm69_vm0, %v8818_v36 }
 0x232   :  { %8351 = vmatpush3.bf16.msra.mxu1 %v8348_v28  ;;  %8357 = vmatprep.subr.bf16.mxu0 %v8356_v34 }
 0x233   :  { %v8820_v20 = vpop.eup %8819  ;;  %8359 = vmatpush3.bf16.msra.mxu0 %v8356_v34  ;;  %8360 = vmatprep.subr.bf16.mxu1 %v10673_v37 }
 0x234   :  { %v8822_v40 = vpop.eup %8821  ;;  %7448 = vmatmul.mubr.msk.f32.gmra.mrb[4].mxu1 %vm69_vm0, %v8820_v20  ;;  %7468 = vmatmul.mubr.msk.f32.gmra.mrb[12].mxu0 %vm69_vm0, %v8820_v20 }
 0x235   :  { %7450 = vmatprep.mubr.msk.f32.mxu1 %vm69_vm0, %v8822_v40  ;;  %7470 = vmatprep.mubr.msk.f32.mxu0 %vm69_vm0, %v8822_v40 }
 0x236   :  { %8372 = vmatprep.subr.bf16.mxu0 %v10673_v37  ;;  %2765 = vperm.xlu1 %8792, %v2763_v10  }
 0x237   :  { %v8824_v42 = vpop.eup %8823 }
 0x238   :  { %7451 = vmatmul.mubr.msk.f32.gmra.mrb[6].mxu1 %vm69_vm0, %v8824_v42  ;;  %7471 = vmatmul.mubr.msk.f32.gmra.mrb[14].mxu0 %vm69_vm0, %v8824_v42 }
 0x239   :  { %7481 = vmatprep.mubr.msk.f32.mxu1 %vm69_vm0, %v8810_v21  ;;  %7501 = vmatprep.mubr.msk.f32.mxu0 %vm69_vm0, %v8810_v21 }
 0x23a   :  { %3084 = vperm.xlu1 %8792, %v3082_v11  }
 0x23c   :  { %7482 = vmatmul.mubr.msk.f32.vlgmr.msra.gmra.mrb[8].mxu1 %vm69_vm0, %v8812_v29  ;;  %7502 = vmatmul.mubr.msk.f32.vlgmr.msra.gmra.mrb[16].mxu0 %vm69_vm0, %v8812_v29 }
 0x23d   :  { %8362 = vmatpush3.bf16.msra.mxu1 %v9432_v45  ;;  %7484 = vmatprep.mubr.msk.f32.mxu1 %vm69_vm0, %v8814_v33 }
 0x23e   :  { %7504 = vmatprep.mubr.msk.f32.mxu0 %vm69_vm0, %v8814_v33  ;;  %8363 = vmatprep.subr.bf16.mxu1 %v10673_v37 }
 0x23f   :  { %8374 = vmatpush3.bf16.msra.mxu0 %v9440_v50  ;;  %3403 = vperm.xlu1 %8792, %v3401_v12  }
 0x240   :  { %7485 = vmatmul.mubr.msk.f32.gmra.mrb[10].mxu1 %vm69_vm0, %v8816_v35  ;;  %7505 = vmatmul.mubr.msk.f32.gmra.mrb[18].mxu0 %vm69_vm0, %v8816_v35 }
 0x241   :  { %7487 = vmatprep.mubr.msk.f32.mxu1 %vm69_vm0, %v8818_v36  ;;  %7507 = vmatprep.mubr.msk.f32.mxu0 %vm69_vm0, %v8818_v36 }
 0x242   :  { %8365 = vmatpush3.bf16.msra.mxu1 %v9454_v53  ;;  %8375 = vmatprep.subr.bf16.mxu0 %v10673_v37 }
 0x243   :  { %8377 = vmatpush3.bf16.msra.mxu0 %v9457_v54  ;;  %8366 = vmatprep.subr.bf16.mxu1 %v10673_v37 }
 0x244   :  { %7488 = vmatmul.mubr.msk.f32.gmra.mrb[12].mxu1 %vm69_vm0, %v8820_v20  ;;  %7508 = vmatmul.mubr.msk.f32.gmra.mrb[20].mxu0 %vm69_vm0, %v8820_v20 }
 0x245   :  { %7490 = vmatprep.mubr.msk.f32.mxu1 %vm69_vm0, %v8822_v40  ;;  %7510 = vmatprep.mubr.msk.f32.mxu0 %vm69_vm0, %v8822_v40 }
 0x246   :  { %8384 = vmatprep.subr.bf16.mxu0 %v10673_v37 }
 0x248   :  { %7491 = vmatmul.mubr.msk.f32.gmra.mrb[14].mxu1 %vm69_vm0, %v8824_v42  ;;  %7511 = vmatmul.mubr.msk.f32.gmra.mrb[22].mxu0 %vm69_vm0, %v8824_v42  ;;  %v6769_v42 = vld [vmem:[%s10659_s7 + $0x2] ss:$0 sm:$0xff] }
 0x249   :  { %7521 = vmatprep.mubr.msk.f32.mxu1 %vm9135_vm2, %v10671_v59  ;;  %7543 = vmatprep.mubr.msk.f32.mxu0 %vm9135_vm2, %v10671_v59 }
 0x24c   :  { %7522 = vmatmul.mubr.f32.vlgmr.msra.gmra.mrb[16].mxu1 %v10671_v59  ;;  %7544 = vmatmul.mubr.f32.vlgmr.msra.gmra.mrb[24].mxu0 %v10671_v59 }
 0x24d   :  { %8368 = vmatpush3.bf16.msra.mxu1 %v9484_v60  ;;  %7532 = vmatprep.mubr.msk.f32.mxu1 %vm9135_vm2, %v10671_v59 }
 0x24e   :  { %8369 = vmatprep.subr.bf16.mxu1 %v10673_v37  ;;  %8386 = vmatpush3.bf16.msra.mxu0 %v9432_v45 }
 0x24f   :  { %8387 = vmatprep.subr.bf16.mxu0 %v10673_v37  ;;  %7565 = vmatprep.mubr.msk.f32.mxu0 %vm9135_vm2, %v10671_v59 }
 0x251   :  { %8371 = vmatpush3.bf16.msra.mxu1 %v9495_v63 }
 0x252   :  { %8378 = vmatprep.subr.bf16.mxu1 %v10673_v37  ;;  %8389 = vmatpush3.bf16.msra.mxu0 %v9454_v53 }
 0x253   :  { %8396 = vmatprep.subr.bf16.mxu0 %v10673_v37 }
 0x254   :  { %7533 = vmatmul.mubr.f32.vlgmr.msra.gmra.mrb[18].mxu1 %v10671_v59 }
 0x255   :  { %8380 = vmatpush3.bf16.msra.mxu1 %v9511_v3  ;;  %7554 = vmatprep.mubr.msk.f32.mxu1 %vm9135_vm2, %v10671_v59 }
 0x256   :  { %8381 = vmatprep.subr.bf16.mxu1 %v10673_v37 }
 0x259   :  { %8383 = vmatpush3.bf16.msra.mxu1 %v9524_v5 }
 0x25a   :  { %8390 = vmatprep.subr.bf16.mxu1 %v10673_v37 }
 0x25c   :  { %7555 = vmatmul.mubr.f32.vlgmr.msra.gmra.mrb[20].mxu1 %v10671_v59 }
 0x25d   :  { %8392 = vmatpush3.bf16.msra.mxu1 %v9484_v60  ;;  %7576 = vmatprep.mubr.msk.f32.mxu1 %vm9135_vm2, %v10671_v59 }
 0x25e   :  { %8393 = vmatprep.subr.bf16.mxu1 %v10673_v37 }
 0x261   :  { %8395 = vmatpush3.bf16.msra.mxu1 %v9495_v63 }
 0x262   :  { %8402 = vmatprep.subr.bf16.mxu1 %v10673_v37 }
 0x2ff   :  { %v7443_v38 = vpop.f32.mrb[0].mxu1  ;;  %v7463_v15 = vpop.f32.mrb[8].mxu0 }
 0x300   :  { %v9563_v39 = vadd.f32 %v7443_v38, %v9555_v13  ;;  %v9566_v24 = vadd.f32 %v7463_v15, %v9560_v14  ;;  %v444_v25 = vpop.f32.mrb[1].mxu1  ;;  %v9568_v16 = vpop.f32.mrb[9].mxu0 }
 0x303   :  { %v7446_v17 = vpop.f32.mrb[2].mxu1  ;;  %v7466_v18 = vpop.f32.mrb[10].mxu0 }
 0x304   :  { %v9571_v19 = vadd.f32 %v7446_v17, %v9555_v13  ;;  %v9574_v47 = vadd.f32 %v7466_v18, %v9560_v14  ;;  %v454_v21 = vpop.f32.mrb[3].mxu1  ;;  %v572_v22 = vpop.f32.mrb[11].mxu0 }
 0x305   :  { %v9577_v48 = vadd.f32 %v9555_v13, %v454_v21  ;;  %v9580_v26 = vadd.f32 %v9560_v14, %v572_v22 }
 0x307   :  { %v7449_v57 = vpop.f32.mrb[4].mxu1  ;;  %v7469_v27 = vpop.f32.mrb[12].mxu0 }
 0x308   :  { %v9583_v58 = vadd.f32 %v7449_v57, %v9555_v13  ;;  %v9586_v28 = vadd.f32 %v7469_v27, %v9560_v14  ;;  %v464_v29 = vpop.f32.mrb[5].mxu1  ;;  %v582_v30 = vpop.f32.mrb[13].mxu0 }
 0x309   :  { %v9589_v1 = vadd.f32 %v9555_v13, %v464_v29  ;;  %v9592_v31 = vadd.f32 %v9560_v14, %v582_v30 }
 0x30b   :  { %v7452_v33 = vpop.f32.mrb[6].mxu1  ;;  %v7472_v34 = vpop.f32.mrb[14].mxu0 }
 0x30c   :  { %v9595_v35 = vadd.f32 %v7452_v33, %v9555_v13  ;;  %v9598_v36 = vadd.f32 %v7472_v34, %v9560_v14  ;;  %v474_v20 = vpop.f32.mrb[7].mxu1  ;;  %v592_v40 = vpop.f32.mrb[15].mxu0  ;;  %v445_v33 = vadd.f32 %v9555_v13, %v444_v25 }
 0x30d   :  { %v9601_v23 = vadd.f32 %v9555_v13, %v474_v20  ;;  %v9604_v41 = vadd.f32 %v9560_v14, %v592_v40 }
 0x30f   :  { %v7483_v44 = vpop.f32.mrb[8].mxu1  ;;  %v7503_v46 = vpop.f32.mrb[16].mxu0 }
 0x310   :  { %v9612_v49 = vadd.f32 %v7483_v44, %v6769_v42  ;;  %v9614_v51 = vadd.f32 %v7503_v46, %v6783_v43  ;;  %v680_v52 = vpop.f32.mrb[9].mxu1  ;;  %v798_v55 = vpop.f32.mrb[17].mxu0 }
 0x311   :  { %v681_v34 = vadd.f32 %v6769_v42, %v680_v52 }
 0x313   :  { %v7486_v56 = vpop.f32.mrb[10].mxu1  ;;  %v7506_v61 = vpop.f32.mrb[18].mxu0 }
 0x314   :  { %v9616_v62 = vadd.f32 %v7486_v56, %v6769_v42  ;;  %v9618_v0 = vadd.f32 %v7506_v61, %v6783_v43  ;;  %v690_v2 = vpop.f32.mrb[11].mxu1  ;;  %v808_v4 = vpop.f32.mrb[19].mxu0 }
 0x315   :  { %v9620_v32 = vadd.f32 %v6769_v42, %v690_v2  ;;  %v9622_v6 = vadd.f32 %v6783_v43, %v808_v4  ;;  %v563_v4 = vadd.f32 %v9560_v14, %v9568_v16 }
 0x317   :  { %v7489_v7 = vpop.f32.mrb[12].mxu1  ;;  %v7509_v8 = vpop.f32.mrb[20].mxu0 }
 0x318   :  { %v9624_v9 = vadd.f32 %v7489_v7, %v6769_v42  ;;  %v9626_v10 = vadd.f32 %v7509_v8, %v6783_v43  ;;  %v700_v11 = vpop.f32.mrb[13].mxu1  ;;  %v818_v12 = vpop.f32.mrb[21].mxu0 }
 0x319   :  { %v9628_v38 = vadd.f32 %v6769_v42, %v700_v11  ;;  %v9630_v15 = vadd.f32 %v6783_v43, %v818_v12 }
 0x31b   :  { %v7492_v17 = vpop.f32.mrb[14].mxu1  ;;  %v7512_v18 = vpop.f32.mrb[22].mxu0 }
 0x31c   :  { %v9632_v21 = vadd.f32 %v7492_v17, %v6769_v42  ;;  %v9634_v22 = vadd.f32 %v7512_v18, %v6783_v43  ;;  %v710_v57 = vpop.f32.mrb[15].mxu1  ;;  %v828_v27 = vpop.f32.mrb[23].mxu0  ;;  %v799_v18 = vadd.f32 %v6783_v43, %v798_v55 }
 0x31d   :  { %v9636_v29 = vadd.f32 %v6769_v42, %v710_v57  ;;  %v9638_v30 = vadd.f32 %v6783_v43, %v828_v27  ;;  %v9643_v55 = vpop.permute.xlu0 %1170 }
 0x31e   :  { %vm1172_vm10 = vcmp.eq.s32.totalorder %v9643_v55, 1 }
 0x31f   :  { %v925_v20 = vpop.f32.mrb[16].mxu1  ;;  %v1079_v40 = vpop.f32.mrb[24].mxu0 }
 0x320   :  { %v929_v44 = vadd.f32 %v925_v20, %v445_v33  ;;  %v1083_v46 = vadd.f32 %v1079_v40, %v681_v34  ;;  %v7523_v56 = vpop.f32.mrb[17].mxu1  ;;  %v7545_v61 = vpop.f32.mrb[25].mxu0 }
 0x322   :  { %v6804_v2 = vmul.f32 -1.442695, %v929_v44 }
 0x324   :  { %8825 = vpow2.f32 %v6804_v2 }
 0x327   :  { %v1002_v7 = vpop.f32.mrb[18].mxu1 }
 0x328   :  { %v1006_v8 = vadd.f32 %v1002_v7, %v563_v4  ;;  %v7534_v11 = vpop.f32.mrb[19].mxu1 }
 0x32a   :  { %v6805_v12 = vmul.f32 -1.442695, %v1006_v8 }
 0x32c   :  { %8827 = vpow2.f32 %v6805_v12 }
 0x32d   :  { %8829 = vtanh.f32 %v1083_v46 }
 0x32e   :  { %v8826_v17 = vpop.eup %8825 }
 0x32f   :  { %v933_v13 = vadd.f32 1.0, %v8826_v17  ;;  %v1151_v25 = vpop.f32.mrb[20].mxu1 }
 0x330   :  { %v1155_v42 = vadd.f32 %v1151_v25, %v799_v18  ;;  %v7556_v52 = vpop.f32.mrb[21].mxu1 }
 0x331   :  { %8831 = vrcp.f32 %v933_v13 }
 0x332   :  { %v6806_v57 = vmul.f32 -1.442695, %v1155_v42 }
 0x334   :  { %8833 = vpow2.f32 %v6806_v57 }
 0x336   :  { %v8828_v27 = vpop.eup %8827 }
 0x337   :  { %v1010_v33 = vadd.f32 1.0, %v8828_v27  ;;  %v8830_v34 = vpop.eup %8829 }
 0x339   :  { %8835 = vrcp.f32 %v1010_v33 }
 0x33b   :  { %v8832_v14 = vpop.eup %8831 }
 0x33c   :  { %v1163_v16 = vmul.f32 %v8832_v14, %v8830_v34 }
 0x33e   :  { %v8834_v20 = vpop.eup %8833 }
 0x33f   :  { %v1159_v44 = vadd.f32 1.0, %v8834_v20 }
 0x341   :  { %8837 = vrcp.f32 %v1159_v44 }
 0x343   :  { %v8836_v40 = vpop.eup %8835 }
 0x344   :  { %v1162_v56 = vmul.f32 0.0, %v8836_v40 }
 0x346   :  { %v1164_v61 = vadd.f32 %v1163_v16, %v1162_v56 }
 0x348   :  { %8839 = vtanh.f32 %v1164_v61 }
 0x34b   :  { %v8838_v43 = vpop.eup %8837 }
 0x352   :  { %v8840_v46 = vpop.eup %8839 }
 0x353   :  { %v1166_v2 = vmul.f32 %v8840_v46, %v8838_v43 }
 0x355   :  { %v9648_v4 = vsel %vm1172_vm10, %v1166_v2, 0.0  ;;  %v9688_v2 = vpop.permute.xlu1 %1489 }
 0x356   :  { %7566 = vmatmul.mubr.msk.f32.vlgmr.msra.gmra.mrb[26].mxu0 %vm69_vm0, %v9648_v4  ;;  %7577 = vmatmul.mubr.msk.f32.vlgmr.msra.gmra.mrb[22].mxu1 %vm69_vm0, %v9648_v4  ;;  %vm1491_vm11 = vcmp.eq.s32.totalorder %v9688_v2, 1 }
 0x357   :  { %8398 = vmatpush3.bf16.msra.mxu0 %v9440_v50  ;;  %8404 = vmatpush3.bf16.msra.mxu1 %v9511_v3 }
 0x358   :  { %8399 = vmatprep.subr.bf16.mxu0 %v10673_v37  ;;  %8405 = vmatprep.subr.bf16.mxu1 %v10673_v37 }
 0x359   :  { %7587 = vmatprep.mubr.msk.f32.mxu0 %vm9135_vm2, %v10671_v59  ;;  %7598 = vmatprep.mubr.msk.f32.mxu1 %vm9135_vm2, %v10671_v59 }
 0x35b   :  { %8401 = vmatpush3.bf16.msra.mxu0 %v9457_v54  ;;  %8407 = vmatpush3.bf16.msra.mxu1 %v9524_v5 }
 0x35c   :  { %8408 = vmatprep.subr.bf16.mxu0 %v10673_v37  ;;  %8414 = vmatprep.subr.bf16.mxu1 %v10673_v37 }
 0x35e   :  { %7588 = vmatmul.mubr.msk.f32.vlgmr.msra.gmra.mrb[28].mxu0 %vm69_vm0, %v9648_v4  ;;  %7599 = vmatmul.mubr.msk.f32.vlgmr.msra.gmra.mrb[24].mxu1 %vm69_vm0, %v9648_v4 }
 0x35f   :  { %8410 = vmatpush3.bf16.msra.mxu0 %v9432_v45  ;;  %8416 = vmatpush3.bf16.msra.mxu1 %v9484_v60 }
 0x360   :  { %8411 = vmatprep.subr.bf16.mxu0 %v10673_v37  ;;  %8417 = vmatprep.subr.bf16.mxu1 %v10673_v37 }
 0x361   :  { %7609 = vmatprep.mubr.msk.f32.mxu0 %vm9135_vm2, %v10671_v59  ;;  %7620 = vmatprep.mubr.msk.f32.mxu1 %vm9135_vm2, %v10671_v59 }
 0x363   :  { %8413 = vmatpush3.bf16.msra.mxu0 %v9454_v53  ;;  %8419 = vmatpush3.bf16.msra.mxu1 %v9495_v63 }
 0x364   :  { %8420 = vmatprep.subr.bf16.mxu0 %v10673_v37  ;;  %8426 = vmatprep.subr.bf16.mxu1 %v10673_v37 }
 0x429   :  { %v1244_v7 = vpop.f32.mrb[26].mxu0  ;;  %v1321_v8 = vpop.f32.mrb[22].mxu1 }
 0x42a   :  { %v1248_v11 = vadd.f32 %v1244_v7, %v9563_v39  ;;  %v1325_v12 = vadd.f32 %v1321_v8, %v9566_v24  ;;  %v7567_v17 = vpop.f32.mrb[27].mxu0  ;;  %v7578_v18 = vpop.f32.mrb[23].mxu1 }
 0x42c   :  { %v6808_v13 = vmul.f32 -1.442695, %v1248_v11  ;;  %v6810_v25 = vmul.f32 -1.442695, %v1325_v12 }
 0x42e   :  { %8841 = vpow2.f32 %v6808_v13 }
 0x42f   :  { %8843 = vpow2.f32 %v6810_v25 }
 0x431   :  { %v1398_v42 = vpop.f32.mrb[28].mxu0  ;;  %v1470_v52 = vpop.f32.mrb[24].mxu1 }
 0x432   :  { %v1402_v57 = vadd.f32 %v1398_v42, %v9612_v49  ;;  %v1474_v27 = vadd.f32 %v1470_v52, %v9614_v51  ;;  %v7589_v33 = vpop.f32.mrb[29].mxu0  ;;  %v7600_v34 = vpop.f32.mrb[25].mxu1  ;;  %v1174_v49 = vsel %vm1172_vm10, %v1164_v61, 0.0 }
 0x434   :  { %v6813_v14 = vmul.f32 -1.442695, %v1474_v27 }
 0x436   :  { %8845 = vpow2.f32 %v6813_v14 }
 0x437   :  { %8847 = vtanh.f32 %v1402_v57 }
 0x438   :  { %v8842_v16 = vpop.eup %8841 }
 0x439   :  { %v8844_v20 = vpop.eup %8843  ;;  %v1252_v39 = vadd.f32 1.0, %v8842_v16 }
 0x43a   :  { %v1329_v24 = vadd.f32 1.0, %v8844_v20 }
 0x43b   :  { %8849 = vrcp.f32 %v1252_v39 }
 0x43c   :  { %8851 = vrcp.f32 %v1329_v24 }
 0x440   :  { %v8846_v40 = vpop.eup %8845 }
 0x441   :  { %v8848_v44 = vpop.eup %8847  ;;  %v1478_v46 = vadd.f32 1.0, %v8846_v40 }
 0x443   :  { %8853 = vrcp.f32 %v1478_v46 }
 0x445   :  { %v8850_v56 = vpop.eup %8849 }
 0x446   :  { %v8852_v43 = vpop.eup %8851  ;;  %v1482_v51 = vmul.f32 %v8850_v56, %v8848_v44 }
 0x447   :  { %v1481_v7 = vmul.f32 %v8852_v43, %v1174_v49 }
 0x449   :  { %v1483_v8 = vadd.f32 %v1482_v51, %v1481_v7 }
 0x44b   :  { %8855 = vtanh.f32 %v1483_v8  ;;  %v9693_v11 = vsel %vm1491_vm11, %v1483_v8, %v1174_v49 }
 0x44d   :  { %v8854_v12 = vpop.eup %8853 }
 0x455   :  { %v8856_v17 = vpop.eup %8855 }
 0x456   :  { %v1485_v18 = vmul.f32 %v8856_v17, %v8854_v12 }
 0x458   :  { %v9698_v61 = vsel %vm1491_vm11, %v1485_v18, %v9648_v4 }
 0x459   :  { %7610 = vmatmul.mubr.msk.f32.vlgmr.msra.gmra.mrb[30].mxu0 %vm69_vm0, %v9698_v61  ;;  %7621 = vmatmul.mubr.msk.f32.vlgmr.msra.gmra.mrb[26].mxu1 %vm69_vm0, %v9698_v61 }
 0x45a   :  { %8422 = vmatpush3.bf16.msra.mxu0 %v9440_v50  ;;  %8428 = vmatpush3.bf16.msra.mxu1 %v9511_v3 }
 0x45b   :  { %8423 = vmatprep.subr.bf16.mxu0 %v10673_v37  ;;  %8429 = vmatprep.subr.bf16.mxu1 %v10673_v37 }
 0x45c   :  { %7631 = vmatprep.mubr.msk.f32.mxu0 %vm9135_vm2, %v10671_v59  ;;  %7642 = vmatprep.mubr.msk.f32.mxu1 %vm9135_vm2, %v10671_v59 }
 0x45e   :  { %8425 = vmatpush3.bf16.msra.mxu0 %v9457_v54  ;;  %8431 = vmatpush3.bf16.msra.mxu1 %v9524_v5 }
 0x45f   :  { %8432 = vmatprep.subr.bf16.mxu0 %v10673_v37  ;;  %8438 = vmatprep.subr.bf16.mxu1 %v10673_v37 }
 0x461   :  { %7632 = vmatmul.mubr.msk.f32.vlgmr.msra.gmra.mrb[32].mxu0 %vm69_vm0, %v9698_v61  ;;  %7643 = vmatmul.mubr.msk.f32.vlgmr.msra.gmra.mrb[28].mxu1 %vm69_vm0, %v9698_v61 }
 0x462   :  { %8434 = vmatpush3.bf16.msra.mxu0 %v9432_v45  ;;  %8440 = vmatpush3.bf16.msra.mxu1 %v9484_v60 }
 0x463   :  { %8435 = vmatprep.subr.bf16.mxu0 %v10673_v37  ;;  %8441 = vmatprep.subr.bf16.mxu1 %v10673_v37 }
 0x464   :  { %7653 = vmatprep.mubr.msk.f32.mxu0 %vm9135_vm2, %v10671_v59  ;;  %7664 = vmatprep.mubr.msk.f32.mxu1 %vm9135_vm2, %v10671_v59 }
 0x466   :  { %8437 = vmatpush3.bf16.msra.mxu0 %v9454_v53  ;;  %8443 = vmatpush3.bf16.msra.mxu1 %v9495_v63 }
 0x467   :  { %8444 = vmatprep.subr.bf16.mxu0 %v10673_v37  ;;  %8450 = vmatprep.subr.bf16.mxu1 %v10673_v37 }
 0x52c   :  { %v1563_v13 = vpop.f32.mrb[30].mxu0  ;;  %v1640_v25 = vpop.f32.mrb[26].mxu1 }
 0x52d   :  { %v1567_v42 = vadd.f32 %v1563_v13, %v9577_v48  ;;  %v1644_v52 = vadd.f32 %v1640_v25, %v9580_v26  ;;  %v7611_v57 = vpop.f32.mrb[31].mxu0  ;;  %v7622_v27 = vpop.f32.mrb[27].mxu1 }
 0x52f   :  { %v6815_v33 = vmul.f32 -1.442695, %v1567_v42  ;;  %v6817_v34 = vmul.f32 -1.442695, %v1644_v52 }
 0x531   :  { %8857 = vpow2.f32 %v6815_v33 }
 0x532   :  { %8859 = vpow2.f32 %v6817_v34 }
 0x534   :  { %v1717_v14 = vpop.f32.mrb[32].mxu0  ;;  %v1789_v16 = vpop.f32.mrb[28].mxu1 }
 0x535   :  { %v1721_v20 = vadd.f32 %v1717_v14, %v9620_v32  ;;  %v1793_v39 = vadd.f32 %v1789_v16, %v9622_v6  ;;  %v7633_v24 = vpop.f32.mrb[33].mxu0  ;;  %v7644_v40 = vpop.f32.mrb[29].mxu1 }
 0x536   :  { %v9737_v6 = vpop.permute.xlu1 %1808 }
 0x537   :  { %v6820_v44 = vmul.f32 -1.442695, %v1793_v39  ;;  %vm1810_vm12 = vcmp.eq.s32.totalorder %v9737_v6, 1 }
 0x539   :  { %8861 = vpow2.f32 %v6820_v44 }
 0x53a   :  { %8863 = vtanh.f32 %v1721_v20 }
 0x53b   :  { %v8858_v56 = vpop.eup %8857 }
 0x53c   :  { %v8860_v43 = vpop.eup %8859  ;;  %v1571_v48 = vadd.f32 1.0, %v8858_v56 }
 0x53d   :  { %v1648_v26 = vadd.f32 1.0, %v8860_v43 }
 0x53e   :  { %8865 = vrcp.f32 %v1571_v48 }
 0x53f   :  { %8867 = vrcp.f32 %v1648_v26 }
 0x543   :  { %v8862_v49 = vpop.eup %8861 }
 0x544   :  { %v8864_v46 = vpop.eup %8863  ;;  %v1797_v12 = vadd.f32 1.0, %v8862_v49 }
 0x546   :  { %8869 = vrcp.f32 %v1797_v12 }
 0x548   :  { %v8866_v51 = vpop.eup %8865 }
 0x549   :  { %v8868_v7 = vpop.eup %8867  ;;  %v1801_v8 = vmul.f32 %v8866_v51, %v8864_v46 }
 0x54a   :  { %v1800_v32 = vmul.f32 %v8868_v7, %v9693_v11 }
 0x54c   :  { %v1802_v17 = vadd.f32 %v1801_v8, %v1800_v32 }
 0x54e   :  { %8871 = vtanh.f32 %v1802_v17  ;;  %v9743_v18 = vsel %vm1810_vm12, %v1802_v17, %v9693_v11 }
 0x550   :  { %v8870_v13 = vpop.eup %8869 }
 0x558   :  { %v8872_v25 = vpop.eup %8871 }
 0x559   :  { %v1804_v42 = vmul.f32 %v8872_v25, %v8870_v13 }
 0x55b   :  { %v9748_v52 = vsel %vm1810_vm12, %v1804_v42, %v9698_v61 }
 0x55c   :  { %7654 = vmatmul.mubr.msk.f32.vlgmr.msra.gmra.mrb[34].mxu0 %vm69_vm0, %v9748_v52  ;;  %7665 = vmatmul.mubr.msk.f32.vlgmr.msra.gmra.mrb[30].mxu1 %vm69_vm0, %v9748_v52 }
 0x55d   :  { %8446 = vmatpush3.bf16.msra.mxu0 %v9440_v50  ;;  %8452 = vmatpush3.bf16.msra.mxu1 %v9511_v3 }
 0x55e   :  { %8447 = vmatprep.subr.bf16.mxu0 %v10673_v37  ;;  %8453 = vmatprep.subr.bf16.mxu1 %v10673_v37 }
 0x55f   :  { %7675 = vmatprep.mubr.msk.f32.mxu0 %vm9135_vm2, %v10671_v59  ;;  %7686 = vmatprep.mubr.msk.f32.mxu1 %vm9135_vm2, %v10671_v59 }
 0x561   :  { %8449 = vmatpush3.bf16.msra.mxu0 %v9457_v54  ;;  %8455 = vmatpush3.bf16.msra.mxu1 %v9524_v5 }
 0x562   :  { %8456 = vmatprep.subr.bf16.mxu0 %v10673_v37  ;;  %8462 = vmatprep.subr.bf16.mxu1 %v10673_v37 }
 0x564   :  { %7676 = vmatmul.mubr.msk.f32.vlgmr.msra.gmra.mrb[36].mxu0 %vm69_vm0, %v9748_v52  ;;  %7687 = vmatmul.mubr.msk.f32.vlgmr.msra.gmra.mrb[32].mxu1 %vm69_vm0, %v9748_v52 }
 0x565   :  { %8458 = vmatpush3.bf16.msra.mxu0 %v9432_v45  ;;  %8464 = vmatpush3.bf16.msra.mxu1 %v9484_v60 }
 0x566   :  { %8459 = vmatprep.subr.bf16.mxu0 %v10673_v37  ;;  %8465 = vmatprep.subr.bf16.mxu1 %v10673_v37 }
 0x567   :  { %7697 = vmatprep.mubr.msk.f32.mxu0 %vm9135_vm2, %v10671_v59  ;;  %7708 = vmatprep.mubr.msk.f32.mxu1 %vm9135_vm2, %v10671_v59 }
 0x569   :  { %8461 = vmatpush3.bf16.msra.mxu0 %v9454_v53  ;;  %8467 = vmatpush3.bf16.msra.mxu1 %v9495_v63 }
 0x56a   :  { %8468 = vmatprep.subr.bf16.mxu0 %v10673_v37  ;;  %8474 = vmatprep.subr.bf16.mxu1 %v10673_v37 }
 0x62f   :  { %v1882_v11 = vpop.f32.mrb[34].mxu0  ;;  %v1959_v57 = vpop.f32.mrb[30].mxu1 }
 0x630   :  { %v1886_v27 = vadd.f32 %v1882_v11, %v9571_v19  ;;  %v1963_v33 = vadd.f32 %v1959_v57, %v9574_v47  ;;  %v7655_v34 = vpop.f32.mrb[35].mxu0  ;;  %v7666_v14 = vpop.f32.mrb[31].mxu1 }
 0x632   :  { %v6822_v16 = vmul.f32 -1.442695, %v1886_v27  ;;  %v6824_v20 = vmul.f32 -1.442695, %v1963_v33 }
 0x634   :  { %8873 = vpow2.f32 %v6822_v16 }
 0x635   :  { %8875 = vpow2.f32 %v6824_v20 }
 0x637   :  { %v2036_v39 = vpop.f32.mrb[36].mxu0  ;;  %v2108_v24 = vpop.f32.mrb[32].mxu1 }
 0x638   :  { %v2040_v40 = vadd.f32 %v2036_v39, %v9616_v62  ;;  %v2112_v44 = vadd.f32 %v2108_v24, %v9618_v0  ;;  %v7677_v56 = vpop.f32.mrb[37].mxu0  ;;  %v7688_v43 = vpop.f32.mrb[33].mxu1 }
 0x639   :  { %v9787_v0 = vpop.permute.xlu1 %2127 }
 0x63a   :  { %v6827_v48 = vmul.f32 -1.442695, %v2112_v44  ;;  %vm2129_vm13 = vcmp.eq.s32.totalorder %v9787_v0, 1 }
 0x63c   :  { %8877 = vpow2.f32 %v6827_v48 }
 0x63d   :  { %8879 = vtanh.f32 %v2040_v40 }
 0x63e   :  { %v8874_v26 = vpop.eup %8873 }
 0x63f   :  { %v8876_v49 = vpop.eup %8875  ;;  %v1890_v19 = vadd.f32 1.0, %v8874_v26 }
 0x640   :  { %v1967_v47 = vadd.f32 1.0, %v8876_v49 }
 0x641   :  { %8881 = vrcp.f32 %v1890_v19 }
 0x642   :  { %8883 = vrcp.f32 %v1967_v47 }
 0x646   :  { %v8878_v46 = vpop.eup %8877 }
 0x647   :  { %v8880_v51 = vpop.eup %8879  ;;  %v2116_v32 = vadd.f32 1.0, %v8878_v46 }
 0x649   :  { %8885 = vrcp.f32 %v2116_v32 }
 0x64b   :  { %v8882_v7 = vpop.eup %8881 }
 0x64c   :  { %v8884_v8 = vpop.eup %8883  ;;  %v2120_v12 = vmul.f32 %v8882_v7, %v8880_v51 }
 0x64d   :  { %v2119_v62 = vmul.f32 %v8884_v8, %v9743_v18 }
 0x64f   :  { %v2121_v17 = vadd.f32 %v2120_v12, %v2119_v62 }
 0x651   :  { %8887 = vtanh.f32 %v2121_v17  ;;  %v9793_v13 = vsel %vm2129_vm13, %v2121_v17, %v9743_v18 }
 0x653   :  { %v8886_v25 = vpop.eup %8885 }
 0x65b   :  { %v8888_v42 = vpop.eup %8887 }
 0x65c   :  { %v2123_v11 = vmul.f32 %v8888_v42, %v8886_v25 }
 0x65e   :  { %v9798_v57 = vsel %vm2129_vm13, %v2123_v11, %v9748_v52 }
 0x65f   :  { %7698 = vmatmul.mubr.msk.f32.vlgmr.msra.gmra.mrb[38].mxu0 %vm69_vm0, %v9798_v57  ;;  %7709 = vmatmul.mubr.msk.f32.vlgmr.msra.gmra.mrb[34].mxu1 %vm69_vm0, %v9798_v57 }
 0x660   :  { %8470 = vmatpush3.bf16.msra.mxu0 %v9440_v50  ;;  %8476 = vmatpush3.bf16.msra.mxu1 %v9511_v3 }
 0x661   :  { %8471 = vmatprep.subr.bf16.mxu0 %v10673_v37  ;;  %8477 = vmatprep.subr.bf16.mxu1 %v10673_v37 }
 0x662   :  { %7719 = vmatprep.mubr.msk.f32.mxu0 %vm9135_vm2, %v10671_v59  ;;  %7730 = vmatprep.mubr.msk.f32.mxu1 %vm9135_vm2, %v10671_v59 }
 0x664   :  { %8473 = vmatpush3.bf16.msra.mxu0 %v9457_v54  ;;  %8479 = vmatpush3.bf16.msra.mxu1 %v9524_v5 }
 0x665   :  { %8480 = vmatprep.subr.bf16.mxu0 %v10673_v37  ;;  %8486 = vmatprep.subr.bf16.mxu1 %v10673_v37 }
 0x667   :  { %7720 = vmatmul.mubr.msk.f32.vlgmr.msra.gmra.mrb[40].mxu0 %vm69_vm0, %v9798_v57  ;;  %7731 = vmatmul.mubr.msk.f32.vlgmr.msra.gmra.mrb[36].mxu1 %vm69_vm0, %v9798_v57 }
 0x668   :  { %8482 = vmatpush3.bf16.msra.mxu0 %v9432_v45  ;;  %8488 = vmatpush3.bf16.msra.mxu1 %v9484_v60 }
 0x669   :  { %8483 = vmatprep.subr.bf16.mxu0 %v10673_v37  ;;  %8489 = vmatprep.subr.bf16.mxu1 %v10673_v37 }
 0x66a   :  { %7741 = vmatprep.mubr.msk.f32.mxu0 %vm9135_vm2, %v10671_v59  ;;  %7752 = vmatprep.mubr.msk.f32.mxu1 %vm9135_vm2, %v10671_v59 }
 0x66c   :  { %8485 = vmatpush3.bf16.msra.mxu0 %v9454_v53  ;;  %8491 = vmatpush3.bf16.msra.mxu1 %v9495_v63 }
 0x66d   :  { %8492 = vmatprep.subr.bf16.mxu0 %v10673_v37  ;;  %8498 = vmatprep.subr.bf16.mxu1 %v10673_v37 }
 0x732   :  { %v2201_v18 = vpop.f32.mrb[38].mxu0  ;;  %v2278_v27 = vpop.f32.mrb[34].mxu1 }
 0x733   :  { %v2205_v33 = vadd.f32 %v2201_v18, %v9589_v1  ;;  %v2282_v34 = vadd.f32 %v2278_v27, %v9592_v31  ;;  %v7699_v14 = vpop.f32.mrb[39].mxu0  ;;  %v7710_v16 = vpop.f32.mrb[35].mxu1 }
 0x735   :  { %v6829_v20 = vmul.f32 -1.442695, %v2205_v33  ;;  %v6831_v39 = vmul.f32 -1.442695, %v2282_v34 }
 0x737   :  { %8889 = vpow2.f32 %v6829_v20 }
 0x738   :  { %8891 = vpow2.f32 %v6831_v39 }
 0x73a   :  { %v2355_v24 = vpop.f32.mrb[40].mxu0  ;;  %v2427_v40 = vpop.f32.mrb[36].mxu1 }
 0x73b   :  { %v2359_v44 = vadd.f32 %v2355_v24, %v9628_v38  ;;  %v2431_v56 = vadd.f32 %v2427_v40, %v9630_v15  ;;  %v7721_v43 = vpop.f32.mrb[41].mxu0  ;;  %v7732_v48 = vpop.f32.mrb[37].mxu1 }
 0x73c   :  { %v9837_v15 = vpop.permute.xlu1 %2446 }
 0x73d   :  { %v6834_v26 = vmul.f32 -1.442695, %v2431_v56  ;;  %vm2448_vm14 = vcmp.eq.s32.totalorder %v9837_v15, 1 }
 0x73f   :  { %8893 = vpow2.f32 %v6834_v26 }
 0x740   :  { %8895 = vtanh.f32 %v2359_v44 }
 0x741   :  { %v8890_v49 = vpop.eup %8889 }
 0x742   :  { %v8892_v19 = vpop.eup %8891  ;;  %v2209_v1 = vadd.f32 1.0, %v8890_v49 }
 0x743   :  { %v2286_v31 = vadd.f32 1.0, %v8892_v19 }
 0x744   :  { %8897 = vrcp.f32 %v2209_v1 }
 0x745   :  { %8899 = vrcp.f32 %v2286_v31 }
 0x749   :  { %v8894_v47 = vpop.eup %8893 }
 0x74a   :  { %v8896_v46 = vpop.eup %8895  ;;  %v2435_v12 = vadd.f32 1.0, %v8894_v47 }
 0x74c   :  { %8901 = vrcp.f32 %v2435_v12 }
 0x74e   :  { %v8898_v51 = vpop.eup %8897 }
 0x74f   :  { %v8900_v7 = vpop.eup %8899  ;;  %v2439_v8 = vmul.f32 %v8898_v51, %v8896_v46 }
 0x750   :  { %v2438_v38 = vmul.f32 %v8900_v7, %v9793_v13 }
 0x752   :  { %v2440_v32 = vadd.f32 %v2439_v8, %v2438_v38 }
 0x754   :  { %8903 = vtanh.f32 %v2440_v32  ;;  %v9843_v62 = vsel %vm2448_vm14, %v2440_v32, %v9793_v13 }
 0x756   :  { %v8902_v17 = vpop.eup %8901 }
 0x75e   :  { %v8904_v25 = vpop.eup %8903 }
 0x75f   :  { %v2442_v42 = vmul.f32 %v8904_v25, %v8902_v17 }
 0x761   :  { %v9848_v11 = vsel %vm2448_vm14, %v2442_v42, %v9798_v57 }
 0x762   :  { %7742 = vmatmul.mubr.msk.f32.vlgmr.msra.gmra.mrb[42].mxu0 %vm69_vm0, %v9848_v11  ;;  %7753 = vmatmul.mubr.msk.f32.vlgmr.msra.gmra.mrb[38].mxu1 %vm69_vm0, %v9848_v11 }
 0x763   :  { %8494 = vmatpush3.bf16.msra.mxu0 %v9440_v50  ;;  %8500 = vmatpush3.bf16.msra.mxu1 %v9511_v3 }
 0x764   :  { %8495 = vmatprep.subr.bf16.mxu0 %v10673_v37  ;;  %8501 = vmatprep.subr.bf16.mxu1 %v10673_v37 }
 0x765   :  { %7763 = vmatprep.mubr.msk.f32.mxu0 %vm9135_vm2, %v10671_v59  ;;  %7774 = vmatprep.mubr.msk.f32.mxu1 %vm9135_vm2, %v10671_v59 }
 0x767   :  { %8497 = vmatpush3.bf16.msra.mxu0 %v9457_v54  ;;  %8503 = vmatpush3.bf16.msra.mxu1 %v9524_v5 }
 0x768   :  { %8504 = vmatprep.subr.bf16.mxu0 %v10673_v37  ;;  %8510 = vmatprep.subr.bf16.mxu1 %v10673_v37 }
 0x76a   :  { %7764 = vmatmul.mubr.msk.f32.vlgmr.msra.gmra.mrb[44].mxu0 %vm69_vm0, %v9848_v11  ;;  %7775 = vmatmul.mubr.msk.f32.vlgmr.msra.gmra.mrb[40].mxu1 %vm69_vm0, %v9848_v11 }
 0x76b   :  { %8506 = vmatpush3.bf16.msra.mxu0 %v9432_v45  ;;  %8512 = vmatpush3.bf16.msra.mxu1 %v9484_v60 }
 0x76c   :  { %8507 = vmatprep.subr.bf16.mxu0 %v10673_v37  ;;  %8513 = vmatprep.subr.bf16.mxu1 %v10673_v37 }
 0x76d   :  { %7785 = vmatprep.mubr.msk.f32.mxu0 %vm9135_vm2, %v10671_v59  ;;  %7796 = vmatprep.mubr.msk.f32.mxu1 %vm9135_vm2, %v10671_v59 }
 0x76f   :  { %8509 = vmatpush3.bf16.msra.mxu0 %v9454_v53  ;;  %8515 = vmatpush3.bf16.msra.mxu1 %v9495_v63 }
 0x770   :  { %8516 = vmatprep.subr.bf16.mxu0 %v10673_v37  ;;  %8522 = vmatprep.subr.bf16.mxu1 %v10673_v37 }
 0x835   :  { %v2520_v13 = vpop.f32.mrb[42].mxu0  ;;  %v2597_v18 = vpop.f32.mrb[38].mxu1 }
 0x836   :  { %v2524_v27 = vadd.f32 %v2520_v13, %v9583_v58  ;;  %v2601_v33 = vadd.f32 %v2597_v18, %v9586_v28  ;;  %v7743_v34 = vpop.f32.mrb[43].mxu0  ;;  %v7754_v14 = vpop.f32.mrb[39].mxu1 }
 0x838   :  { %v6836_v16 = vmul.f32 -1.442695, %v2524_v27  ;;  %v6838_v20 = vmul.f32 -1.442695, %v2601_v33 }
 0x83a   :  { %8905 = vpow2.f32 %v6836_v16 }
 0x83b   :  { %8907 = vpow2.f32 %v6838_v20 }
 0x83d   :  { %v2674_v39 = vpop.f32.mrb[44].mxu0  ;;  %v2746_v24 = vpop.f32.mrb[40].mxu1 }
 0x83e   :  { %v2678_v40 = vadd.f32 %v2674_v39, %v9624_v9  ;;  %v2750_v44 = vadd.f32 %v2746_v24, %v9626_v10  ;;  %v7765_v56 = vpop.f32.mrb[45].mxu0  ;;  %v7776_v43 = vpop.f32.mrb[41].mxu1 }
 0x83f   :  { %v9887_v10 = vpop.permute.xlu1 %2765 }
 0x840   :  { %v6841_v48 = vmul.f32 -1.442695, %v2750_v44  ;;  %vm2767_vm15 = vcmp.eq.s32.totalorder %v9887_v10, 1 }
 0x842   :  { %8909 = vpow2.f32 %v6841_v48 }
 0x843   :  { %8911 = vtanh.f32 %v2678_v40 }
 0x844   :  { %v8906_v26 = vpop.eup %8905 }
 0x845   :  { %v8908_v49 = vpop.eup %8907  ;;  %v2528_v58 = vadd.f32 1.0, %v8906_v26 }
 0x846   :  { %v2605_v28 = vadd.f32 1.0, %v8908_v49 }
 0x847   :  { %8913 = vrcp.f32 %v2528_v58 }
 0x848   :  { %8915 = vrcp.f32 %v2605_v28 }
 0x84c   :  { %v8910_v19 = vpop.eup %8909 }
 0x84d   :  { %v8912_v1 = vpop.eup %8911  ;;  %v2754_v51 = vadd.f32 1.0, %v8910_v19 }
 0x84f   :  { %8917 = vrcp.f32 %v2754_v51  ;;  %v6865_v51 = vld [vmem:[%s10660_s8 + $0x20] sm:$0xff] }
 0x851   :  { %v8914_v31 = vpop.eup %8913 }
 0x852   :  { %v8916_v47 = vpop.eup %8915  ;;  %v2758_v46 = vmul.f32 %v8914_v31, %v8912_v1  ;;  %v3407_v31 = vld [vmem:[%s10660_s8] sm:$0xff] }
 0x853   :  { %v2757_v9 = vmul.f32 %v8916_v47, %v9843_v62 }
 0x855   :  { %v2759_v7 = vadd.f32 %v2758_v46, %v2757_v9  ;;  %v3408_v46 = vld [vmem:[%s10660_s8 + $0x8] sm:$0xff] }
 0x856   :  { %v6866_v9 = vld [vmem:[%s10660_s8 + $0x28] sm:$0xff] }
 0x857   :  { %8919 = vtanh.f32 %v2759_v7  ;;  %v9893_v8 = vsel %vm2767_vm15, %v2759_v7, %v9843_v62  ;;  %v8552_v7 = vpack.c.bf16 %v3408_v46, %v3407_v31 }
 0x859   :  { %v8918_v12 = vpop.eup %8917 }
 0x861   :  { %v8920_v38 = vpop.eup %8919 }
 0x862   :  { %v2761_v32 = vmul.f32 %v8920_v38, %v8918_v12  ;;  %v3409_v12 = vld [vmem:[%s10660_s8 + $0x10] sm:$0xff]  ;;  %v6868_v38 = vld [vmem:[%s10660_s8 + $0x38] sm:$0xff] }
 0x864   :  { %v9898_v17 = vsel %vm2767_vm15, %v2761_v32, %v9848_v11 }
 0x865   :  { %7786 = vmatmul.mubr.msk.f32.vlgmr.msra.gmra.mrb[46].mxu0 %vm69_vm0, %v9898_v17  ;;  %7797 = vmatmul.mubr.msk.f32.vlgmr.msra.gmra.mrb[42].mxu1 %vm69_vm0, %v9898_v17 }
 0x866   :  { %8518 = vmatpush3.bf16.msra.mxu0 %v9440_v50  ;;  %8524 = vmatpush3.bf16.msra.mxu1 %v9511_v3 }
 0x867   :  { %8519 = vmatprep.subr.bf16.mxu0 %v10673_v37  ;;  %8525 = vmatprep.subr.bf16.mxu1 %v10673_v37 }
 0x868   :  { %7807 = vmatprep.mubr.msk.f32.mxu0 %vm9135_vm2, %v10671_v59  ;;  %7818 = vmatprep.mubr.msk.f32.mxu1 %vm9135_vm2, %v10671_v59 }
 0x86a   :  { %8521 = vmatpush3.bf16.msra.mxu0 %v9457_v54  ;;  %8527 = vmatpush3.bf16.msra.mxu1 %v9524_v5 }
 0x86b   :  { %8528 = vmatprep.subr.bf16.mxu0 %v10673_v37  ;;  %8534 = vmatprep.subr.bf16.mxu1 %v10673_v37 }
 0x86d   :  { %7808 = vmatmul.mubr.msk.f32.vlgmr.msra.gmra.mrb[48].mxu0 %vm69_vm0, %v9898_v17  ;;  %7819 = vmatmul.mubr.msk.f32.vlgmr.msra.gmra.mrb[44].mxu1 %vm69_vm0, %v9898_v17 }
 0x86e   :  { %8530 = vmatpush3.bf16.msra.mxu0 %v9432_v45  ;;  %8536 = vmatpush3.bf16.msra.mxu1 %v9484_v60 }
 0x86f   :  { %8531 = vmatprep.subr.bf16.mxu0 %v10673_v37  ;;  %8537 = vmatprep.subr.bf16.mxu1 %v10673_v37 }
 0x870   :  { %7829 = vmatprep.mubr.msk.f32.mxu0 %vm9135_vm2, %v10671_v59  ;;  %7840 = vmatprep.mubr.msk.f32.mxu1 %vm9135_vm2, %v10671_v59 }
 0x872   :  { %8533 = vmatpush3.bf16.msra.mxu0 %v9454_v53  ;;  %8539 = vmatpush3.bf16.msra.mxu1 %v9495_v63 }
 0x873   :  { %8540 = vmatprep.subr.bf16.mxu0 %v10673_v37  ;;  %8546 = vmatprep.subr.bf16.mxu1 %v10673_v37 }
 0x938   :  { %v2839_v45 = vpop.f32.mrb[46].mxu0  ;;  %v2916_v60 = vpop.f32.mrb[42].mxu1 }
 0x939   :  { %v2843_v62 = vadd.f32 %v2839_v45, %v9601_v23  ;;  %v2920_v25 = vadd.f32 %v2916_v60, %v9604_v41  ;;  %v7787_v42 = vpop.f32.mrb[47].mxu0  ;;  %v7798_v13 = vpop.f32.mrb[43].mxu1  ;;  %v6893_v60 = vld [vmem:[%s10660_s8 + $0x60] sm:$0xff] }
 0x93a   :  { %v6881_v42 = vld [vmem:[%s10660_s8 + $0x50] sm:$0xff]  ;;  %v6882_v13 = vld [vmem:[%s10660_s8 + $0x58] sm:$0xff] }
 0x93b   :  { %v6843_v18 = vmul.f32 -1.442695, %v2843_v62  ;;  %v6845_v27 = vmul.f32 -1.442695, %v2920_v25  ;;  %v6894_v25 = vld [vmem:[%s10660_s8 + $0x68] sm:$0xff] }
 0x93d   :  { %8921 = vpow2.f32 %v6843_v18  ;;  %v8576_v18 = vpack.c.bf16 %v6894_v25, %v6893_v60 }
 0x93e   :  { %8923 = vpow2.f32 %v6845_v27  ;;  %v8572_v27 = vpack.c.bf16 %v6882_v13, %v6881_v42 }
 0x940   :  { %v2993_v33 = vpop.f32.mrb[48].mxu0  ;;  %v3065_v53 = vpop.f32.mrb[44].mxu1 }
 0x941   :  { %v2997_v63 = vadd.f32 %v2993_v33, %v9636_v29  ;;  %v3069_v34 = vadd.f32 %v3065_v53, %v9638_v30  ;;  %v7809_v14 = vpop.f32.mrb[49].mxu0  ;;  %v7820_v16 = vpop.f32.mrb[45].mxu1  ;;  %v6895_v33 = vld [vmem:[%s10660_s8 + $0x70] sm:$0xff]  ;;  %v6896_v53 = vld [vmem:[%s10660_s8 + $0x78] sm:$0xff] }
 0x942   :  { %v9937_v30 = vpop.permute.xlu1 %3084 }
 0x943   :  { %v6848_v20 = vmul.f32 -1.442695, %v3069_v34  ;;  %10682 = vst [vmem:[#allocation8_spill] sm:$0xff] %v9937_v30  ;;  %vm3086_vm1 = vcmp.eq.s32.totalorder %v9937_v30, 1 }
 0x945   :  { %8925 = vpow2.f32 %v6848_v20 }
 0x946   :  { %8927 = vtanh.f32 %v2997_v63  ;;  %v8580_v63 = vpack.c.bf16 %v6896_v53, %v6895_v33  ;;  %v10075_v42 = vpop.permute.xlu1 %3403  ;;  %v3881_v33 = vld [vmem:[%s10661_s9 + $0x8] sm:$0xff] }
 0x947   :  { %v8922_v39 = vpop.eup %8921  ;;  %10683 = vst [vmem:[#allocation9_spill] sm:$0xff] %v10075_v42  ;;  %vm3405_vm3 = vcmp.eq.s32.totalorder %v10075_v42, 1  ;;  %v6908_v53 = vld [vmem:[%s10661_s9 + $0x28] sm:$0xff] }
 0x948   :  { %v8924_v24 = vpop.eup %8923  ;;  %v2847_v23 = vadd.f32 1.0, %v8922_v39 }
 0x949   :  { %v2924_v41 = vadd.f32 1.0, %v8924_v24 }
 0x94a   :  { %8929 = vrcp.f32 %v2847_v23 }
 0x94b   :  { %8931 = vrcp.f32 %v2924_v41 }
 0x94f   :  { %v8926_v40 = vpop.eup %8925 }
 0x950   :  { %v8928_v44 = vpop.eup %8927  ;;  %v3073_v26 = vadd.f32 1.0, %v8926_v40 }
 0x952   :  { %8933 = vrcp.f32 %v3073_v26 }
 0x954   :  { %v8930_v56 = vpop.eup %8929 }
 0x955   :  { %v8932_v43 = vpop.eup %8931  ;;  %v3077_v48 = vmul.f32 %v8930_v56, %v8928_v44 }
 0x956   :  { %v3076_v29 = vmul.f32 %v8932_v43, %v9893_v8 }
 0x958   :  { %v3078_v49 = vadd.f32 %v3077_v48, %v3076_v29 }
 0x95a   :  { %8935 = vtanh.f32 %v3078_v49  ;;  %v9943_v58 = vsel %vm3086_vm1, %v3078_v49, %v9893_v8  ;;  %v8560_v8 = vpack.c.bf16 %v6866_v9, %v6865_v51 }
 0x95c   :  { %v8934_v28 = vpop.eup %8933 }
 0x964   :  { %v8936_v19 = vpop.eup %8935 }
 0x965   :  { %v3080_v1 = vmul.f32 %v8936_v19, %v8934_v28 }
 0x967   :  { %v9951_v47 = vsel %vm3086_vm1, %v3080_v1, %v9898_v17 }
 0x968   :  { %7830 = vmatmul.mubr.msk.f32.vlgmr.msra.gmra.mrb[50].mxu0 %vm69_vm0, %v9951_v47  ;;  %7841 = vmatmul.mubr.msk.f32.vlgmr.msra.gmra.mrb[46].mxu1 %vm69_vm0, %v9951_v47 }
 0x969   :  { %8542 = vmatpush3.bf16.msra.mxu0 %v9440_v50  ;;  %8548 = vmatpush3.bf16.msra.mxu1 %v9511_v3  ;;  %v3410_v50 = vld [vmem:[%s10660_s8 + $0x18] sm:$0xff]  ;;  %v6867_v3 = vld [vmem:[%s10660_s8 + $0x30] sm:$0xff] }
 0x96a   :  { %8543 = vmatprep.subr.bf16.mxu0 %v10673_v37  ;;  %8549 = vmatprep.subr.bf16.mxu1 %v10673_v37  ;;  %v8556_v32 = vpack.c.bf16 %v3410_v50, %v3409_v12  ;;  %v8564_v45 = vpack.c.bf16 %v6868_v38, %v6867_v3 }
 0x96b   :  { %7851 = vmatprep.mubr.msk.f32.mxu0 %vm9135_vm2, %v10671_v59  ;;  %7862 = vmatprep.mubr.msk.f32.mxu1 %vm9135_vm2, %v10671_v59 }
 0x96d   :  { %8545 = vmatpush3.bf16.msra.mxu0 %v9457_v54  ;;  %8551 = vmatpush3.bf16.msra.mxu1 %v9524_v5  ;;  %v6879_v54 = vld [vmem:[%s10660_s8 + $0x40] sm:$0xff]  ;;  %v6880_v5 = vld [vmem:[%s10660_s8 + $0x48] sm:$0xff] }
 0x96e   :  { %8553 = vmatprep.subr.bf16.mxu0 %v8552_v7  ;;  %8561 = vmatprep.subr.bf16.mxu1 %v8560_v8  ;;  %v8568_v62 = vpack.c.bf16 %v6880_v5, %v6879_v54 }
 0x970   :  { %7852 = vmatmul.mubr.msk.f32.vlgmr.msra.gmra.mrb[52].mxu0 %vm69_vm0, %v9951_v47  ;;  %7863 = vmatmul.mubr.msk.f32.vlgmr.msra.gmra.mrb[48].mxu1 %vm69_vm0, %v9951_v47 }
 0x971   :  { %8555 = vmatpush3.bf16.msra.mxu0 %v8552_v7  ;;  %7873 = vmatprep.mubr.msk.f32.mxu0 %vm69_vm0, %v9648_v4 }
 0x972   :  { %8563 = vmatpush3.bf16.msra.mxu1 %v8560_v8  ;;  %7893 = vmatprep.mubr.msk.f32.mxu1 %vm69_vm0, %v9648_v4 }
 0x973   :  { %8557 = vmatprep.subr.bf16.mxu0 %v8556_v32  ;;  %8565 = vmatprep.subr.bf16.mxu1 %v8564_v45 }
 0x975   :  { %8559 = vmatpush3.bf16.msra.mxu0 %v8556_v32 }
 0x976   :  { %8567 = vmatpush3.bf16.msra.mxu1 %v8564_v45  ;;  %8569 = vmatprep.subr.bf16.mxu0 %v8568_v62 }
 0x977   :  { %8577 = vmatprep.subr.bf16.mxu1 %v8576_v18 }
 0x978   :  { %7874 = vmatmul.mubr.msk.f32.vlgmr.msra.gmra.mrb[54].mxu0 %vm69_vm0, %v9698_v61 }
 0x979   :  { %7894 = vmatmul.mubr.msk.f32.vlgmr.msra.gmra.mrb[50].mxu1 %vm69_vm0, %v9698_v61  ;;  %7876 = vmatprep.mubr.msk.f32.mxu0 %vm69_vm0, %v9748_v52 }
 0x97a   :  { %7896 = vmatprep.mubr.msk.f32.mxu1 %vm69_vm0, %v9748_v52  ;;  %8571 = vmatpush3.bf16.msra.mxu0 %v8568_v62 }
 0x97b   :  { %8579 = vmatpush3.bf16.msra.mxu1 %v8576_v18  ;;  %8573 = vmatprep.subr.bf16.mxu0 %v8572_v27 }
 0x97c   :  { %7877 = vmatmul.mubr.msk.f32.gmra.mrb[56].mxu0 %vm69_vm0, %v9798_v57  ;;  %8581 = vmatprep.subr.bf16.mxu1 %v8580_v63 }
 0x97d   :  { %7897 = vmatmul.mubr.msk.f32.gmra.mrb[52].mxu1 %vm69_vm0, %v9798_v57  ;;  %7879 = vmatprep.mubr.msk.f32.mxu0 %vm69_vm0, %v9848_v11 }
 0x97e   :  { %7899 = vmatprep.mubr.msk.f32.mxu1 %vm69_vm0, %v9848_v11  ;;  %8575 = vmatpush3.bf16.msra.mxu0 %v8572_v27  ;;  %v3880_v27 = vld [vmem:[%s10661_s9] sm:$0xff] }
 0x97f   :  { %8583 = vmatpush3.bf16.msra.mxu1 %v8580_v63  ;;  %8584 = vmatprep.subr.bf16.mxu0 %v10673_v37 }
 0x980   :  { %7880 = vmatmul.mubr.msk.f32.gmra.mrb[58].mxu0 %vm69_vm0, %v9898_v17  ;;  %8590 = vmatprep.subr.bf16.mxu1 %v10673_v37 }
 0x981   :  { %7900 = vmatmul.mubr.msk.f32.gmra.mrb[54].mxu1 %vm69_vm0, %v9898_v17  ;;  %7882 = vmatprep.mubr.msk.f32.mxu0 %vm69_vm0, %v9951_v47 }
 0x982   :  { %7902 = vmatprep.mubr.msk.f32.mxu1 %vm69_vm0, %v9951_v47 }
 0xa3b   :  { %v3158_v34 = vpop.f32.mrb[50].mxu0  ;;  %v3235_v14 = vpop.f32.mrb[46].mxu1 }
 0xa3c   :  { %v3162_v16 = vadd.f32 %v3158_v34, %v9595_v35  ;;  %v3239_v20 = vadd.f32 %v3235_v14, %v9598_v36  ;;  %v7831_v39 = vpop.f32.mrb[51].mxu0  ;;  %v7842_v24 = vpop.f32.mrb[47].mxu1  ;;  %v10099_v34 = vpack.c.bf16 %v3881_v33, %v3880_v27 }
 0xa3d   :  { %v6909_v39 = vld [vmem:[%s10661_s9 + $0x30] sm:$0xff] }
 0xa3e   :  { %v6850_v23 = vmul.f32 -1.442695, %v3162_v16  ;;  %v6852_v41 = vmul.f32 -1.442695, %v3239_v20  ;;  %v3882_v16 = vld [vmem:[%s10661_s9 + $0x10] sm:$0xff]  ;;  %v3883_v20 = vld [vmem:[%s10661_s9 + $0x18] sm:$0xff] }
 0xa3f   :  { %v10125_v24 = vpack.c.bf16 %v3883_v20, %v3882_v16 }
 0xa40   :  { %8937 = vpow2.f32 %v6850_v23 }
 0xa41   :  { %8939 = vpow2.f32 %v6852_v41  ;;  %v6913_v41 = vld [vmem:[%s10661_s9 + $0x50] sm:$0xff] }
 0xa43   :  { %v3312_v40 = vpop.f32.mrb[52].mxu0  ;;  %v3384_v44 = vpop.f32.mrb[48].mxu1 }
 0xa44   :  { %v3316_v56 = vadd.f32 %v3312_v40, %v9632_v21  ;;  %v3388_v43 = vadd.f32 %v3384_v44, %v9634_v22  ;;  %v7853_v48 = vpop.f32.mrb[53].mxu0  ;;  %v7864_v26 = vpop.f32.mrb[49].mxu1  ;;  %v6914_v40 = vld [vmem:[%s10661_s9 + $0x58] sm:$0xff]  ;;  %v6917_v44 = vld [vmem:[%s10661_s9 + $0x70] sm:$0xff] }
 0xa46   :  { %v6855_v29 = vmul.f32 -1.442695, %v3388_v43  ;;  %v10189_v43 = vpack.c.bf16 %v6914_v40, %v6913_v41 }
 0xa48   :  { %8941 = vpow2.f32 %v6855_v29 }
 0xa49   :  { %8943 = vtanh.f32 %v3316_v56  ;;  %v6918_v56 = vld [vmem:[%s10661_s9 + $0x78] sm:$0xff] }
 0xa4a   :  { %v8938_v49 = vpop.eup %8937  ;;  %v10191_v48 = vpack.c.bf16 %v6918_v56, %v6917_v44 }
 0xa4b   :  { %v8940_v28 = vpop.eup %8939  ;;  %v3166_v35 = vadd.f32 1.0, %v8938_v49  ;;  %v10050_v36 = vpop.f32.mrb[54].mxu0 }
 0xa4c   :  { %v3243_v19 = vadd.f32 1.0, %v8940_v28  ;;  %v10052_v1 = vpop.f32.mrb[50].mxu1  ;;  %v10054_v31 = vpop.f32.mrb[55].mxu0 }
 0xa4d   :  { %8945 = vrcp.f32 %v3166_v35  ;;  %v10056_v46 = vpop.f32.mrb[51].mxu1  ;;  %v6884_v35 = vld [vmem:[%s10662_s10 + $0x2] ss:$0 sm:$0xff] }
 0xa4e   :  { %8947 = vrcp.f32 %v3243_v19  ;;  %v6898_v19 = vld [vmem:[%s10662_s10 + $0x3] ss:$0 sm:$0xff] }
 0xa4f   :  { %v10058_v21 = vpop.f32.mrb[56].mxu0 }
 0xa50   :  { %v10060_v22 = vpop.f32.mrb[52].mxu1  ;;  %v10062_v51 = vpop.f32.mrb[57].mxu0 }
 0xa51   :  { %v10064_v9 = vpop.f32.mrb[53].mxu1 }
 0xa52   :  { %v8942_v50 = vpop.eup %8941 }
 0xa53   :  { %v10066_v7 = vpop.f32.mrb[58].mxu0  ;;  %v8944_v38 = vpop.eup %8943  ;;  %v3392_v5 = vadd.f32 1.0, %v8942_v50 }
 0xa54   :  { %v10068_v8 = vpop.f32.mrb[54].mxu1  ;;  %v10070_v12 = vpop.f32.mrb[59].mxu0 }
 0xa55   :  { %v10072_v3 = vpop.f32.mrb[55].mxu1  ;;  %8949 = vrcp.f32 %v3392_v5 }
 0xa57   :  { %v8946_v32 = vpop.eup %8945 }
 0xa58   :  { %v8948_v45 = vpop.eup %8947  ;;  %v3396_v54 = vmul.f32 %v8946_v32, %v8944_v38 }
 0xa59   :  { %v3395_v60 = vmul.f32 %v8948_v45, %v9943_v58  ;;  %v6907_v58 = vld [vmem:[%s10661_s9 + $0x20] sm:$0xff] }
 0xa5a   :  { %v10101_v14 = vpack.c.bf16 %v6908_v53, %v6907_v58 }
 0xa5b   :  { %v3397_v62 = vadd.f32 %v3396_v54, %v3395_v60 }
 0xa5d   :  { %8951 = vtanh.f32 %v3397_v62 }
 0xa5f   :  { %v8950_v25 = vpop.eup %8949 }
 0xa67   :  { %v8952_v13 = vpop.eup %8951 }
 0xa68   :  { %v3399_v18 = vmul.f32 %v8952_v13, %v8950_v25 }
 0xa6a   :  { %v3406_v63 = vsel %vm3405_vm3, %v3399_v18, %v9951_v47 }
 0xa6b   :  { %7883 = vmatmul.mubr.msk.f32.gmra.mrb[60].mxu0 %vm69_vm0, %v3406_v63  ;;  %7903 = vmatmul.mubr.msk.f32.gmra.mrb[56].mxu1 %vm69_vm0, %v3406_v63 }
 0xa6c   :  { %7913 = vmatprep.mubr.msk.f32.mxu0 %vm69_vm0, %v9648_v4  ;;  %7933 = vmatprep.mubr.msk.f32.mxu1 %vm69_vm0, %v9648_v4  ;;  %v6910_v4 = vld [vmem:[%s10661_s9 + $0x38] sm:$0xff] }
 0xa6d   :  { %v10127_v23 = vpack.c.bf16 %v6910_v4, %v6909_v39 }
 0xa6f   :  { %7914 = vmatmul.mubr.msk.f32.vlgmr.msra.gmra.mrb[62].mxu0 %vm69_vm0, %v9698_v61  ;;  %7934 = vmatmul.mubr.msk.f32.vlgmr.msra.gmra.mrb[58].mxu1 %vm69_vm0, %v9698_v61  ;;  %v6911_v61 = vld [vmem:[%s10661_s9 + $0x40] sm:$0xff] }
 0xa70   :  { %8586 = vmatpush3.bf16.msra.mxu0 %v10099_v34  ;;  %8592 = vmatpush3.bf16.msra.mxu1 %v10101_v14 }
 0xa71   :  { %7916 = vmatprep.mubr.msk.f32.mxu0 %vm69_vm0, %v9748_v52  ;;  %7936 = vmatprep.mubr.msk.f32.mxu1 %vm69_vm0, %v9748_v52  ;;  %v6912_v52 = vld [vmem:[%s10661_s9 + $0x48] sm:$0xff] }
 0xa72   :  { %8587 = vmatprep.subr.bf16.mxu0 %v10673_v37  ;;  %8593 = vmatprep.subr.bf16.mxu1 %v10673_v37 }
 0xa73   :  { %7917 = vmatmul.mubr.msk.f32.gmra.mrb[64].mxu0 %vm69_vm0, %v9798_v57  ;;  %7937 = vmatmul.mubr.msk.f32.gmra.mrb[60].mxu1 %vm69_vm0, %v9798_v57  ;;  %v6915_v57 = vld [vmem:[%s10661_s9 + $0x60] sm:$0xff] }
 0xa74   :  { %7919 = vmatprep.mubr.msk.f32.mxu0 %vm69_vm0, %v9848_v11  ;;  %7939 = vmatprep.mubr.msk.f32.mxu1 %vm69_vm0, %v9848_v11  ;;  %v6916_v11 = vld [vmem:[%s10661_s9 + $0x68] sm:$0xff] }
 0xa75   :  { %8589 = vmatpush3.bf16.msra.mxu0 %v10125_v24  ;;  %8595 = vmatpush3.bf16.msra.mxu1 %v10127_v23 }
 0xa76   :  { %8596 = vmatprep.subr.bf16.mxu0 %v10673_v37  ;;  %8602 = vmatprep.subr.bf16.mxu1 %v10673_v37 }
 0xa77   :  { %7920 = vmatmul.mubr.msk.f32.gmra.mrb[66].mxu0 %vm69_vm0, %v9898_v17  ;;  %7940 = vmatmul.mubr.msk.f32.gmra.mrb[62].mxu1 %vm69_vm0, %v9898_v17  ;;  %v10169_v17 = vpack.c.bf16 %v6912_v52, %v6911_v61 }
 0xa78   :  { %7922 = vmatprep.mubr.msk.f32.mxu0 %vm69_vm0, %v9951_v47  ;;  %7942 = vmatprep.mubr.msk.f32.mxu1 %vm69_vm0, %v9951_v47  ;;  %v10171_v47 = vpack.c.bf16 %v6916_v11, %v6915_v57  ;;  %v10254_v57 = vld [vmem:[%s10662_s10] ss:$0 sm:$0xff]  ;;  %v10259_v11 = vld [vmem:[%s10662_s10 + $0x1] ss:$0 sm:$0xff] }
 0xa79   :  { %v3498_v55 = vadd.f32 %v10254_v57, %v10062_v51  ;;  %v3616_v2 = vadd.f32 %v10259_v11, %v10064_v9  ;;  %v3503_v6 = vadd.f32 %v10058_v21, %v10254_v57  ;;  %v3508_v0 = vadd.f32 %v10254_v57, %v10070_v12 }
 0xa7a   :  { %v3513_v15 = vadd.f32 %v10066_v7, %v10254_v57 }
 0xa7b   :  { %7923 = vmatmul.mubr.msk.f32.gmra.mrb[68].mxu0 %vm69_vm0, %v3406_v63  ;;  %7943 = vmatmul.mubr.msk.f32.gmra.mrb[64].mxu1 %vm69_vm0, %v3406_v63 }
 0xa7c   :  { %7953 = vmatprep.mubr.msk.f32.mxu0 %vm9135_vm2, %v10671_v59  ;;  %7964 = vmatprep.mubr.msk.f32.mxu1 %vm9135_vm2, %v10671_v59 }
 0xa7f   :  { %7954 = vmatmul.mubr.f32.vlgmr.msra.gmra.mrb[70].mxu0 %v10671_v59  ;;  %7965 = vmatmul.mubr.f32.vlgmr.msra.gmra.mrb[66].mxu1 %v10671_v59 }
 0xa80   :  { %8598 = vmatpush3.bf16.msra.mxu0 %v10169_v17  ;;  %8604 = vmatpush3.bf16.msra.mxu1 %v10171_v47 }
 0xa81   :  { %8599 = vmatprep.subr.bf16.mxu0 %v10673_v37  ;;  %8605 = vmatprep.subr.bf16.mxu1 %v10673_v37 }
 0xa82   :  { %7975 = vmatprep.mubr.msk.f32.mxu0 %vm9135_vm2, %v10671_v59  ;;  %7986 = vmatprep.mubr.msk.f32.mxu1 %vm9135_vm2, %v10671_v59 }
 0xa84   :  { %8601 = vmatpush3.bf16.msra.mxu0 %v10189_v43  ;;  %8607 = vmatpush3.bf16.msra.mxu1 %v10191_v48 }
 0xa85   :  { %8608 = vmatprep.subr.bf16.mxu0 %v10673_v37  ;;  %8614 = vmatprep.subr.bf16.mxu1 %v10673_v37 }
 0xa87   :  { %7976 = vmatmul.mubr.f32.vlgmr.msra.gmra.mrb[72].mxu0 %v10671_v59  ;;  %7987 = vmatmul.mubr.f32.vlgmr.msra.gmra.mrb[68].mxu1 %v10671_v59 }
 0xa88   :  { %8610 = vmatpush3.bf16.msra.mxu0 %v10099_v34  ;;  %8616 = vmatpush3.bf16.msra.mxu1 %v10101_v14 }
 0xa89   :  { %8611 = vmatprep.subr.bf16.mxu0 %v10673_v37  ;;  %8617 = vmatprep.subr.bf16.mxu1 %v10673_v37 }
 0xa8a   :  { %7997 = vmatprep.mubr.msk.f32.mxu0 %vm9135_vm2, %v10671_v59  ;;  %8008 = vmatprep.mubr.msk.f32.mxu1 %vm9135_vm2, %v10671_v59 }
 0xa8c   :  { %8613 = vmatpush3.bf16.msra.mxu0 %v10125_v24  ;;  %8619 = vmatpush3.bf16.msra.mxu1 %v10127_v23 }
 0xa8d   :  { %8620 = vmatprep.subr.bf16.mxu0 %v10673_v37  ;;  %8626 = vmatprep.subr.bf16.mxu1 %v10673_v37 }
 0xb3e   :  { %v10217_v26 = vpop.f32.mrb[60].mxu0  ;;  %v10219_v29 = vpop.f32.mrb[56].mxu1 }
 0xb3f   :  { %10684 = vst [vmem:[#allocation10_spill] sm:$0xff] %v10217_v26  ;;  %10685 = vst [vmem:[#allocation11_spill] sm:$0xff] %v10219_v29  ;;  %v10221_v49 = vpop.f32.mrb[61].mxu0  ;;  %v10223_v28 = vpop.f32.mrb[57].mxu1 }
 0xb40   :  { %v3518_v10 = vadd.f32 %v10254_v57, %v10221_v49 }
 0xb42   :  { %v7915_v50 = vpop.f32.mrb[62].mxu0  ;;  %v7935_v38 = vpop.f32.mrb[58].mxu1 }
 0xb43   :  { %v10231_v32 = vadd.f32 %v7915_v50, %v6884_v35  ;;  %v10233_v45 = vadd.f32 %v7935_v38, %v6898_v19  ;;  %v3723_v54 = vpop.f32.mrb[63].mxu0  ;;  %v3841_v5 = vpop.f32.mrb[59].mxu1 }
 0xb44   :  { %v3842_v42 = vadd.f32 %v6898_v19, %v3841_v5 }
 0xb46   :  { %v7918_v60 = vpop.f32.mrb[64].mxu0  ;;  %v7938_v62 = vpop.f32.mrb[60].mxu1 }
 0xb47   :  { %v10235_v25 = vadd.f32 %v7918_v60, %v6884_v35  ;;  %v10237_v13 = vadd.f32 %v7938_v62, %v6898_v19  ;;  %v3733_v18 = vpop.f32.mrb[65].mxu0  ;;  %v3851_v27 = vpop.f32.mrb[61].mxu1 }
 0xb48   :  { %v10239_v33 = vadd.f32 %v6884_v35, %v3733_v18  ;;  %v10241_v58 = vadd.f32 %v6898_v19, %v3851_v27  ;;  %v3488_v18 = vadd.f32 %v10254_v57, %v10054_v31  ;;  %v3606_v27 = vadd.f32 %v10259_v11, %v10056_v46 }
 0xb4a   :  { %v7921_v53 = vpop.f32.mrb[66].mxu0  ;;  %v7941_v63 = vpop.f32.mrb[62].mxu1 }
 0xb4b   :  { %v10243_v16 = vadd.f32 %v7921_v53, %v6884_v35  ;;  %v10245_v20 = vadd.f32 %v7941_v63, %v6898_v19  ;;  %v3743_v39 = vpop.f32.mrb[67].mxu0  ;;  %v3861_v4 = vpop.f32.mrb[63].mxu1 }
 0xb4c   :  { %v10247_v61 = vadd.f32 %v6884_v35, %v3743_v39  ;;  %v10249_v52 = vadd.f32 %v6898_v19, %v3861_v4 }
 0xb4e   :  { %v7924_v41 = vpop.f32.mrb[68].mxu0  ;;  %v7944_v40 = vpop.f32.mrb[64].mxu1 }
 0xb4f   :  { %v10261_v44 = vadd.f32 %v7924_v41, %v6884_v35  ;;  %v10263_v56 = vadd.f32 %v7944_v40, %v6898_v19  ;;  %v3753_v50 = vpop.f32.mrb[69].mxu0  ;;  %v3871_v38 = vpop.f32.mrb[65].mxu1 }
 0xb50   :  { %v10265_v60 = vadd.f32 %v6884_v35, %v3753_v50  ;;  %v10267_v62 = vadd.f32 %v6898_v19, %v3871_v38  ;;  %v3724_v50 = vadd.f32 %v6884_v35, %v3723_v54 }
 0xb51   :  { %10686 = vst [vmem:[#allocation12_spill] sm:$0xff] %v10261_v44  ;;  %10687 = vst [vmem:[#allocation13_spill] sm:$0xff] %v10263_v56 }
 0xb52   :  { %10688 = vst [vmem:[#allocation14_spill] sm:$0xff] %v10265_v60  ;;  %10689 = vst [vmem:[#allocation15_spill] sm:$0xff] %v10267_v62  ;;  %v3965_v53 = vpop.f32.mrb[70].mxu0  ;;  %v4042_v63 = vpop.f32.mrb[66].mxu1 }
 0xb53   :  { %v3969_v39 = vadd.f32 %v3965_v53, %v3488_v18  ;;  %v4046_v4 = vadd.f32 %v4042_v63, %v3606_v27  ;;  %v7955_v41 = vpop.f32.mrb[71].mxu0  ;;  %v7966_v59 = vpop.f32.mrb[67].mxu1 }
 0xb55   :  { %v6919_v40 = vmul.f32 -1.442695, %v3969_v39  ;;  %v6920_v37 = vmul.f32 -1.442695, %v4046_v4 }
 0xb57   :  { %8953 = vpow2.f32 %v6919_v40 }
 0xb58   :  { %8955 = vpow2.f32 %v6920_v37 }
 0xb5a   :  { %v4119_v38 = vpop.f32.mrb[72].mxu0  ;;  %v4191_v56 = vpop.f32.mrb[68].mxu1 }
 0xb5b   :  { %v4123_v44 = vadd.f32 %v4119_v38, %v3724_v50  ;;  %v4195_v29 = vadd.f32 %v4191_v56, %v3842_v42  ;;  %v7977_v31 = vpop.f32.mrb[73].mxu0  ;;  %v7988_v26 = vpop.f32.mrb[69].mxu1  ;;  %v10691_v56 = vmov 0.0  }
 0xb5d   :  { %v6921_v30 = vmul.f32 -1.442695, %v4195_v29 }
 0xb5f   :  { %8957 = vpow2.f32 %v6921_v30 }
 0xb60   :  { %8959 = vtanh.f32 %v4123_v44  ;;  %v10690_v44 = vmov 0.0|0.0  }
 0xb61   :  { %v8954_v46 = vpop.eup %8953 }
 0xb62   :  { %v8956_v62 = vpop.eup %8955  ;;  %v3973_v60 = vadd.f32 1.0, %v8954_v46 }
 0xb63   :  { %v4050_v18 = vadd.f32 1.0, %v8956_v62  ;;  %v3611_v62 = vadd.f32 %v10052_v1, %v10259_v11 }
 0xb64   :  { %8961 = vrcp.f32 %v3973_v60  ;;  %v3493_v60 = vadd.f32 %v10050_v36, %v10254_v57 }
 0xb65   :  { %8963 = vrcp.f32 %v4050_v18 }
 0xb69   :  { %v8958_v59 = vpop.eup %8957 }
 0xb6a   :  { %v8960_v27 = vpop.eup %8959  ;;  %v4199_v54 = vadd.f32 1.0, %v8958_v59 }
 0xb6c   :  { %8965 = vrcp.f32 %v4199_v54 }
 0xb6e   :  { %v8962_v37 = vpop.eup %8961 }
 0xb6f   :  { %v8964_v35 = vpop.eup %8963  ;;  %v4203_v19 = vmul.f32 %v8962_v37, %v8960_v27 }
 0xb70   :  { %v4202_v5 = vmul.f32 0.0, %v8964_v35 }
 0xb72   :  { %v4204_v53 = vadd.f32 %v4203_v19, %v4202_v5 }
 0xb74   :  { %8967 = vtanh.f32 %v4204_v53 }
 0xb76   :  { %v8966_v42 = vpop.eup %8965 }
 0xb7e   :  { %v8968_v26 = vpop.eup %8967 }
 0xb7f   :  { %v4206_v29 = vmul.f32 %v8968_v26, %v8966_v42 }
 0xb81   :  { %v10275_v30 = vsel %vm1172_vm10, %v4206_v29, 0.0 }
 0xb82   :  { %7998 = vmatmul.mubr.msk.f32.vlgmr.msra.gmra.mrb[74].mxu0 %vm69_vm0, %v10275_v30  ;;  %8009 = vmatmul.mubr.msk.f32.vlgmr.msra.gmra.mrb[70].mxu1 %vm69_vm0, %v10275_v30 }
 0xb83   :  { %8622 = vmatpush3.bf16.msra.mxu0 %v10169_v17  ;;  %8628 = vmatpush3.bf16.msra.mxu1 %v10171_v47 }
 0xb84   :  { %8623 = vmatprep.subr.bf16.mxu0 %v10690_v44  ;;  %8629 = vmatprep.subr.bf16.mxu1 %v10690_v44 }
 0xb85   :  { %8019 = vmatprep.mubr.msk.f32.mxu0 %vm9135_vm2, %v10691_v56  ;;  %8030 = vmatprep.mubr.msk.f32.mxu1 %vm9135_vm2, %v10691_v56 }
 0xb87   :  { %8625 = vmatpush3.bf16.msra.mxu0 %v10189_v43  ;;  %8631 = vmatpush3.bf16.msra.mxu1 %v10191_v48 }
 0xb88   :  { %8632 = vmatprep.subr.bf16.mxu0 %v10690_v44  ;;  %8638 = vmatprep.subr.bf16.mxu1 %v10690_v44 }
 0xb8a   :  { %8020 = vmatmul.mubr.msk.f32.vlgmr.msra.gmra.mrb[76].mxu0 %vm69_vm0, %v10275_v30  ;;  %8031 = vmatmul.mubr.msk.f32.vlgmr.msra.gmra.mrb[72].mxu1 %vm69_vm0, %v10275_v30 }
 0xb8b   :  { %8634 = vmatpush3.bf16.msra.mxu0 %v10099_v34  ;;  %8640 = vmatpush3.bf16.msra.mxu1 %v10101_v14 }
 0xb8c   :  { %8635 = vmatprep.subr.bf16.mxu0 %v10690_v44  ;;  %8641 = vmatprep.subr.bf16.mxu1 %v10690_v44 }
 0xb8d   :  { %8041 = vmatprep.mubr.msk.f32.mxu0 %vm9135_vm2, %v10691_v56  ;;  %8052 = vmatprep.mubr.msk.f32.mxu1 %vm9135_vm2, %v10691_v56 }
 0xb8f   :  { %8637 = vmatpush3.bf16.msra.mxu0 %v10125_v24  ;;  %8643 = vmatpush3.bf16.msra.mxu1 %v10127_v23 }
 0xb90   :  { %8644 = vmatprep.subr.bf16.mxu0 %v10690_v44  ;;  %8650 = vmatprep.subr.bf16.mxu1 %v10690_v44 }
 0xc55   :  { %v4278_v63 = vpop.f32.mrb[74].mxu0  ;;  %v4355_v39 = vpop.f32.mrb[70].mxu1 }
 0xc56   :  { %v4282_v4 = vadd.f32 %v4278_v63, %v3493_v60  ;;  %v4359_v41 = vadd.f32 %v4355_v39, %v3611_v62  ;;  %v7999_v40 = vpop.f32.mrb[75].mxu0  ;;  %v8010_v50 = vpop.f32.mrb[71].mxu1 }
 0xc58   :  { %v6923_v38 = vmul.f32 -1.442695, %v4282_v4  ;;  %v6925_v31 = vmul.f32 -1.442695, %v4359_v41 }
 0xc5a   :  { %8969 = vpow2.f32 %v6923_v38 }
 0xc5b   :  { %8971 = vpow2.f32 %v6925_v31 }
 0xc5d   :  { %v4432_v46 = vpop.f32.mrb[76].mxu0  ;;  %v4504_v18 = vpop.f32.mrb[72].mxu1 }
 0xc5e   :  { %v4436_v59 = vadd.f32 %v4432_v46, %v10231_v32  ;;  %v4508_v27 = vadd.f32 %v4504_v18, %v10233_v45  ;;  %v8021_v36 = vpop.f32.mrb[77].mxu0  ;;  %v8032_v37 = vpop.f32.mrb[73].mxu1  ;;  %v4208_v32 = vsel %vm1172_vm10, %v4204_v53, 0.0 }
 0xc60   :  { %v6928_v35 = vmul.f32 -1.442695, %v4508_v27 }
 0xc62   :  { %8973 = vpow2.f32 %v6928_v35 }
 0xc63   :  { %8975 = vtanh.f32 %v4436_v59 }
 0xc64   :  { %v8970_v1 = vpop.eup %8969 }
 0xc65   :  { %v8972_v19 = vpop.eup %8971  ;;  %v4286_v54 = vadd.f32 1.0, %v8970_v1 }
 0xc66   :  { %v4363_v5 = vadd.f32 1.0, %v8972_v19 }
 0xc67   :  { %8977 = vrcp.f32 %v4286_v54 }
 0xc68   :  { %8979 = vrcp.f32 %v4363_v5 }
 0xc6c   :  { %v8974_v42 = vpop.eup %8973 }
 0xc6d   :  { %v8976_v26 = vpop.eup %8975  ;;  %v4512_v45 = vadd.f32 1.0, %v8974_v42 }
 0xc6f   :  { %8981 = vrcp.f32 %v4512_v45 }
 0xc71   :  { %v8978_v29 = vpop.eup %8977 }
 0xc72   :  { %v8980_v60 = vpop.eup %8979  ;;  %v4516_v62 = vmul.f32 %v8978_v29, %v8976_v26 }
 0xc73   :  { %v4515_v63 = vmul.f32 %v8980_v60, %v4208_v32 }
 0xc75   :  { %v4517_v39 = vadd.f32 %v4516_v62, %v4515_v63 }
 0xc77   :  { %8983 = vtanh.f32 %v4517_v39  ;;  %v10319_v4 = vsel %vm1491_vm11, %v4517_v39, %v4208_v32 }
 0xc79   :  { %v8982_v41 = vpop.eup %8981 }
 0xc81   :  { %v8984_v40 = vpop.eup %8983 }
 0xc82   :  { %v4519_v50 = vmul.f32 %v8984_v40, %v8982_v41 }
 0xc84   :  { %v10324_v38 = vsel %vm1491_vm11, %v4519_v50, %v10275_v30 }
 0xc85   :  { %8042 = vmatmul.mubr.msk.f32.vlgmr.msra.gmra.mrb[78].mxu0 %vm69_vm0, %v10324_v38  ;;  %8053 = vmatmul.mubr.msk.f32.vlgmr.msra.gmra.mrb[74].mxu1 %vm69_vm0, %v10324_v38 }
 0xc86   :  { %8646 = vmatpush3.bf16.msra.mxu0 %v10169_v17  ;;  %8652 = vmatpush3.bf16.msra.mxu1 %v10171_v47 }
 0xc87   :  { %8647 = vmatprep.subr.bf16.mxu0 %v10690_v44  ;;  %8653 = vmatprep.subr.bf16.mxu1 %v10690_v44 }
 0xc88   :  { %8063 = vmatprep.mubr.msk.f32.mxu0 %vm9135_vm2, %v10691_v56  ;;  %8074 = vmatprep.mubr.msk.f32.mxu1 %vm9135_vm2, %v10691_v56 }
 0xc8a   :  { %8649 = vmatpush3.bf16.msra.mxu0 %v10189_v43  ;;  %8655 = vmatpush3.bf16.msra.mxu1 %v10191_v48 }
 0xc8b   :  { %8656 = vmatprep.subr.bf16.mxu0 %v10690_v44  ;;  %8662 = vmatprep.subr.bf16.mxu1 %v10690_v44 }
 0xc8d   :  { %8064 = vmatmul.mubr.msk.f32.vlgmr.msra.gmra.mrb[80].mxu0 %vm69_vm0, %v10324_v38  ;;  %8075 = vmatmul.mubr.msk.f32.vlgmr.msra.gmra.mrb[76].mxu1 %vm69_vm0, %v10324_v38 }
 0xc8e   :  { %8658 = vmatpush3.bf16.msra.mxu0 %v10099_v34  ;;  %8664 = vmatpush3.bf16.msra.mxu1 %v10101_v14 }
 0xc8f   :  { %8659 = vmatprep.subr.bf16.mxu0 %v10690_v44  ;;  %8665 = vmatprep.subr.bf16.mxu1 %v10690_v44 }
 0xc90   :  { %8085 = vmatprep.mubr.msk.f32.mxu0 %vm9135_vm2, %v10691_v56  ;;  %8096 = vmatprep.mubr.msk.f32.mxu1 %vm9135_vm2, %v10691_v56 }
 0xc92   :  { %8661 = vmatpush3.bf16.msra.mxu0 %v10125_v24  ;;  %8667 = vmatpush3.bf16.msra.mxu1 %v10127_v23 }
 0xc93   :  { %8668 = vmatprep.subr.bf16.mxu0 %v10690_v44  ;;  %8674 = vmatprep.subr.bf16.mxu1 %v10690_v44 }
 0xd58   :  { %v4591_v53 = vpop.f32.mrb[78].mxu0  ;;  %v4668_v30 = vpop.f32.mrb[74].mxu1 }
 0xd59   :  { %v4595_v31 = vadd.f32 %v4591_v53, %v3498_v55  ;;  %v4672_v46 = vadd.f32 %v4668_v30, %v3616_v2  ;;  %v8043_v18 = vpop.f32.mrb[79].mxu0  ;;  %v8054_v59 = vpop.f32.mrb[75].mxu1 }
 0xd5b   :  { %v6930_v27 = vmul.f32 -1.442695, %v4595_v31  ;;  %v6932_v36 = vmul.f32 -1.442695, %v4672_v46 }
 0xd5d   :  { %8985 = vpow2.f32 %v6930_v27 }
 0xd5e   :  { %8987 = vpow2.f32 %v6932_v36 }
 0xd60   :  { %v4745_v37 = vpop.f32.mrb[80].mxu0  ;;  %v4817_v35 = vpop.f32.mrb[76].mxu1 }
 0xd61   :  { %v4749_v1 = vadd.f32 %v4745_v37, %v10239_v33  ;;  %v4821_v19 = vadd.f32 %v4817_v35, %v10241_v58  ;;  %v8065_v51 = vpop.f32.mrb[81].mxu0  ;;  %v8076_v54 = vpop.f32.mrb[77].mxu1 }
 0xd63   :  { %v6935_v5 = vmul.f32 -1.442695, %v4821_v19 }
 0xd65   :  { %8989 = vpow2.f32 %v6935_v5 }
 0xd66   :  { %8991 = vtanh.f32 %v4749_v1 }
 0xd67   :  { %v8986_v9 = vpop.eup %8985 }
 0xd68   :  { %v8988_v42 = vpop.eup %8987  ;;  %v4599_v26 = vadd.f32 1.0, %v8986_v9 }
 0xd69   :  { %v4676_v29 = vadd.f32 1.0, %v8988_v42 }
 0xd6a   :  { %8993 = vrcp.f32 %v4599_v26 }
 0xd6b   :  { %8995 = vrcp.f32 %v4676_v29 }
 0xd6f   :  { %v8990_v60 = vpop.eup %8989 }
 0xd70   :  { %v8992_v32 = vpop.eup %8991  ;;  %v4825_v39 = vadd.f32 1.0, %v8990_v60 }
 0xd72   :  { %8997 = vrcp.f32 %v4825_v39 }
 0xd74   :  { %v8994_v62 = vpop.eup %8993 }
 0xd75   :  { %v8996_v45 = vpop.eup %8995  ;;  %v4829_v63 = vmul.f32 %v8994_v62, %v8992_v32 }
 0xd76   :  { %v4828_v33 = vmul.f32 %v8996_v45, %v10319_v4 }
 0xd78   :  { %v4830_v58 = vadd.f32 %v4829_v63, %v4828_v33 }
 0xd7a   :  { %8999 = vtanh.f32 %v4830_v58  ;;  %v10368_v41 = vsel %vm1810_vm12, %v4830_v58, %v10319_v4  ;;  %v3621_v4 = vadd.f32 %v10060_v22, %v10259_v11 }
 0xd7c   :  { %v8998_v40 = vpop.eup %8997 }
 0xd84   :  { %v9000_v50 = vpop.eup %8999 }
 0xd85   :  { %v4832_v55 = vmul.f32 %v9000_v50, %v8998_v40 }
 0xd87   :  { %v10373_v2 = vsel %vm1810_vm12, %v4832_v55, %v10324_v38 }
 0xd88   :  { %8086 = vmatmul.mubr.msk.f32.vlgmr.msra.gmra.mrb[82].mxu0 %vm69_vm0, %v10373_v2  ;;  %8097 = vmatmul.mubr.msk.f32.vlgmr.msra.gmra.mrb[78].mxu1 %vm69_vm0, %v10373_v2 }
 0xd89   :  { %8670 = vmatpush3.bf16.msra.mxu0 %v10169_v17  ;;  %8676 = vmatpush3.bf16.msra.mxu1 %v10171_v47 }
 0xd8a   :  { %8671 = vmatprep.subr.bf16.mxu0 %v10690_v44  ;;  %8677 = vmatprep.subr.bf16.mxu1 %v10690_v44 }
 0xd8b   :  { %8107 = vmatprep.mubr.msk.f32.mxu0 %vm9135_vm2, %v10691_v56  ;;  %8118 = vmatprep.mubr.msk.f32.mxu1 %vm9135_vm2, %v10691_v56 }
 0xd8d   :  { %8673 = vmatpush3.bf16.msra.mxu0 %v10189_v43  ;;  %8679 = vmatpush3.bf16.msra.mxu1 %v10191_v48 }
 0xd8e   :  { %8680 = vmatprep.subr.bf16.mxu0 %v10690_v44  ;;  %8686 = vmatprep.subr.bf16.mxu1 %v10690_v44 }
 0xd90   :  { %8108 = vmatmul.mubr.msk.f32.vlgmr.msra.gmra.mrb[84].mxu0 %vm69_vm0, %v10373_v2  ;;  %8119 = vmatmul.mubr.msk.f32.vlgmr.msra.gmra.mrb[80].mxu1 %vm69_vm0, %v10373_v2 }
 0xd91   :  { %8682 = vmatpush3.bf16.msra.mxu0 %v10099_v34  ;;  %8688 = vmatpush3.bf16.msra.mxu1 %v10101_v14 }
 0xd92   :  { %8683 = vmatprep.subr.bf16.mxu0 %v10690_v44  ;;  %8689 = vmatprep.subr.bf16.mxu1 %v10690_v44 }
 0xd93   :  { %8129 = vmatprep.mubr.msk.f32.mxu0 %vm9135_vm2, %v10691_v56  ;;  %8140 = vmatprep.mubr.msk.f32.mxu1 %vm9135_vm2, %v10691_v56 }
 0xd95   :  { %8685 = vmatpush3.bf16.msra.mxu0 %v10125_v24  ;;  %8691 = vmatpush3.bf16.msra.mxu1 %v10127_v23 }
 0xd96   :  { %8692 = vmatprep.subr.bf16.mxu0 %v10690_v44  ;;  %8698 = vmatprep.subr.bf16.mxu1 %v10690_v44 }
 0xe5b   :  { %v4904_v38 = vpop.f32.mrb[82].mxu0  ;;  %v4981_v53 = vpop.f32.mrb[78].mxu1 }
 0xe5c   :  { %v4908_v30 = vadd.f32 %v4904_v38, %v3503_v6  ;;  %v4985_v31 = vadd.f32 %v4981_v53, %v3621_v4  ;;  %v8087_v46 = vpop.f32.mrb[83].mxu0  ;;  %v8098_v18 = vpop.f32.mrb[79].mxu1 }
 0xe5e   :  { %v6937_v59 = vmul.f32 -1.442695, %v4908_v30  ;;  %v6939_v27 = vmul.f32 -1.442695, %v4985_v31 }
 0xe60   :  { %9001 = vpow2.f32 %v6937_v59 }
 0xe61   :  { %9003 = vpow2.f32 %v6939_v27 }
 0xe63   :  { %v5058_v36 = vpop.f32.mrb[84].mxu0  ;;  %v5130_v37 = vpop.f32.mrb[80].mxu1 }
 0xe64   :  { %v5062_v35 = vadd.f32 %v5058_v36, %v10235_v25  ;;  %v5134_v1 = vadd.f32 %v5130_v37, %v10237_v13  ;;  %v8109_v21 = vpop.f32.mrb[85].mxu0  ;;  %v8120_v19 = vpop.f32.mrb[81].mxu1 }
 0xe66   :  { %v6942_v51 = vmul.f32 -1.442695, %v5134_v1 }
 0xe68   :  { %9005 = vpow2.f32 %v6942_v51 }
 0xe69   :  { %9007 = vtanh.f32 %v5062_v35 }
 0xe6a   :  { %v9002_v22 = vpop.eup %9001 }
 0xe6b   :  { %v9004_v54 = vpop.eup %9003  ;;  %v4912_v5 = vadd.f32 1.0, %v9002_v22 }
 0xe6c   :  { %v4989_v9 = vadd.f32 1.0, %v9004_v54 }
 0xe6d   :  { %9009 = vrcp.f32 %v4912_v5 }
 0xe6e   :  { %9011 = vrcp.f32 %v4989_v9 }
 0xe72   :  { %v9006_v42 = vpop.eup %9005 }
 0xe73   :  { %v9008_v26 = vpop.eup %9007  ;;  %v5138_v62 = vadd.f32 1.0, %v9006_v42 }
 0xe75   :  { %9013 = vrcp.f32 %v5138_v62 }
 0xe77   :  { %v9010_v29 = vpop.eup %9009 }
 0xe78   :  { %v9012_v60 = vpop.eup %9011  ;;  %v5142_v32 = vmul.f32 %v9010_v29, %v9008_v26 }
 0xe79   :  { %v5141_v25 = vmul.f32 %v9012_v60, %v10368_v41  ;;  %v3631_v60 = vadd.f32 %v10068_v8, %v10259_v11 }
 0xe7b   :  { %v5143_v13 = vadd.f32 %v5142_v32, %v5141_v25 }
 0xe7d   :  { %9015 = vtanh.f32 %v5143_v13  ;;  %v10417_v45 = vsel %vm2129_vm13, %v5143_v13, %v10368_v41  ;;  %v3626_v41 = vadd.f32 %v10259_v11, %v10072_v3 }
 0xe7f   :  { %v9014_v63 = vpop.eup %9013 }
 0xe87   :  { %v9016_v39 = vpop.eup %9015 }
 0xe88   :  { %v5145_v33 = vmul.f32 %v9016_v39, %v9014_v63 }
 0xe8a   :  { %v10422_v58 = vsel %vm2129_vm13, %v5145_v33, %v10373_v2 }
 0xe8b   :  { %8130 = vmatmul.mubr.msk.f32.vlgmr.msra.gmra.mrb[86].mxu0 %vm69_vm0, %v10422_v58  ;;  %8141 = vmatmul.mubr.msk.f32.vlgmr.msra.gmra.mrb[82].mxu1 %vm69_vm0, %v10422_v58 }
 0xe8c   :  { %8694 = vmatpush3.bf16.msra.mxu0 %v10169_v17  ;;  %8700 = vmatpush3.bf16.msra.mxu1 %v10171_v47 }
 0xe8d   :  { %8695 = vmatprep.subr.bf16.mxu0 %v10690_v44  ;;  %8701 = vmatprep.subr.bf16.mxu1 %v10690_v44 }
 0xe8e   :  { %8151 = vmatprep.mubr.msk.f32.mxu0 %vm9135_vm2, %v10691_v56  ;;  %8162 = vmatprep.mubr.msk.f32.mxu1 %vm9135_vm2, %v10691_v56 }
 0xe90   :  { %8697 = vmatpush3.bf16.msra.mxu0 %v10189_v43  ;;  %8703 = vmatpush3.bf16.msra.mxu1 %v10191_v48 }
 0xe91   :  { %8704 = vmatprep.subr.bf16.mxu0 %v10690_v44  ;;  %8710 = vmatprep.subr.bf16.mxu1 %v10690_v44 }
 0xe93   :  { %8152 = vmatmul.mubr.msk.f32.vlgmr.msra.gmra.mrb[88].mxu0 %vm69_vm0, %v10422_v58  ;;  %8163 = vmatmul.mubr.msk.f32.vlgmr.msra.gmra.mrb[84].mxu1 %vm69_vm0, %v10422_v58 }
 0xe94   :  { %8706 = vmatpush3.bf16.msra.mxu0 %v10099_v34  ;;  %8712 = vmatpush3.bf16.msra.mxu1 %v10101_v14 }
 0xe95   :  { %8707 = vmatprep.subr.bf16.mxu0 %v10690_v44  ;;  %8713 = vmatprep.subr.bf16.mxu1 %v10690_v44 }
 0xe96   :  { %8173 = vmatprep.mubr.msk.f32.mxu0 %vm9135_vm2, %v10691_v56  ;;  %8184 = vmatprep.mubr.msk.f32.mxu1 %vm9135_vm2, %v10691_v56 }
 0xe98   :  { %8709 = vmatpush3.bf16.msra.mxu0 %v10125_v24  ;;  %8715 = vmatpush3.bf16.msra.mxu1 %v10127_v23 }
 0xe99   :  { %8716 = vmatprep.subr.bf16.mxu0 %v10690_v44  ;;  %8722 = vmatprep.subr.bf16.mxu1 %v10690_v44 }
 0xf5e   :  { %v5217_v40 = vpop.f32.mrb[86].mxu0  ;;  %v5294_v50 = vpop.f32.mrb[82].mxu1 }
 0xf5f   :  { %v5221_v55 = vadd.f32 %v5217_v40, %v3508_v0  ;;  %v5298_v2 = vadd.f32 %v5294_v50, %v3626_v41  ;;  %v8131_v6 = vpop.f32.mrb[87].mxu0  ;;  %v8142_v4 = vpop.f32.mrb[83].mxu1 }
 0xf61   :  { %v6944_v38 = vmul.f32 -1.442695, %v5221_v55  ;;  %v6946_v53 = vmul.f32 -1.442695, %v5298_v2 }
 0xf63   :  { %9017 = vpow2.f32 %v6944_v38 }
 0xf64   :  { %9019 = vpow2.f32 %v6946_v53 }
 0xf66   :  { %v5371_v30 = vpop.f32.mrb[88].mxu0  ;;  %v5443_v31 = vpop.f32.mrb[84].mxu1 }
 0xf67   :  { %v5375_v46 = vadd.f32 %v5371_v30, %v10247_v61  ;;  %v5447_v18 = vadd.f32 %v5443_v31, %v10249_v52  ;;  %v8153_v12 = vpop.f32.mrb[89].mxu0  ;;  %v8164_v59 = vpop.f32.mrb[85].mxu1 }
 0xf69   :  { %v6949_v27 = vmul.f32 -1.442695, %v5447_v18 }
 0xf6b   :  { %9021 = vpow2.f32 %v6949_v27 }
 0xf6c   :  { %9023 = vtanh.f32 %v5375_v46 }
 0xf6d   :  { %v9018_v3 = vpop.eup %9017 }
 0xf6e   :  { %v9020_v36 = vpop.eup %9019  ;;  %v5225_v37 = vadd.f32 1.0, %v9018_v3 }
 0xf6f   :  { %v5302_v35 = vadd.f32 1.0, %v9020_v36 }
 0xf70   :  { %9025 = vrcp.f32 %v5225_v37 }
 0xf71   :  { %9027 = vrcp.f32 %v5302_v35 }
 0xf75   :  { %v9022_v1 = vpop.eup %9021 }
 0xf76   :  { %v9024_v21 = vpop.eup %9023  ;;  %v5451_v54 = vadd.f32 1.0, %v9022_v1 }
 0xf78   :  { %9029 = vrcp.f32 %v5451_v54  ;;  %v10692_v54 = vld [vmem:[#allocation14_spill] sm:$0xff] }
 0xf7a   :  { %v9026_v19 = vpop.eup %9025 }
 0xf7b   :  { %v9028_v51 = vpop.eup %9027  ;;  %v5455_v22 = vmul.f32 %v9026_v19, %v9024_v21 }
 0xf7c   :  { %v5454_v61 = vmul.f32 %v9028_v51, %v10417_v45 }
 0xf7e   :  { %v5456_v52 = vadd.f32 %v5455_v22, %v5454_v61 }
 0xf80   :  { %9031 = vtanh.f32 %v5456_v52  ;;  %v10466_v5 = vsel %vm2448_vm14, %v5456_v52, %v10417_v45  ;;  %v10693_v52 = vld [vmem:[#allocation15_spill] sm:$0xff] }
 0xf82   :  { %v9030_v9 = vpop.eup %9029 }
 0xf8a   :  { %v9032_v42 = vpop.eup %9031 }
 0xf8b   :  { %v5458_v26 = vmul.f32 %v9032_v42, %v9030_v9 }
 0xf8d   :  { %v10471_v29 = vsel %vm2448_vm14, %v5458_v26, %v10422_v58 }
 0xf8e   :  { %8174 = vmatmul.mubr.msk.f32.vlgmr.msra.gmra.mrb[90].mxu0 %vm69_vm0, %v10471_v29  ;;  %8185 = vmatmul.mubr.msk.f32.vlgmr.msra.gmra.mrb[86].mxu1 %vm69_vm0, %v10471_v29 }
 0xf8f   :  { %8718 = vmatpush3.bf16.msra.mxu0 %v10169_v17  ;;  %8724 = vmatpush3.bf16.msra.mxu1 %v10171_v47 }
 0xf90   :  { %8719 = vmatprep.subr.bf16.mxu0 %v10690_v44  ;;  %8725 = vmatprep.subr.bf16.mxu1 %v10690_v44 }
 0xf91   :  { %8195 = vmatprep.mubr.msk.f32.mxu0 %vm9135_vm2, %v10691_v56  ;;  %8206 = vmatprep.mubr.msk.f32.mxu1 %vm9135_vm2, %v10691_v56 }
 0xf93   :  { %8721 = vmatpush3.bf16.msra.mxu0 %v10189_v43  ;;  %8727 = vmatpush3.bf16.msra.mxu1 %v10191_v48 }
 0xf94   :  { %8728 = vmatprep.subr.bf16.mxu0 %v10690_v44  ;;  %8734 = vmatprep.subr.bf16.mxu1 %v10690_v44 }
 0xf96   :  { %8196 = vmatmul.mubr.msk.f32.vlgmr.msra.gmra.mrb[92].mxu0 %vm69_vm0, %v10471_v29  ;;  %8207 = vmatmul.mubr.msk.f32.vlgmr.msra.gmra.mrb[88].mxu1 %vm69_vm0, %v10471_v29 }
 0xf97   :  { %8730 = vmatpush3.bf16.msra.mxu0 %v10099_v34  ;;  %8736 = vmatpush3.bf16.msra.mxu1 %v10101_v14 }
 0xf98   :  { %8731 = vmatprep.subr.bf16.mxu0 %v10690_v44  ;;  %8737 = vmatprep.subr.bf16.mxu1 %v10690_v44 }
 0xf99   :  { %8217 = vmatprep.mubr.msk.f32.mxu0 %vm9135_vm2, %v10691_v56  ;;  %8228 = vmatprep.mubr.msk.f32.mxu1 %vm9135_vm2, %v10691_v56 }
 0xf9b   :  { %8733 = vmatpush3.bf16.msra.mxu0 %v10125_v24  ;;  %8739 = vmatpush3.bf16.msra.mxu1 %v10127_v23 }
 0xf9c   :  { %8740 = vmatprep.subr.bf16.mxu0 %v10690_v44  ;;  %8746 = vmatprep.subr.bf16.mxu1 %v10690_v44 }
0x1061   :  { %v5530_v32 = vpop.f32.mrb[90].mxu0  ;;  %v5607_v62 = vpop.f32.mrb[86].mxu1 }
0x1062   :  { %v5534_v25 = vadd.f32 %v5530_v32, %v3513_v15  ;;  %v5611_v13 = vadd.f32 %v5607_v62, %v3631_v60  ;;  %v8175_v45 = vpop.f32.mrb[91].mxu0  ;;  %v8186_v63 = vpop.f32.mrb[87].mxu1 }
0x1064   :  { %v6951_v39 = vmul.f32 -1.442695, %v5534_v25  ;;  %v6953_v33 = vmul.f32 -1.442695, %v5611_v13 }
0x1066   :  { %9033 = vpow2.f32 %v6951_v39 }
0x1067   :  { %9035 = vpow2.f32 %v6953_v33 }
0x1069   :  { %v5684_v58 = vpop.f32.mrb[92].mxu0  ;;  %v5756_v0 = vpop.f32.mrb[88].mxu1 }
0x106a   :  { %v5688_v41 = vadd.f32 %v5684_v58, %v10243_v16  ;;  %v5760_v40 = vadd.f32 %v5756_v0, %v10245_v20  ;;  %v8197_v7 = vpop.f32.mrb[93].mxu0  ;;  %v8208_v50 = vpop.f32.mrb[89].mxu1 }
0x106c   :  { %v6956_v55 = vmul.f32 -1.442695, %v5760_v40 }
0x106e   :  { %9037 = vpow2.f32 %v6956_v55 }
0x106f   :  { %9039 = vtanh.f32 %v5688_v41 }
0x1070   :  { %v9034_v8 = vpop.eup %9033 }
0x1071   :  { %v9036_v2 = vpop.eup %9035  ;;  %v5538_v6 = vadd.f32 1.0, %v9034_v8 }
0x1072   :  { %v5615_v4 = vadd.f32 1.0, %v9036_v2 }
0x1073   :  { %9041 = vrcp.f32 %v5538_v6 }
0x1074   :  { %9043 = vrcp.f32 %v5615_v4 }
0x1078   :  { %v9038_v38 = vpop.eup %9037 }
0x1079   :  { %v9040_v53 = vpop.eup %9039  ;;  %v5764_v18 = vadd.f32 1.0, %v9038_v38 }
0x107b   :  { %9045 = vrcp.f32 %v5764_v18 }
0x107d   :  { %v9042_v30 = vpop.eup %9041 }
0x107e   :  { %v9044_v31 = vpop.eup %9043  ;;  %v5768_v46 = vmul.f32 %v9042_v30, %v9040_v53 }
0x107f   :  { %v5767_v16 = vmul.f32 %v9044_v31, %v10466_v5 }
0x1081   :  { %v5769_v20 = vadd.f32 %v5768_v46, %v5767_v16  ;;  %v10697_v46 = vld [vmem:[#allocation12_spill] sm:$0xff]  ;;  %v10698_v16 = vld [vmem:[#allocation13_spill] sm:$0xff] }
0x1083   :  { %9047 = vtanh.f32 %v5769_v20  ;;  %v10515_v12 = vsel %vm2767_vm15, %v5769_v20, %v10466_v5 }
0x1085   :  { %v9046_v59 = vpop.eup %9045 }
0x108d   :  { %v9048_v27 = vpop.eup %9047 }
0x108e   :  { %v5771_v3 = vmul.f32 %v9048_v27, %v9046_v59 }
0x1090   :  { %v10520_v36 = vsel %vm2767_vm15, %v5771_v3, %v10471_v29 }
0x1091   :  { %8218 = vmatmul.mubr.msk.f32.vlgmr.msra.gmra.mrb[94].mxu0 %vm69_vm0, %v10520_v36  ;;  %8229 = vmatmul.mubr.msk.f32.vlgmr.msra.gmra.mrb[90].mxu1 %vm69_vm0, %v10520_v36 }
0x1092   :  { %8742 = vmatpush3.bf16.msra.mxu0 %v10169_v17  ;;  %8748 = vmatpush3.bf16.msra.mxu1 %v10171_v47 }
0x1093   :  { %8743 = vmatprep.subr.bf16.mxu0 %v10690_v44  ;;  %8749 = vmatprep.subr.bf16.mxu1 %v10690_v44 }
0x1094   :  { %8239 = vmatprep.mubr.msk.f32.mxu0 %vm9135_vm2, %v10691_v56  ;;  %8250 = vmatprep.mubr.msk.f32.mxu1 %vm9135_vm2, %v10691_v56 }
0x1096   :  { %8745 = vmatpush3.bf16.msra.mxu0 %v10189_v43  ;;  %8751 = vmatpush3.bf16.msra.mxu1 %v10191_v48 }
0x1097   :  { %8752 = vmatprep.subr.bf16.mxu0 %v10690_v44  ;;  %8758 = vmatprep.subr.bf16.mxu1 %v10690_v44 }
0x1099   :  { %8240 = vmatmul.mubr.msk.f32.vlgmr.msra.gmra.mrb[96].mxu0 %vm69_vm0, %v10520_v36  ;;  %8251 = vmatmul.mubr.msk.f32.vlgmr.msra.gmra.mrb[92].mxu1 %vm69_vm0, %v10520_v36 }
0x109a   :  { %8754 = vmatpush3.bf16.msra.mxu0 %v10099_v34  ;;  %8760 = vmatpush3.bf16.msra.mxu1 %v10101_v14  ;;  %v3636_v34 = vadd.f32 %v10259_v11, %v10223_v28 }
0x109b   :  { %8755 = vmatprep.subr.bf16.mxu0 %v10690_v44  ;;  %8761 = vmatprep.subr.bf16.mxu1 %v10690_v44 }
0x109c   :  { %8261 = vmatprep.mubr.msk.f32.mxu0 %vm9135_vm2, %v10691_v56  ;;  %8272 = vmatprep.mubr.msk.f32.mxu1 %vm9135_vm2, %v10691_v56 }
0x109e   :  { %8757 = vmatpush3.bf16.msra.mxu0 %v10125_v24  ;;  %8763 = vmatpush3.bf16.msra.mxu1 %v10127_v23 }
0x109f   :  { %8764 = vmatprep.subr.bf16.mxu0 %v10690_v44  ;;  %8770 = vmatprep.subr.bf16.mxu1 %v10690_v44 }
0x1164   :  { %v5843_v14 = vpop.f32.mrb[94].mxu0  ;;  %v5920_v37 = vpop.f32.mrb[90].mxu1 }
0x1165   :  { %v5847_v35 = vadd.f32 %v5843_v14, %v3518_v10  ;;  %v5924_v1 = vadd.f32 %v5920_v37, %v3636_v34  ;;  %v8219_v21 = vpop.f32.mrb[95].mxu0  ;;  %v8230_v19 = vpop.f32.mrb[91].mxu1 }
0x1167   :  { %v6958_v51 = vmul.f32 -1.442695, %v5847_v35  ;;  %v6960_v24 = vmul.f32 -1.442695, %v5924_v1 }
0x1169   :  { %9049 = vpow2.f32 %v6958_v51 }
0x116a   :  { %9051 = vpow2.f32 %v6960_v24 }
0x116c   :  { %v5997_v23 = vpop.f32.mrb[96].mxu0  ;;  %v6069_v22 = vpop.f32.mrb[92].mxu1 }
0x116d   :  { %v6001_v61 = vadd.f32 %v5997_v23, %v10692_v54  ;;  %v6073_v5 = vadd.f32 %v6069_v22, %v10693_v52  ;;  %v8241_v49 = vpop.f32.mrb[97].mxu0  ;;  %v8252_v9 = vpop.f32.mrb[93].mxu1  ;;  %v6971_v22 = vld [vmem:[%s10663_s11] ss:$0 sm:$0xff] }
0x116e   :  { %v6410_v49 = vld [vmem:[%s10664_s12] sm:$0xff] }
0x116f   :  { %v6963_v42 = vmul.f32 -1.442695, %v6073_v5  ;;  %vm6411_vm4 = vcmp.gt.f32.partialorder %v6410_v49, 0.5 }
0x1171   :  { %9053 = vpow2.f32 %v6963_v42 }
0x1172   :  { %9055 = vtanh.f32 %v6001_v61 }
0x1173   :  { %v9050_v28 = vpop.eup %9049 }
0x1174   :  { %v9052_v26 = vpop.eup %9051  ;;  %v5851_v29 = vadd.f32 1.0, %v9050_v28 }
0x1175   :  { %v5928_v15 = vadd.f32 1.0, %v9052_v26 }
0x1176   :  { %9057 = vrcp.f32 %v5851_v29 }
0x1177   :  { %9059 = vrcp.f32 %v5928_v15 }
0x117b   :  { %v9054_v60 = vpop.eup %9053 }
0x117c   :  { %v9056_v32 = vpop.eup %9055  ;;  %v6077_v45 = vadd.f32 1.0, %v9054_v60 }
0x117e   :  { %9061 = vrcp.f32 %v6077_v45 }
0x1180   :  { %v9058_v62 = vpop.eup %9057 }
0x1181   :  { %v9060_v25 = vpop.eup %9059  ;;  %v6081_v13 = vmul.f32 %v9058_v62, %v9056_v32 }
0x1182   :  { %v6080_v63 = vmul.f32 %v9060_v25, %v10515_v12 }
0x1184   :  { %v6082_v39 = vadd.f32 %v6081_v13, %v6080_v63 }
0x1186   :  { %9063 = vtanh.f32 %v6082_v39  ;;  %v6086_v58 = vsel %vm3086_vm1, %v6082_v39, %v10515_v12 }
0x1188   :  { %v9062_v0 = vpop.eup %9061 }
0x1190   :  { %v9064_v41 = vpop.eup %9063 }
0x1191   :  { %v6084_v40 = vmul.f32 %v9064_v41, %v9062_v0 }
0x1193   :  { %v6085_v7 = vsel %vm3086_vm1, %v6084_v40, %v10520_v36 }
0x1194   :  { %8262 = vmatmul.mubr.msk.f32.vlgmr.msra.gmra.mrb[98].mxu0 %vm69_vm0, %v6085_v7  ;;  %8273 = vmatmul.mubr.msk.f32.vlgmr.msra.gmra.mrb[94].mxu1 %vm69_vm0, %v6085_v7 }
0x1195   :  { %8766 = vmatpush3.bf16.msra.mxu0 %v10169_v17  ;;  %8772 = vmatpush3.bf16.msra.mxu1 %v10171_v47  ;;  %v10695_v17 = vld [vmem:[#allocation10_spill] sm:$0xff] }
0x1196   :  { %8767 = vmatprep.subr.bf16.mxu0 %v10690_v44  ;;  %8773 = vmatprep.subr.bf16.mxu1 %v10690_v44  ;;  %v3523_v47 = vadd.f32 %v10695_v17, %v10254_v57 }
0x1197   :  { %8283 = vmatprep.mubr.msk.f32.mxu0 %vm9135_vm2, %v10691_v56  ;;  %8294 = vmatprep.mubr.msk.f32.mxu1 %vm9135_vm2, %v10691_v56 }
0x1199   :  { %8769 = vmatpush3.bf16.msra.mxu0 %v10189_v43  ;;  %8775 = vmatpush3.bf16.msra.mxu1 %v10191_v48  ;;  %v10696_v43 = vld [vmem:[#allocation11_spill] sm:$0xff] }
0x119a   :  { %8297 = vmatprep.subr.mxu0 %v10691_v56  ;;  %8776 = vmatprep.subr.bf16.mxu1 %v10690_v44  ;;  %v3641_v48 = vadd.f32 %v10696_v43, %v10259_v11  ;;  %v6435_v43 = vlaneseq }
0x119c   :  { %8284 = vmatmul.mubr.msk.f32.vlgmr.msra.gmra.mrb[100].mxu0 %vm69_vm0, %v6085_v7  ;;  %8295 = vmatmul.mubr.msk.f32.vlgmr.msra.gmra.mrb[96].mxu1 %vm69_vm0, %v6085_v7 }
0x119d   :  { %8299 = vmatprep.mubr.msk.f32.mxu0 %vm9135_vm2, %v10691_v56  ;;  %8310 = vmatprep.mubr.msk.f32.mxu1 %vm9135_vm2, %v10691_v56 }
0x1267   :  { %v6156_v50 = vpop.f32.mrb[98].mxu0  ;;  %v6233_v55 = vpop.f32.mrb[94].mxu1 }
0x1268   :  { %v6160_v8 = vadd.f32 %v6156_v50, %v3523_v47  ;;  %v6237_v2 = vadd.f32 %v6233_v55, %v3641_v48  ;;  %v8263_v6 = vpop.f32.mrb[99].mxu0  ;;  %v8274_v4 = vpop.f32.mrb[95].mxu1  ;;  %v6436_v48 = vshrl.u32 %v6435_v43, 7 }
0x1269   :  { %v6546_v6 = vld [vmem:[%s10666_s14] sm:$0xff]  ;;  %v6547_v4 = vld [vmem:[%s10666_s14 + $0x8] sm:$0xff] }
0x126a   :  { %v6965_v38 = vmul.f32 -1.442695, %v6160_v8  ;;  %v6967_v53 = vmul.f32 -1.442695, %v6237_v2  ;;  %v6437_v50 = vsub.s32 0, %v6436_v48 }
0x126c   :  { %9065 = vpow2.f32 %v6965_v38  ;;  %v6548_v38 = vld [vmem:[%s10666_s14 + $0x10] sm:$0xff] }
0x126d   :  { %9067 = vpow2.f32 %v6967_v53  ;;  %v8777_v53 = vpack.c.bf16 %v6547_v4, %v6546_v6 }
0x126f   :  { %v6310_v30 = vpop.f32.mrb[100].mxu0  ;;  %v6382_v31 = vpop.f32.mrb[96].mxu1  ;;  %8778 = vmatpush3.bf16.msra.mxu1 %v8777_v53 }
0x1270   :  { %v6314_v18 = vadd.f32 %v6310_v30, %v10697_v46  ;;  %v6386_v20 = vadd.f32 %v6382_v31, %v10698_v16  ;;  %v8285_v57 = vpop.f32.mrb[101].mxu0  ;;  %v8296_v12 = vpop.f32.mrb[97].mxu1  ;;  %v6549_v30 = vld [vmem:[%s10666_s14 + $0x18] sm:$0xff]  ;;  %8779 = vmatprep.subr.bf16.mxu1 %v10690_v44  ;;  %v6626_v16 = vld [vmem:[%s10667_s15 + $0x8] sm:$0xff]  ;;  %s9137_s14 = smov [#allocation4]  }
0x1271   :  { %v8780_v31 = vpack.c.bf16 %v6549_v30, %v6548_v38  ;;  %s6719_s22 = sshll.u32 %s9137_s14, 4  ;;  %s6720_s22 = int_to_ptr.vmem [resolvable:$true] %s6719_s22 }
0x1272   :  { %v6970_v59 = vmul.f32 -1.442695, %v6386_v20  ;;  %s9085_s9 = scalar_lea.vmem %s6720_s22, 32  ;;  %p9090_p1 = scmp.lt.s32.totalorder %s6720_s22, %s6720_s22 }
0x1273   :  { %8781 = vmatpush3.bf16.msra.mxu1 %v8780_v31  ;;  %p9086_p0 = scmp.ne.s32.totalorder %s6720_s22, %s9085_s9  ;;  %p9091_p2 = scmp.lt.s32.totalorder %s9085_s9, %s9085_s9 }
0x1274   :  { %9069 = vpow2.f32 %v6970_v59 }
0x1275   :  { %9071 = vtanh.f32 %v6314_v18  ;;  %v6625_v18 = vld [vmem:[%s10667_s15] sm:$0xff]  ;;  %p9092_p3 = por %p9091_p2, %p9090_p1 }
0x1276   :  { %v9066_v11 = vpop.eup %9065  ;;  %v8783_v20 = vpack.c.bf16 %v6626_v16, %v6625_v18 }
0x1277   :  { %v9068_v27 = vpop.eup %9067  ;;  %v6164_v3 = vadd.f32 1.0, %v9066_v11  ;;  %p9093_p4 = pnand %p9092_p3, %p9086_p0 }
0x1278   :  { %v6241_v36 = vadd.f32 1.0, %v9068_v27 }
0x1279   :  { %9073 = vrcp.f32 %v6164_v3 }
0x127a   :  { %9075 = vrcp.f32 %v6241_v36 }
0x127e   :  { %v9070_v10 = vpop.eup %9069 }
0x127f   :  { %v9072_v34 = vpop.eup %9071  ;;  %v6390_v1 = vadd.f32 1.0, %v9070_v10 }
0x1281   :  { %9077 = vrcp.f32 %v6390_v1 }
0x1283   :  { %v9074_v14 = vpop.eup %9073 }
0x1284   :  { %v9076_v37 = vpop.eup %9075  ;;  %v6394_v35 = vmul.f32 %v9074_v14, %v9072_v34 }
0x1285   :  { %v6393_v21 = vmul.f32 %v9076_v37, %v6086_v58 }
0x1287   :  { %v6395_v19 = vadd.f32 %v6394_v35, %v6393_v21 }
0x1289   :  { %9079 = vtanh.f32 %v6395_v19 }
0x128b   :  { %v9078_v51 = vpop.eup %9077 }
0x1293   :  { %v9080_v24 = vpop.eup %9079 }
0x1294   :  { %v6397_v23 = vmul.f32 %v9080_v24, %v9078_v51 }
0x1296   :  { %v6398_v61 = vsel %vm3405_vm3, %v6397_v23, %v6085_v7  ;;  %v6432_v7 = vld [vmem:[%s10665_s13] sm:$0x1] }
0x1297   :  { %8298 = vmatpush3.msra.mxu0 %v6398_v61  ;;  %v6406_v52 = vmul.f32 %v6971_v22, %v6398_v61 }
0x1298   :  { %8782 = vmatprep.subr.bf16.mxu0 %v10690_v44 }
0x1299   :  { %v6407_v5 = vsel %vm69_vm0, %v6406_v52, 0.0 }
0x129a   :  { %6408 = vadd.xlane.f32.xlu1 %v6407_v5 }
0x1327   :  { %v6409_v9 = vpop.xlane.xlu1 %6408 }
0x1328   :  { %v6412_v42 = vsel %vm6411_vm4, %v6409_v9, -1e+30 }
0x1329   :  { %v6414_v28 = vsel %vm6413_vm5, %v6412_v42, -inf }
0x132a   :  { %v6415_v26 = vrot.slane %v6414_v28, 4 }
0x132c   :  { %v6416_v29 = vmax.f32 %v6414_v28, %v6415_v26 }
0x132e   :  { %v6417_v15 = vrot.slane %v6416_v29, 2 }
0x1330   :  { %v6418_v60 = vmax.f32 %v6416_v29, %v6417_v15 }
0x1332   :  { %v6419_v32 = vrot.slane %v6418_v60, 1 }
0x1334   :  { %v6420_v62 = vmax.f32 %v6418_v60, %v6419_v32 }
0x1336   :  { %v6421_v25 = vsub.f32 %v6412_v42, %v6420_v62 }
0x1338   :  { %v6422_v13 = vmul.f32 1.442695, %v6421_v25 }
0x133a   :  { %9081 = vpow2.f32 %v6422_v13 }
0x1344   :  { %v9082_v45 = vpop.eup %9081 }
0x1345   :  { %v6424_v63 = vsel %vm6411_vm4, %v9082_v45, 0.0 }
0x1346   :  { %v6425_v39 = vsel %vm6413_vm5, %v6424_v63, 0.0 }
0x1347   :  { %v6426_v33 = vrot.slane %v6425_v39, 4 }
0x1349   :  { %v6427_v58 = vadd.f32 %v6426_v33, %v6425_v39 }
0x134b   :  { %v6428_v0 = vrot.slane %v6427_v58, 2 }
0x134d   :  { %v6429_v41 = vadd.f32 %v6428_v0, %v6427_v58 }
0x134f   :  { %v6430_v40 = vrot.slane %v6429_v41, 1 }
0x1351   :  { %v6431_v17 = vadd.f32 %v6430_v40, %v6429_v41 }
0x1353   :  { %v6433_v47 = vmul.f32 %v6432_v7, %v6431_v17 }
0x1355   :  { %9083 = vrcp.f32 %v6433_v47 }
0x135f   :  { %v9084_v55 = vpop.eup %9083 }
0x1360   :  { %v6438_v8 = vrot.slane %v9084_v55, %v6437_v50 }
0x1362   :  { %v6439_v2 = vmul.f32 %v6438_v8, %v6424_v63 }
0x1364   :  { %6440 = vxpose.xlu0.b32.start.end [1/1] (short) (narrow) %v6439_v2, 8 }
0x13e4   :  { %v6456_v46 = vpop.trf.xlu0 }
0x13e5   :  { %8300 = vmatmul.mubr.msk.f32.vlgmr.msra.gmra.mrb[102].mxu0 %vm6472_vm6, %v6456_v46 }
0x13e6   :  { %8317 = vmatprep.mubr.msk.f32.mxu0 %vm9135_vm2, %v10691_v56  ;;  %8784 = vmatpush3.bf16.msra.mxu0 %v8783_v20 }
0x14b8   :  { %v6542_v57 = vpop.f32.mrb[102].mxu0 }
0x14b9   :  { %v8301_v12 = vpop.f32.mrb[103].mxu0  ;;  %8311 = vmatmul.mubr.msk.f32.vlgmr.msra.gmra.mrb[98].mxu1 %vm69_vm0, %v6542_v57 }
0x158c   :  { %v6619_v44 = vpop.f32.mrb[98].mxu1 }
0x158d   :  { %v8312_v59 = vpop.f32.mrb[99].mxu1  ;;  %8318 = vmatmul.mubr.msk.f32.vlgmr.msra.gmra.mrb[104].mxu0 %vm6627_vm7, %v6619_v44  ;;  %6624 = vst.msk [vmem:[#allocation4] sm:$0x3] %vm6623_vm8, %v6619_v44 }
0x158e   :  { %9096 = shalt.err (!%p9093_p4)
}
0x158f   :  { %s9097_s7 = scalar_lea.hbm %s10669_s17, 32 }
0x1590   :  { %p9098_p5 = scmp.ne.s32.totalorder %s10669_s17, %s9097_s7  ;;  %p9101_p6 = scmp.lt.u32.totalorder %s9097_s7, %s10669_s17 }
0x1592   :  { %p9103_p7 = pnand %p9101_p6, %p9098_p5 }
0x1594   :  { %9106 = shalt.err (!%p9103_p7)
}
0x1595   :  { %6722 = dma.vmem_to_hbm [thread:$0]  %s6720_s22, 32, %s10669_s17, [#allocation5]   ;;  %vm6701_vm0 = vcmask 9216  }
0x1596   :  { %s9138_s27 = smov [#allocation2]  }
0x1597   :  { %s6709_s28 = sshll.u32 %s9138_s27, 4  ;;  %s6710_s28 = int_to_ptr.vmem [resolvable:$true] %s6709_s28 }
0x1598   :  { %s9107_s29 = scalar_lea.vmem %s6710_s28, 32  ;;  %p9112_p9 = scmp.lt.s32.totalorder %s6710_s28, %s6710_s28 }
0x1599   :  { %p9108_p8 = scmp.ne.s32.totalorder %s6710_s28, %s9107_s29  ;;  %p9113_p10 = scmp.lt.s32.totalorder %s9107_s29, %s9107_s29 }
0x159b   :  { %p9114_p11 = por %p9113_p10, %p9112_p9 }
0x159d   :  { %p9115_p12 = pnand %p9114_p11, %p9108_p8 }
0x1660   :  { %v6697_v56 = vpop.f32.mrb[104].mxu0 }
0x1661   :  { %v8319_v11 = vpop.f32.mrb[105].mxu0  ;;  %6702 = vst.msk [vmem:[#allocation2] sm:$0x3] %vm6701_vm0, %v6697_v56 }
0x1662   :  { %9118 = shalt.err (!%p9115_p12)
}
0x1663   :  { %s9119_s0 = scalar_lea.hbm %s10668_s16, 32 }
0x1664   :  { %p9120_p13 = scmp.ne.s32.totalorder %s10668_s16, %s9119_s0  ;;  %p9123_p0 = scmp.lt.u32.totalorder %s9119_s0, %s10668_s16 }
0x1666   :  { %p9125_p1 = pnand %p9123_p0, %p9120_p13 }
0x1668   :  { %9128 = shalt.err (!%p9125_p1)
}
0x1669   :  { %6712 = dma.vmem_to_hbm [thread:$0]  %s6710_s28, 32, %s10668_s16, [#allocation3]  }
0x166a   :  { %9129 = dma.done.wait [#allocation3], 32  }
0x166b   :  { %9130 = vsyncadd [#allocation3], 4294967264 }
0x166c   :  { %9131 = dma.done.wait [#allocation5], 32  }
0x166d   :  { %9132 = vsyncadd [#allocation5], 4294967264 }
0x166e   :  { %6729 = vsyncpa [#allocation3], 1 }
0x166f   :  { %6730 = vsyncpa [#allocation5], 1 }

</bundles_post_ra>
